<compile_context>
chip_gen: v7x
topology: tpu7x:2x2x1
jax: 0.10.0
libtpu: 0.0.40
codegen_flags: <defaults>
</compile_context>

<pallas_src>
import jax
import jax.numpy as jnp
from jax.experimental import pallas as pl
from jax.experimental.pallas import tpu as pltpu

HIDDEN = 256
POOL = 10
PH, PW = 16, 9                      # pooled grid: 160/10 x 90/10
IN_FEATS = PH * PW                  # 144
V_FEATS = 6
OUT_FEATS = 4
H_IN, W_IN = PH * POOL, PW * POOL   # 160, 90


def _round_up(n, m):
    return ((n + m - 1) // m) * m


def _pick_batch_tile(batch, max_tile=128):
    """Adaptive batch tile: <=128 rows, sublane-aligned, >=2 grid steps when
    the batch allows it (keeps both v7x TensorCores busy)."""
    min_steps = 2 if batch >= 16 else 1
    steps = max(pl.cdiv(batch, max_tile), min_steps)
    return _round_up(pl.cdiv(batch, steps), 8)


# --------------------------------------------------------------------------
# Kernel 1: 10x10/10 max pooling from the (tb, 16, 900) contiguous view.
# --------------------------------------------------------------------------
def _pool_kernel(x_ref, o_ref):
    # Height windows: 10 contiguous 90-lane slices folded with elementwise max.
    rm = x_ref[:, :, 0:W_IN]
    for kh in range(1, POOL):
        rm = jnp.maximum(rm, x_ref[:, :, kh * W_IN:(kh + 1) * W_IN])
    # rm: (tb, 16, 90). Width windows are 10 consecutive lanes; accumulate the
    # 9 column maxes in registers and issue a single full-tile store.
    lane = jax.lax.broadcasted_iota(jnp.int32, o_ref.shape, 2)
    pooled = jnp.zeros(o_ref.shape, o_ref.dtype)
    for w in range(PW):
        col = jnp.max(rm[:, :, w * POOL:(w + 1) * POOL], axis=-1, keepdims=True)
        pooled = jnp.where(lane == w, col, pooled)
    o_ref[...] = pooled


# --------------------------------------------------------------------------
# Kernel 2: stem + v_proj (+bias) -> ReLU -> GRUCell -> fc + tanh.
# --------------------------------------------------------------------------
def _cell_kernel(p_ref, v_ref, h_ref,
                 ws_ref, wv_ref, bv_ref,
                 wih_ref, bih_ref, whh_ref, bhh_ref,
                 wfc_ref,
                 out_ref, hnew_ref):
    H = HIDDEN
    a = jnp.dot(p_ref[...], ws_ref[...], preferred_element_type=jnp.float32)
    a = a + jnp.dot(v_ref[...], wv_ref[...], preferred_element_type=jnp.float32)
    a = jnp.maximum(a + bv_ref[...], 0.0)
    # TODO(synk): nn.Dropout treated as identity (eval mode).

    h = h_ref[...]
    gi = jnp.dot(a, wih_ref[...], preferred_element_type=jnp.float32) + bih_ref[...]
    gh = jnp.dot(h, whh_ref[...], preferred_element_type=jnp.float32) + bhh_ref[...]
    r = jax.nn.sigmoid(gi[:, 0:H] + gh[:, 0:H])
    z = jax.nn.sigmoid(gi[:, H:2 * H] + gh[:, H:2 * H])
    n = jnp.tanh(gi[:, 2 * H:3 * H] + r * gh[:, 2 * H:3 * H])
    h_new = (1.0 - z) * n + z * h
    hnew_ref[...] = h_new

    out_ref[...] = jnp.tanh(
        jnp.dot(h_new, wfc_ref[...], preferred_element_type=jnp.float32))


# --------------------------------------------------------------------------
# Wrapper
# --------------------------------------------------------------------------
def model_forward(x, v, packed, hx=None, *, max_batch_tile=128):
    """x: (B, 1, 160, 90) f32 NCHW; v: (B, 6) f32; packed: pack_params(...)."""
    B = x.shape[0]
    # Contiguous regrouping of the NCHW buffer (row h of the image = lanes
    # [ (h%10)*90 : (h%10)*90+90 ) of pooled-row h//10).  If the caller keeps
    # x in this layout upstream the reshape is a no-op.
    x3 = x.reshape(B, PH, POOL * W_IN)
    v = v.astype(jnp.float32)
    if hx is None:
        hx = jnp.zeros((B, HIDDEN), jnp.float32)

    tb = _pick_batch_tile(B, max_batch_tile)
    grid = (pl.cdiv(B, tb),)   # last block may overhang B; Pallas clips the DMAs

    pooled = pl.pallas_call(
        _pool_kernel,
        out_shape=jax.ShapeDtypeStruct((B, PH, PW), jnp.float32),
        grid=grid,
        in_specs=[pl.BlockSpec((tb, PH, POOL * W_IN), lambda i: (i, 0, 0))],
        out_specs=pl.BlockSpec((tb, PH, PW), lambda i: (i, 0, 0)),
        compiler_params=pltpu.CompilerParams(
            dimension_semantics=("parallel",),
            vmem_limit_bytes=40 * 1024 * 1024),
    )(x3)

    # Tiny (0.6 KB/row) bridge; flatten order (16,9) matches torch flatten(1).
    pooled_flat = pooled.reshape(B, IN_FEATS)

    wspec = lambda shape: pl.BlockSpec(shape, lambda i: (0, 0))  # VMEM-resident
    out, h_new = pl.pallas_call(
        _cell_kernel,
        out_shape=(jax.ShapeDtypeStruct((B, OUT_FEATS), jnp.float32),
                   jax.ShapeDtypeStruct((B, HIDDEN), jnp.float32)),
        grid=grid,
        in_specs=[pl.BlockSpec((tb, IN_FEATS), lambda i: (i, 0)),
                  pl.BlockSpec((tb, V_FEATS), lambda i: (i, 0)),
                  pl.BlockSpec((tb, HIDDEN), lambda i: (i, 0)),
                  wspec((IN_FEATS, HIDDEN)),
                  wspec((V_FEATS, HIDDEN)),
                  wspec((1, HIDDEN)),
                  wspec((HIDDEN, 3 * HIDDEN)),
                  wspec((1, 3 * HIDDEN)),
                  wspec((HIDDEN, 3 * HIDDEN)),
                  wspec((1, 3 * HIDDEN)),
                  wspec((HIDDEN, OUT_FEATS))],
        out_specs=(pl.BlockSpec((tb, OUT_FEATS), lambda i: (i, 0)),
                   pl.BlockSpec((tb, HIDDEN), lambda i: (i, 0))),
        # hx buffer reused for the new hidden state (no batch padding, so the
        # alias is always on the caller's buffer; donate hx at the jit boundary
        # to make it truly in-place when stepping the cell repeatedly).
        input_output_aliases={2: 1},
        compiler_params=pltpu.CompilerParams(
            dimension_semantics=("parallel",),
            vmem_limit_bytes=32 * 1024 * 1024),
    )(pooled_flat, v, hx,
      packed["w_stem_t"], packed["w_v_t"], packed["b_v"],
      packed["w_ih_t"], packed["b_ih"],
      packed["w_hh_t"], packed["b_hh"],
      packed["w_fc_t"])

    return out, h_new


# --------------------------------------------------------------------------
# Parameters
# --------------------------------------------------------------------------
def init_params(key):
    """PyTorch-layout params mirroring default Linear / GRUCell init."""
    ks = jax.random.split(key, 8)

    def uni(k, shape, bound):
        return jax.random.uniform(k, shape, jnp.float32, -bound, bound)

    b_stem = 1.0 / jnp.sqrt(float(IN_FEATS))
    b_v = 1.0 / jnp.sqrt(float(V_FEATS))
    b_h = 1.0 / jnp.sqrt(float(HIDDEN))
    return {
        "w_stem": uni(ks[0], (HIDDEN, IN_FEATS), b_stem),    # Linear(144,256,bias=False)
        "w_v": uni(ks[1], (HIDDEN, V_FEATS), b_v),           # Linear(6,256)
        "b_v": uni(ks[2], (HIDDEN,), b_v),
        "w_ih": uni(ks[3], (3 * HIDDEN, HIDDEN), b_h),       # GRUCell(256,256)
        "b_ih": uni(ks[4], (3 * HIDDEN,), b_h),
        "w_hh": uni(ks[5], (3 * HIDDEN, HIDDEN), b_h),
        "b_hh": uni(ks[6], (3 * HIDDEN,), b_h),
        "w_fc": uni(ks[7], (OUT_FEATS, HIDDEN), b_h) * 0.01,  # Linear(256,4,bias=False)*0.01
    }


def pack_params(params):
    """One-time repack into the kernels' (K, N) layouts (NOT done per call)."""
    return {
        "w_stem_t": params["w_stem"].T,                      # (144, 256)
        "w_v_t": params["w_v"].T,                            # (6, 256)
        "b_v": params["b_v"].reshape(1, HIDDEN),
        "w_ih_t": params["w_ih"].T,                          # (256, 768)
        "b_ih": params["b_ih"].reshape(1, 3 * HIDDEN),
        "w_hh_t": params["w_hh"].T,                          # (256, 768)
        "b_hh": params["b_hh"].reshape(1, 3 * HIDDEN),
        "w_fc_t": params["w_fc"].T,                          # (256, 4)
    }


# --------------------------------------------------------------------------
# Pure-JAX reference for correctness checking
# --------------------------------------------------------------------------
def _reference_forward(x, v, params, hx=None):
    B = x.shape[0]
    pooled = x.reshape(B, 1, PH, POOL, PW, POOL).max(axis=(3, 5)).reshape(B, -1)
    a = jax.nn.relu(pooled @ params["w_stem"].T
                    + v @ params["w_v"].T + params["b_v"])
    h = jnp.zeros((B, HIDDEN), jnp.float32) if hx is None else hx
    gi = a @ params["w_ih"].T + params["b_ih"]
    gh = h @ params["w_hh"].T + params["b_hh"]
    H = HIDDEN
    r = jax.nn.sigmoid(gi[:, :H] + gh[:, :H])
    z = jax.nn.sigmoid(gi[:, H:2 * H] + gh[:, H:2 * H])
    n = jnp.tanh(gi[:, 2 * H:] + r * gh[:, 2 * H:])
    h_new = (1 - z) * n + z * h
    return jnp.tanh(h_new @ params["w_fc"].T), h_new


if __name__ == "__main__":
    key = jax.random.PRNGKey(0)
    kp, kx, kv = jax.random.split(key, 3)
    params = init_params(kp)
    packed = pack_params(params)

    B = 2
    x = jax.random.normal(kx, (B, 1, H_IN, W_IN), jnp.float32)   # NCHW
    v = jax.random.normal(kv, (B, V_FEATS), jnp.float32)

    fwd = jax.jit(model_forward)
    out1, hx1 = fwd(x, v, packed)          # hx defaults to zeros
    out2, hx2 = fwd(x, v, packed, hx1)     # second recurrent step
    jax.block_until_ready((out1, hx1, out2, hx2))

    ref_out1, ref_hx1 = _reference_forward(x, v, params)
    ref_out2, ref_hx2 = _reference_forward(x, v, params, ref_hx1)

    assert out1.shape == (B, OUT_FEATS) and hx1.shape == (B, HIDDEN)
    for got, ref in ((out1, ref_out1), (hx1, ref_hx1),
                     (out2, ref_out2), (hx2, ref_hx2)):
        assert jnp.allclose(got, ref, atol=1e-3, rtol=1e-3), \
            float(jnp.max(jnp.abs(got - ref)))

    print("KERNEL_OK")
</pallas_src>

<mosaic_0001>
module attributes {stable_mosaic.version = 11 : i64} {
  func.func @_pool_kernel(%arg0: i32, %arg1: memref<8x16x900xf32, #tpu.memory_space<vmem>>, %arg2: memref<8x16x9xf32, #tpu.memory_space<vmem>>) attributes {dimension_semantics = [#tpu.dimension_semantics<parallel>], iteration_bounds = array<i64: 1>, scalar_prefetch = 0 : i64, scratch_operands = 0 : i64, tpu.core_type = #tpu.core_type<tc>, window_params = [{transform_indices = @transform_0, window_bounds = array<i64: 8, 16, 900>}, {transform_indices = @transform_1, window_bounds = array<i64: 8, 16, 9>}]} {
    %c0 = arith.constant 0 : index
    %c0_0 = arith.constant 0 : index
    %c0_1 = arith.constant 0 : index
    %0 = vector.load %arg1[%c0, %c0_0, %c0_1] : memref<8x16x900xf32, #tpu.memory_space<vmem>>, vector<8x16x90xf32>
    %c0_2 = arith.constant 0 : index
    %c0_3 = arith.constant 0 : index
    %c90 = arith.constant 90 : index
    %1 = vector.load %arg1[%c0_2, %c0_3, %c90] : memref<8x16x900xf32, #tpu.memory_space<vmem>>, vector<8x16x90xf32>
    %2 = arith.maximumf %0, %1 : vector<8x16x90xf32>
    %c0_4 = arith.constant 0 : index
    %c0_5 = arith.constant 0 : index
    %c180 = arith.constant 180 : index
    %3 = vector.load %arg1[%c0_4, %c0_5, %c180] : memref<8x16x900xf32, #tpu.memory_space<vmem>>, vector<8x16x90xf32>
    %4 = arith.maximumf %2, %3 : vector<8x16x90xf32>
    %c0_6 = arith.constant 0 : index
    %c0_7 = arith.constant 0 : index
    %c270 = arith.constant 270 : index
    %5 = vector.load %arg1[%c0_6, %c0_7, %c270] : memref<8x16x900xf32, #tpu.memory_space<vmem>>, vector<8x16x90xf32>
    %6 = arith.maximumf %4, %5 : vector<8x16x90xf32>
    %c0_8 = arith.constant 0 : index
    %c0_9 = arith.constant 0 : index
    %c360 = arith.constant 360 : index
    %7 = vector.load %arg1[%c0_8, %c0_9, %c360] : memref<8x16x900xf32, #tpu.memory_space<vmem>>, vector<8x16x90xf32>
    %8 = arith.maximumf %6, %7 : vector<8x16x90xf32>
    %c0_10 = arith.constant 0 : index
    %c0_11 = arith.constant 0 : index
    %c450 = arith.constant 450 : index
    %9 = vector.load %arg1[%c0_10, %c0_11, %c450] : memref<8x16x900xf32, #tpu.memory_space<vmem>>, vector<8x16x90xf32>
    %10 = arith.maximumf %8, %9 : vector<8x16x90xf32>
    %c0_12 = arith.constant 0 : index
    %c0_13 = arith.constant 0 : index
    %c540 = arith.constant 540 : index
    %11 = vector.load %arg1[%c0_12, %c0_13, %c540] : memref<8x16x900xf32, #tpu.memory_space<vmem>>, vector<8x16x90xf32>
    %12 = arith.maximumf %10, %11 : vector<8x16x90xf32>
    %c0_14 = arith.constant 0 : index
    %c0_15 = arith.constant 0 : index
    %c630 = arith.constant 630 : index
    %13 = vector.load %arg1[%c0_14, %c0_15, %c630] : memref<8x16x900xf32, #tpu.memory_space<vmem>>, vector<8x16x90xf32>
    %14 = arith.maximumf %12, %13 : vector<8x16x90xf32>
    %c0_16 = arith.constant 0 : index
    %c0_17 = arith.constant 0 : index
    %c720 = arith.constant 720 : index
    %15 = vector.load %arg1[%c0_16, %c0_17, %c720] : memref<8x16x900xf32, #tpu.memory_space<vmem>>, vector<8x16x90xf32>
    %16 = arith.maximumf %14, %15 : vector<8x16x90xf32>
    %c0_18 = arith.constant 0 : index
    %c0_19 = arith.constant 0 : index
    %c810 = arith.constant 810 : index
    %17 = vector.load %arg1[%c0_18, %c0_19, %c810] : memref<8x16x900xf32, #tpu.memory_space<vmem>>, vector<8x16x90xf32>
    %18 = arith.maximumf %16, %17 : vector<8x16x90xf32>
    %19 = tpu.iota {dimensions = array<i32: 2>} : vector<8x16x9xi32>
    %cst = arith.constant 0.000000e+00 : f32
    %20 = vector.broadcast %cst : f32 to vector<8x16x9xf32>
    %21 = vector.extract_strided_slice %18 {offsets = [0, 0, 0], sizes = [8, 16, 10], strides = [1, 1, 1]} : vector<8x16x90xf32> to vector<8x16x10xf32>
    %cst_20 = arith.constant dense<0xFF800000> : vector<8x16xf32>
    %22 = vector.multi_reduction <maximumf>, %21, %cst_20 [2] : vector<8x16x10xf32> to vector<8x16xf32>
    %23 = vector.shape_cast %22 : vector<8x16xf32> to vector<8x16x1xf32>
    %c0_i32 = arith.constant 0 : i32
    %24 = vector.broadcast %c0_i32 : i32 to vector<8x16x9xi32>
    %25 = arith.cmpi eq, %19, %24 : vector<8x16x9xi32>
    %26 = vector.shape_cast %23 : vector<8x16x1xf32> to vector<8x16x1xf32>
    %27 = vector.broadcast %26 : vector<8x16x1xf32> to vector<8x16x9xf32>
    %28 = arith.select %25, %27, %20 : vector<8x16x9xi1>, vector<8x16x9xf32>
    %29 = vector.extract_strided_slice %18 {offsets = [0, 0, 10], sizes = [8, 16, 10], strides = [1, 1, 1]} : vector<8x16x90xf32> to vector<8x16x10xf32>
    %cst_21 = arith.constant dense<0xFF800000> : vector<8x16xf32>
    %30 = vector.multi_reduction <maximumf>, %29, %cst_21 [2] : vector<8x16x10xf32> to vector<8x16xf32>
    %31 = vector.shape_cast %30 : vector<8x16xf32> to vector<8x16x1xf32>
    %c1_i32 = arith.constant 1 : i32
    %32 = vector.broadcast %c1_i32 : i32 to vector<8x16x9xi32>
    %33 = arith.cmpi eq, %19, %32 : vector<8x16x9xi32>
    %34 = vector.shape_cast %31 : vector<8x16x1xf32> to vector<8x16x1xf32>
    %35 = vector.broadcast %34 : vector<8x16x1xf32> to vector<8x16x9xf32>
    %36 = arith.select %33, %35, %28 : vector<8x16x9xi1>, vector<8x16x9xf32>
    %37 = vector.extract_strided_slice %18 {offsets = [0, 0, 20], sizes = [8, 16, 10], strides = [1, 1, 1]} : vector<8x16x90xf32> to vector<8x16x10xf32>
    %cst_22 = arith.constant dense<0xFF800000> : vector<8x16xf32>
    %38 = vector.multi_reduction <maximumf>, %37, %cst_22 [2] : vector<8x16x10xf32> to vector<8x16xf32>
    %39 = vector.shape_cast %38 : vector<8x16xf32> to vector<8x16x1xf32>
    %c2_i32 = arith.constant 2 : i32
    %40 = vector.broadcast %c2_i32 : i32 to vector<8x16x9xi32>
    %41 = arith.cmpi eq, %19, %40 : vector<8x16x9xi32>
    %42 = vector.shape_cast %39 : vector<8x16x1xf32> to vector<8x16x1xf32>
    %43 = vector.broadcast %42 : vector<8x16x1xf32> to vector<8x16x9xf32>
    %44 = arith.select %41, %43, %36 : vector<8x16x9xi1>, vector<8x16x9xf32>
    %45 = vector.extract_strided_slice %18 {offsets = [0, 0, 30], sizes = [8, 16, 10], strides = [1, 1, 1]} : vector<8x16x90xf32> to vector<8x16x10xf32>
    %cst_23 = arith.constant dense<0xFF800000> : vector<8x16xf32>
    %46 = vector.multi_reduction <maximumf>, %45, %cst_23 [2] : vector<8x16x10xf32> to vector<8x16xf32>
    %47 = vector.shape_cast %46 : vector<8x16xf32> to vector<8x16x1xf32>
    %c3_i32 = arith.constant 3 : i32
    %48 = vector.broadcast %c3_i32 : i32 to vector<8x16x9xi32>
    %49 = arith.cmpi eq, %19, %48 : vector<8x16x9xi32>
    %50 = vector.shape_cast %47 : vector<8x16x1xf32> to vector<8x16x1xf32>
    %51 = vector.broadcast %50 : vector<8x16x1xf32> to vector<8x16x9xf32>
    %52 = arith.select %49, %51, %44 : vector<8x16x9xi1>, vector<8x16x9xf32>
    %53 = vector.extract_strided_slice %18 {offsets = [0, 0, 40], sizes = [8, 16, 10], strides = [1, 1, 1]} : vector<8x16x90xf32> to vector<8x16x10xf32>
    %cst_24 = arith.constant dense<0xFF800000> : vector<8x16xf32>
    %54 = vector.multi_reduction <maximumf>, %53, %cst_24 [2] : vector<8x16x10xf32> to vector<8x16xf32>
    %55 = vector.shape_cast %54 : vector<8x16xf32> to vector<8x16x1xf32>
    %c4_i32 = arith.constant 4 : i32
    %56 = vector.broadcast %c4_i32 : i32 to vector<8x16x9xi32>
    %57 = arith.cmpi eq, %19, %56 : vector<8x16x9xi32>
    %58 = vector.shape_cast %55 : vector<8x16x1xf32> to vector<8x16x1xf32>
    %59 = vector.broadcast %58 : vector<8x16x1xf32> to vector<8x16x9xf32>
    %60 = arith.select %57, %59, %52 : vector<8x16x9xi1>, vector<8x16x9xf32>
    %61 = vector.extract_strided_slice %18 {offsets = [0, 0, 50], sizes = [8, 16, 10], strides = [1, 1, 1]} : vector<8x16x90xf32> to vector<8x16x10xf32>
    %cst_25 = arith.constant dense<0xFF800000> : vector<8x16xf32>
    %62 = vector.multi_reduction <maximumf>, %61, %cst_25 [2] : vector<8x16x10xf32> to vector<8x16xf32>
    %63 = vector.shape_cast %62 : vector<8x16xf32> to vector<8x16x1xf32>
    %c5_i32 = arith.constant 5 : i32
    %64 = vector.broadcast %c5_i32 : i32 to vector<8x16x9xi32>
    %65 = arith.cmpi eq, %19, %64 : vector<8x16x9xi32>
    %66 = vector.shape_cast %63 : vector<8x16x1xf32> to vector<8x16x1xf32>
    %67 = vector.broadcast %66 : vector<8x16x1xf32> to vector<8x16x9xf32>
    %68 = arith.select %65, %67, %60 : vector<8x16x9xi1>, vector<8x16x9xf32>
    %69 = vector.extract_strided_slice %18 {offsets = [0, 0, 60], sizes = [8, 16, 10], strides = [1, 1, 1]} : vector<8x16x90xf32> to vector<8x16x10xf32>
    %cst_26 = arith.constant dense<0xFF800000> : vector<8x16xf32>
    %70 = vector.multi_reduction <maximumf>, %69, %cst_26 [2] : vector<8x16x10xf32> to vector<8x16xf32>
    %71 = vector.shape_cast %70 : vector<8x16xf32> to vector<8x16x1xf32>
    %c6_i32 = arith.constant 6 : i32
    %72 = vector.broadcast %c6_i32 : i32 to vector<8x16x9xi32>
    %73 = arith.cmpi eq, %19, %72 : vector<8x16x9xi32>
    %74 = vector.shape_cast %71 : vector<8x16x1xf32> to vector<8x16x1xf32>
    %75 = vector.broadcast %74 : vector<8x16x1xf32> to vector<8x16x9xf32>
    %76 = arith.select %73, %75, %68 : vector<8x16x9xi1>, vector<8x16x9xf32>
    %77 = vector.extract_strided_slice %18 {offsets = [0, 0, 70], sizes = [8, 16, 10], strides = [1, 1, 1]} : vector<8x16x90xf32> to vector<8x16x10xf32>
    %cst_27 = arith.constant dense<0xFF800000> : vector<8x16xf32>
    %78 = vector.multi_reduction <maximumf>, %77, %cst_27 [2] : vector<8x16x10xf32> to vector<8x16xf32>
    %79 = vector.shape_cast %78 : vector<8x16xf32> to vector<8x16x1xf32>
    %c7_i32 = arith.constant 7 : i32
    %80 = vector.broadcast %c7_i32 : i32 to vector<8x16x9xi32>
    %81 = arith.cmpi eq, %19, %80 : vector<8x16x9xi32>
    %82 = vector.shape_cast %79 : vector<8x16x1xf32> to vector<8x16x1xf32>
    %83 = vector.broadcast %82 : vector<8x16x1xf32> to vector<8x16x9xf32>
    %84 = arith.select %81, %83, %76 : vector<8x16x9xi1>, vector<8x16x9xf32>
    %85 = vector.extract_strided_slice %18 {offsets = [0, 0, 80], sizes = [8, 16, 10], strides = [1, 1, 1]} : vector<8x16x90xf32> to vector<8x16x10xf32>
    %cst_28 = arith.constant dense<0xFF800000> : vector<8x16xf32>
    %86 = vector.multi_reduction <maximumf>, %85, %cst_28 [2] : vector<8x16x10xf32> to vector<8x16xf32>
    %87 = vector.shape_cast %86 : vector<8x16xf32> to vector<8x16x1xf32>
    %c8_i32 = arith.constant 8 : i32
    %88 = vector.broadcast %c8_i32 : i32 to vector<8x16x9xi32>
    %89 = arith.cmpi eq, %19, %88 : vector<8x16x9xi32>
    %90 = vector.shape_cast %87 : vector<8x16x1xf32> to vector<8x16x1xf32>
    %91 = vector.broadcast %90 : vector<8x16x1xf32> to vector<8x16x9xf32>
    %92 = arith.select %89, %91, %84 : vector<8x16x9xi1>, vector<8x16x9xf32>
    %c0_29 = arith.constant 0 : index
    %c0_30 = arith.constant 0 : index
    %c0_31 = arith.constant 0 : index
    %93 = vector.load %arg2[%c0_29, %c0_30, %c0_31] : memref<8x16x9xf32, #tpu.memory_space<vmem>>, vector<8x16x9xf32>
    tpu.vector_store %arg2[%c0_29, %c0_30, %c0_31], %92 {strides = array<i32>} : memref<8x16x9xf32, #tpu.memory_space<vmem>>, vector<8x16x9xf32>,
    return
  }
  func.func @transform_0(%arg0: i32) -> (i32, i32, i32) {
    %c0_i32 = arith.constant 0 : i32
    %c0_i32_0 = arith.constant 0 : i32
    %c0_i32_1 = arith.constant 0 : i32
    return %arg0, %c0_i32, %c0_i32_0 : i32, i32, i32
  }
  func.func @transform_1(%arg0: i32) -> (i32, i32, i32) {
    %c0_i32 = arith.constant 0 : i32
    %c0_i32_0 = arith.constant 0 : i32
    %c0_i32_1 = arith.constant 0 : i32
    return %arg0, %c0_i32, %c0_i32_0 : i32, i32, i32
  }
}

module attributes {stable_mosaic.version = 11 : i64} {
  func.func @_cell_kernel(%arg0: i32, %arg1: memref<8x144xf32, #tpu.memory_space<vmem>>, %arg2: memref<8x6xf32, #tpu.memory_space<vmem>>, %arg3: memref<8x256xf32, #tpu.memory_space<vmem>>, %arg4: memref<144x256xf32, #tpu.memory_space<vmem>>, %arg5: memref<6x256xf32, #tpu.memory_space<vmem>>, %arg6: memref<1x256xf32, #tpu.memory_space<vmem>>, %arg7: memref<256x768xf32, #tpu.memory_space<vmem>>, %arg8: memref<1x768xf32, #tpu.memory_space<vmem>>, %arg9: memref<256x768xf32, #tpu.memory_space<vmem>>, %arg10: memref<1x768xf32, #tpu.memory_space<vmem>>, %arg11: memref<256x4xf32, #tpu.memory_space<vmem>>, %arg12: memref<8x4xf32, #tpu.memory_space<vmem>>, %arg13: memref<8x256xf32, #tpu.memory_space<vmem>>) attributes {dimension_semantics = [#tpu.dimension_semantics<parallel>], iteration_bounds = array<i64: 1>, scalar_prefetch = 0 : i64, scratch_operands = 0 : i64, tpu.core_type = #tpu.core_type<tc>, window_params = [{transform_indices = @transform_0, window_bounds = array<i64: 8, 144>}, {transform_indices = @transform_1, window_bounds = array<i64: 8, 6>}, {transform_indices = @transform_2, window_bounds = array<i64: 8, 256>}, {pipeline_mode = #tpu.pipeline_mode<synchronous>, transform_indices = @transform_3, window_bounds = array<i64: 144, 256>}, {pipeline_mode = #tpu.pipeline_mode<synchronous>, transform_indices = @transform_4, window_bounds = array<i64: 6, 256>}, {pipeline_mode = #tpu.pipeline_mode<synchronous>, transform_indices = @transform_5, window_bounds = array<i64: 1, 256>}, {pipeline_mode = #tpu.pipeline_mode<synchronous>, transform_indices = @transform_6, window_bounds = array<i64: 256, 768>}, {pipeline_mode = #tpu.pipeline_mode<synchronous>, transform_indices = @transform_7, window_bounds = array<i64: 1, 768>}, {pipeline_mode = #tpu.pipeline_mode<synchronous>, transform_indices = @transform_8, window_bounds = array<i64: 256, 768>}, {pipeline_mode = #tpu.pipeline_mode<synchronous>, transform_indices = @transform_9, window_bounds = array<i64: 1, 768>}, {pipeline_mode = #tpu.pipeline_mode<synchronous>, transform_indices = @transform_10, window_bounds = array<i64: 256, 4>}, {transform_indices = @transform_11, window_bounds = array<i64: 8, 4>}, {transform_indices = @transform_12, window_bounds = array<i64: 8, 256>}]} {
    %c0 = arith.constant 0 : index
    %c0_0 = arith.constant 0 : index
    %0 = vector.load %arg1[%c0, %c0_0] : memref<8x144xf32, #tpu.memory_space<vmem>>, vector<8x144xf32>
    %c0_1 = arith.constant 0 : index
    %c0_2 = arith.constant 0 : index
    %1 = vector.load %arg4[%c0_1, %c0_2] : memref<144x256xf32, #tpu.memory_space<vmem>>, vector<144x256xf32>
    %cst = arith.constant dense<0.000000e+00> : vector<8x256xf32>
    %2 = tpu.matmul %0, %1, %cst {dimension_numbers = #tpu.dot_dimension_numbers<[1], [0], [0], [1], [0, 0, 1, 1], [], []>} : vector<8x144xf32>, vector<144x256xf32>, vector<8x256xf32> -> vector<8x256xf32>
    %c0_3 = arith.constant 0 : index
    %c0_4 = arith.constant 0 : index
    %3 = vector.load %arg2[%c0_3, %c0_4] : memref<8x6xf32, #tpu.memory_space<vmem>>, vector<8x6xf32>
    %c0_5 = arith.constant 0 : index
    %c0_6 = arith.constant 0 : index
    %4 = vector.load %arg5[%c0_5, %c0_6] : memref<6x256xf32, #tpu.memory_space<vmem>>, vector<6x256xf32>
    %cst_7 = arith.constant dense<0.000000e+00> : vector<8x256xf32>
    %5 = tpu.matmul %3, %4, %cst_7 {dimension_numbers = #tpu.dot_dimension_numbers<[1], [0], [0], [1], [0, 0, 1, 1], [], []>} : vector<8x6xf32>, vector<6x256xf32>, vector<8x256xf32> -> vector<8x256xf32>
    %6 = arith.addf %2, %5 : vector<8x256xf32>
    %c0_8 = arith.constant 0 : index
    %c0_9 = arith.constant 0 : index
    %7 = vector.load %arg6[%c0_8, %c0_9] : memref<1x256xf32, #tpu.memory_space<vmem>>, vector<1x256xf32>
    %8 = vector.broadcast %7 : vector<1x256xf32> to vector<8x256xf32>
    %9 = arith.addf %6, %8 : vector<8x256xf32>
    %cst_10 = arith.constant 0.000000e+00 : f32
    %10 = vector.broadcast %cst_10 : f32 to vector<8x256xf32>
    %11 = arith.maximumf %9, %10 : vector<8x256xf32>
    %c0_11 = arith.constant 0 : index
    %c0_12 = arith.constant 0 : index
    %12 = vector.load %arg3[%c0_11, %c0_12] : memref<8x256xf32, #tpu.memory_space<vmem>>, vector<8x256xf32>
    %c0_13 = arith.constant 0 : index
    %c0_14 = arith.constant 0 : index
    %13 = vector.load %arg7[%c0_13, %c0_14] : memref<256x768xf32, #tpu.memory_space<vmem>>, vector<256x768xf32>
    %cst_15 = arith.constant dense<0.000000e+00> : vector<8x768xf32>
    %14 = tpu.matmul %11, %13, %cst_15 {dimension_numbers = #tpu.dot_dimension_numbers<[1], [0], [0], [1], [0, 0, 1, 1], [], []>} : vector<8x256xf32>, vector<256x768xf32>, vector<8x768xf32> -> vector<8x768xf32>
    %c0_16 = arith.constant 0 : index
    %c0_17 = arith.constant 0 : index
    %15 = vector.load %arg8[%c0_16, %c0_17] : memref<1x768xf32, #tpu.memory_space<vmem>>, vector<1x768xf32>
    %16 = vector.broadcast %15 : vector<1x768xf32> to vector<8x768xf32>
    %17 = arith.addf %14, %16 : vector<8x768xf32>
    %c0_18 = arith.constant 0 : index
    %c0_19 = arith.constant 0 : index
    %18 = vector.load %arg9[%c0_18, %c0_19] : memref<256x768xf32, #tpu.memory_space<vmem>>, vector<256x768xf32>
    %cst_20 = arith.constant dense<0.000000e+00> : vector<8x768xf32>
    %19 = tpu.matmul %12, %18, %cst_20 {dimension_numbers = #tpu.dot_dimension_numbers<[1], [0], [0], [1], [0, 0, 1, 1], [], []>} : vector<8x256xf32>, vector<256x768xf32>, vector<8x768xf32> -> vector<8x768xf32>
    %c0_21 = arith.constant 0 : index
    %c0_22 = arith.constant 0 : index
    %20 = vector.load %arg10[%c0_21, %c0_22] : memref<1x768xf32, #tpu.memory_space<vmem>>, vector<1x768xf32>
    %21 = vector.broadcast %20 : vector<1x768xf32> to vector<8x768xf32>
    %22 = arith.addf %19, %21 : vector<8x768xf32>
    %23 = vector.extract_strided_slice %17 {offsets = [0, 0], sizes = [8, 256], strides = [1, 1]} : vector<8x768xf32> to vector<8x256xf32>
    %24 = vector.extract_strided_slice %22 {offsets = [0, 0], sizes = [8, 256], strides = [1, 1]} : vector<8x768xf32> to vector<8x256xf32>
    %25 = arith.addf %23, %24 : vector<8x256xf32>
    %26 = arith.negf %25 : vector<8x256xf32>
    %27 = math.exp %26 : vector<8x256xf32>
    %cst_23 = arith.constant 1.000000e+00 : f32
    %28 = vector.broadcast %cst_23 : f32 to vector<8x256xf32>
    %29 = arith.addf %28, %27 : vector<8x256xf32>
    %30 = arith.divf %28, %29 : vector<8x256xf32>
    %31 = vector.extract_strided_slice %17 {offsets = [0, 256], sizes = [8, 256], strides = [1, 1]} : vector<8x768xf32> to vector<8x256xf32>
    %32 = vector.extract_strided_slice %22 {offsets = [0, 256], sizes = [8, 256], strides = [1, 1]} : vector<8x768xf32> to vector<8x256xf32>
    %33 = arith.addf %31, %32 : vector<8x256xf32>
    %34 = arith.negf %33 : vector<8x256xf32>
    %35 = math.exp %34 : vector<8x256xf32>
    %cst_24 = arith.constant 1.000000e+00 : f32
    %36 = vector.broadcast %cst_24 : f32 to vector<8x256xf32>
    %37 = arith.addf %36, %35 : vector<8x256xf32>
    %38 = arith.divf %36, %37 : vector<8x256xf32>
    %39 = vector.extract_strided_slice %17 {offsets = [0, 512], sizes = [8, 256], strides = [1, 1]} : vector<8x768xf32> to vector<8x256xf32>
    %40 = vector.extract_strided_slice %22 {offsets = [0, 512], sizes = [8, 256], strides = [1, 1]} : vector<8x768xf32> to vector<8x256xf32>
    %41 = arith.mulf %30, %40 : vector<8x256xf32>
    %42 = arith.addf %39, %41 : vector<8x256xf32>
    %43 = math.tanh %42 : vector<8x256xf32>
    %cst_25 = arith.constant 1.000000e+00 : f32
    %44 = vector.broadcast %cst_25 : f32 to vector<8x256xf32>
    %45 = arith.subf %44, %38 : vector<8x256xf32>
    %46 = arith.mulf %45, %43 : vector<8x256xf32>
    %47 = arith.mulf %38, %12 : vector<8x256xf32>
    %48 = arith.addf %46, %47 : vector<8x256xf32>
    %c0_26 = arith.constant 0 : index
    %c0_27 = arith.constant 0 : index
    %49 = vector.load %arg13[%c0_26, %c0_27] : memref<8x256xf32, #tpu.memory_space<vmem>>, vector<8x256xf32>
    tpu.vector_store %arg13[%c0_26, %c0_27], %48 {strides = array<i32>} : memref<8x256xf32, #tpu.memory_space<vmem>>, vector<8x256xf32>,
    %c0_28 = arith.constant 0 : index
    %c0_29 = arith.constant 0 : index
    %50 = vector.load %arg11[%c0_28, %c0_29] : memref<256x4xf32, #tpu.memory_space<vmem>>, vector<256x4xf32>
    %cst_30 = arith.constant dense<0.000000e+00> : vector<8x4xf32>
    %51 = tpu.matmul %48, %50, %cst_30 {dimension_numbers = #tpu.dot_dimension_numbers<[1], [0], [0], [1], [0, 0, 1, 1], [], []>} : vector<8x256xf32>, vector<256x4xf32>, vector<8x4xf32> -> vector<8x4xf32>
    %52 = math.tanh %51 : vector<8x4xf32>
    %c0_31 = arith.constant 0 : index
    %c0_32 = arith.constant 0 : index
    %53 = vector.load %arg12[%c0_31, %c0_32] : memref<8x4xf32, #tpu.memory_space<vmem>>, vector<8x4xf32>
    tpu.vector_store %arg12[%c0_31, %c0_32], %52 {strides = array<i32>} : memref<8x4xf32, #tpu.memory_space<vmem>>, vector<8x4xf32>,
    return
  }
  func.func @transform_0(%arg0: i32) -> (i32, i32) {
    %c0_i32 = arith.constant 0 : i32
    %c0_i32_0 = arith.constant 0 : i32
    return %arg0, %c0_i32 : i32, i32
  }
  func.func @transform_1(%arg0: i32) -> (i32, i32) {
    %c0_i32 = arith.constant 0 : i32
    %c0_i32_0 = arith.constant 0 : i32
    return %arg0, %c0_i32 : i32, i32
  }
  func.func @transform_2(%arg0: i32) -> (i32, i32) {
    %c0_i32 = arith.constant 0 : i32
    %c0_i32_0 = arith.constant 0 : i32
    return %arg0, %c0_i32 : i32, i32
  }
  func.func @transform_3(%arg0: i32) -> (i32, i32) {
    %c0_i32 = arith.constant 0 : i32
    %c0_i32_0 = arith.constant 0 : i32
    %c0_i32_1 = arith.constant 0 : i32
    return %c0_i32, %c0_i32_0 : i32, i32
  }
  func.func @transform_4(%arg0: i32) -> (i32, i32) {
    %c0_i32 = arith.constant 0 : i32
    %c0_i32_0 = arith.constant 0 : i32
    %c0_i32_1 = arith.constant 0 : i32
    return %c0_i32, %c0_i32_0 : i32, i32
  }
  func.func @transform_5(%arg0: i32) -> (i32, i32) {
    %c0_i32 = arith.constant 0 : i32
    %c0_i32_0 = arith.constant 0 : i32
    %c0_i32_1 = arith.constant 0 : i32
    return %c0_i32, %c0_i32_0 : i32, i32
  }
  func.func @transform_6(%arg0: i32) -> (i32, i32) {
    %c0_i32 = arith.constant 0 : i32
    %c0_i32_0 = arith.constant 0 : i32
    %c0_i32_1 = arith.constant 0 : i32
    return %c0_i32, %c0_i32_0 : i32, i32
  }
  func.func @transform_7(%arg0: i32) -> (i32, i32) {
    %c0_i32 = arith.constant 0 : i32
    %c0_i32_0 = arith.constant 0 : i32
    %c0_i32_1 = arith.constant 0 : i32
    return %c0_i32, %c0_i32_0 : i32, i32
  }
  func.func @transform_8(%arg0: i32) -> (i32, i32) {
    %c0_i32 = arith.constant 0 : i32
    %c0_i32_0 = arith.constant 0 : i32
    %c0_i32_1 = arith.constant 0 : i32
    return %c0_i32, %c0_i32_0 : i32, i32
  }
  func.func @transform_9(%arg0: i32) -> (i32, i32) {
    %c0_i32 = arith.constant 0 : i32
    %c0_i32_0 = arith.constant 0 : i32
    %c0_i32_1 = arith.constant 0 : i32
    return %c0_i32, %c0_i32_0 : i32, i32
  }
  func.func @transform_10(%arg0: i32) -> (i32, i32) {
    %c0_i32 = arith.constant 0 : i32
    %c0_i32_0 = arith.constant 0 : i32
    %c0_i32_1 = arith.constant 0 : i32
    return %c0_i32, %c0_i32_0 : i32, i32
  }
  func.func @transform_11(%arg0: i32) -> (i32, i32) {
    %c0_i32 = arith.constant 0 : i32
    %c0_i32_0 = arith.constant 0 : i32
    return %arg0, %c0_i32 : i32, i32
  }
  func.func @transform_12(%arg0: i32) -> (i32, i32) {
    %c0_i32 = arith.constant 0 : i32
    %c0_i32_0 = arith.constant 0 : i32
    return %arg0, %c0_i32 : i32, i32
  }
}

</mosaic_0001>

<bundles_post_ra>
// kernel: model_forward.2
= control target key start
LH: loop header
LB: loop body
LE: loop exit
PB: predicated region body
PF: predicated region fallthrough
CT: control target
= control target key end

     0   :  { %s1872_s10 = smov 38   ;;  %s1873_s17 = smov 76   ;;  %vm136_vm0 = vcmask 310272   ;;  %vm281_vm1 = vcmask 621568   ;;  %vm490_vm2 = vcmask 195584   ;;  %vm635_vm3 = vcmask 506880   ;;  %s4234_s0 = inlined_call_operand.vmem [shape: f32[2,16,900], index: 0, kind: input, shape index: {}]   ;;  %s4235_s1 = inlined_call_operand.vmem [shape: f32[2,16,9], index: 1, kind: output, shape index: {}]  }
   0x1   :  { %v9_v0 = vld [vmem:[%s4234_s0 + $0x40] sm:$0xff]  ;;  %v1902_v2 = vld [vmem:[%s4234_s0 + $0x48] sm:$0xff]  ;;  %v2031_v32 = vld [vmem:[%s4234_s0 + $0x10] sm:$0xff]  ;;  %s1875_s21 = smov 24   ;;  %s1876_s26 = smov 62   ;;  %vm844_vm4 = vcmask 80896  }
   0x2   :  { %v8_v1 = vld [vmem:[%s4234_s0] sm:$0xff]  ;;  %76 = vrot.lane.b32.xlu1 %v9_v0, %s1872_s10  ;;  %v24_v3 = vld [vmem:[%s4234_s0 + $0x8] sm:$0xff]  ;;  %v2039_v33 = vld [vmem:[%s4234_s0 + $0x50] sm:$0xff]  ;;  %s1878_s30 = smov 10   ;;  %s1879_s6 = smov 48   ;;  %vm989_vm5 = vcmask 392192  }
   0x3   :  { %72 = vrot.lane.b32.xlu0 %v8_v1, %s1872_s10  ;;  %v1913_v4 = vld [vmem:[%s4234_s0 + $0x88] sm:$0xff]  ;;  %v10_v5 = vld [vmem:[%s4234_s0 + $0x80] sm:$0xff]  ;;  %v2048_v34 = vld [vmem:[%s4234_s0 + $0x90] sm:$0xff]  ;;  %s1880_s11 = smov 86   ;;  %vm1134_vm6 = vcmask 703488   ;;  %vm1712_vm7 = vcmask 736896  }
   0x4   :  { %v1924_v6 = vld [vmem:[%s4234_s0 + $0xc8] sm:$0xff]  ;;  %v11_v7 = vld [vmem:[%s4234_s0 + $0xc0] sm:$0xff]  ;;  %v2057_v35 = vld [vmem:[%s4234_s0 + $0xd0] sm:$0xff]  ;;  %vm1250_vm8 = vcmask 162896   ;;  %vm1316_vm9 = vcmask 244896   ;;  %vm1382_vm10 = vcmask 326896  }
   0x5   :  { %v28_v8 = vld [vmem:[%s4234_s0 + $0x108] sm:$0xff]  ;;  %v12_v9 = vld [vmem:[%s4234_s0 + $0x100] sm:$0xff]  ;;  %v2066_v36 = vld [vmem:[%s4234_s0 + $0x110] sm:$0xff]  ;;  %vm1448_vm11 = vcmask 408896   ;;  %vm1514_vm12 = vcmask 490896   ;;  %vm1580_vm14 = vcmask 572896  }
   0x6   :  { %78 = vrot.lane.b32.xlu1 %v1902_v2, %s1872_s10  ;;  %v29_v10 = vld [vmem:[%s4234_s0 + $0x148] sm:$0xff]  ;;  %v13_v11 = vld [vmem:[%s4234_s0 + $0x140] sm:$0xff]  ;;  %v2074_v37 = vld [vmem:[%s4234_s0 + $0x150] sm:$0xff] }
   0x7   :  { %74 = vrot.lane.b32.xlu0 %v24_v3, %s1872_s10  ;;  %v30_v12 = vld [vmem:[%s4234_s0 + $0x188] sm:$0xff]  ;;  %v14_v13 = vld [vmem:[%s4234_s0 + $0x180] sm:$0xff]  ;;  %v2082_v38 = vld [vmem:[%s4234_s0 + $0x190] sm:$0xff] }
   0x8   :  { %v31_v14 = vld [vmem:[%s4234_s0 + $0x1c8] sm:$0xff]  ;;  %v15_v15 = vld [vmem:[%s4234_s0 + $0x1c0] sm:$0xff]  ;;  %v2090_v39 = vld [vmem:[%s4234_s0 + $0x1d0] sm:$0xff] }
   0x9   :  { %v32_v16 = vld [vmem:[%s4234_s0 + $0x208] sm:$0xff]  ;;  %v16_v17 = vld [vmem:[%s4234_s0 + $0x200] sm:$0xff]  ;;  %v2098_v40 = vld [vmem:[%s4234_s0 + $0x210] sm:$0xff] }
   0xa   :  { %82 = vrot.lane.b32.xlu1 %v1913_v4, %s1872_s10  ;;  %v33_v18 = vld [vmem:[%s4234_s0 + $0x248] sm:$0xff]  ;;  %v17_v19 = vld [vmem:[%s4234_s0 + $0x240] sm:$0xff]  ;;  %v2106_v41 = vld [vmem:[%s4234_s0 + $0x250] sm:$0xff] }
   0xb   :  { %80 = vrot.lane.b32.xlu0 %v10_v5, %s1872_s10  ;;  %v34_v20 = vld [vmem:[%s4234_s0 + $0x288] sm:$0xff]  ;;  %v18_v21 = vld [vmem:[%s4234_s0 + $0x280] sm:$0xff]  ;;  %v2114_v42 = vld [vmem:[%s4234_s0 + $0x290] sm:$0xff] }
   0xc   :  { %v35_v22 = vld [vmem:[%s4234_s0 + $0x2c8] sm:$0xff]  ;;  %v19_v23 = vld [vmem:[%s4234_s0 + $0x2c0] sm:$0xff]  ;;  %v2122_v43 = vld [vmem:[%s4234_s0 + $0x2d0] sm:$0xff] }
   0xd   :  { %v36_v24 = vld [vmem:[%s4234_s0 + $0x308] sm:$0xff]  ;;  %v20_v25 = vld [vmem:[%s4234_s0 + $0x300] sm:$0xff]  ;;  %v2130_v44 = vld [vmem:[%s4234_s0 + $0x310] sm:$0xff] }
   0xe   :  { %86 = vrot.lane.b32.xlu1 %v1924_v6, %s1872_s10  ;;  %v37_v26 = vld [vmem:[%s4234_s0 + $0x348] sm:$0xff]  ;;  %v21_v27 = vld [vmem:[%s4234_s0 + $0x340] sm:$0xff]  ;;  %v2138_v45 = vld [vmem:[%s4234_s0 + $0x350] sm:$0xff] }
   0xf   :  { %84 = vrot.lane.b32.xlu0 %v11_v7, %s1872_s10  ;;  %v38_v28 = vld [vmem:[%s4234_s0 + $0x388] sm:$0xff]  ;;  %v22_v29 = vld [vmem:[%s4234_s0 + $0x380] sm:$0xff]  ;;  %v2150_v48 = vld [vmem:[%s4234_s0 + $0x390] sm:$0xff] }
  0x10   :  { %v39_v30 = vld [vmem:[%s4234_s0 + $0x3c8] sm:$0xff]  ;;  %v23_v31 = vld [vmem:[%s4234_s0 + $0x3c0] sm:$0xff]  ;;  %v2162_v51 = vld [vmem:[%s4234_s0 + $0x3d0] sm:$0xff] }
  0x12   :  { %90 = vrot.lane.b32.xlu1 %v28_v8, %s1872_s10 }
  0x13   :  { %88 = vrot.lane.b32.xlu0 %v12_v9, %s1872_s10  ;;  %v2235_v9 = vld [vmem:[%s4234_s0 + $0x58] sm:$0xff] }
  0x16   :  { %94 = vrot.lane.b32.xlu1 %v29_v10, %s1872_s10 }
  0x17   :  { %92 = vrot.lane.b32.xlu0 %v13_v11, %s1872_s10 }
  0x1a   :  { %98 = vrot.lane.b32.xlu1 %v30_v12, %s1872_s10 }
  0x1b   :  { %96 = vrot.lane.b32.xlu0 %v14_v13, %s1872_s10 }
  0x1e   :  { %102 = vrot.lane.b32.xlu1 %v31_v14, %s1872_s10 }
  0x1f   :  { %100 = vrot.lane.b32.xlu0 %v15_v15, %s1872_s10  ;;  %v2261_v15 = vld [vmem:[%s4234_s0 + $0xd8] sm:$0xff] }
  0x22   :  { %106 = vrot.lane.b32.xlu1 %v32_v16, %s1872_s10 }
  0x23   :  { %104 = vrot.lane.b32.xlu0 %v16_v17, %s1872_s10 }
  0x26   :  { %110 = vrot.lane.b32.xlu1 %v33_v18, %s1872_s10 }
  0x27   :  { %108 = vrot.lane.b32.xlu0 %v17_v19, %s1872_s10 }
  0x2a   :  { %114 = vrot.lane.b32.xlu1 %v34_v20, %s1872_s10 }
  0x2b   :  { %112 = vrot.lane.b32.xlu0 %v18_v21, %s1872_s10  ;;  %v2287_v21 = vld [vmem:[%s4234_s0 + $0x158] sm:$0xff] }
  0x2e   :  { %118 = vrot.lane.b32.xlu1 %v35_v22, %s1872_s10 }
  0x2f   :  { %116 = vrot.lane.b32.xlu0 %v19_v23, %s1872_s10 }
  0x32   :  { %122 = vrot.lane.b32.xlu1 %v36_v24, %s1872_s10 }
  0x33   :  { %120 = vrot.lane.b32.xlu0 %v20_v25, %s1872_s10 }
  0x36   :  { %126 = vrot.lane.b32.xlu1 %v37_v26, %s1872_s10 }
  0x37   :  { %124 = vrot.lane.b32.xlu0 %v21_v27, %s1872_s10  ;;  %v2313_v27 = vld [vmem:[%s4234_s0 + $0x1d8] sm:$0xff] }
  0x3a   :  { %130 = vrot.lane.b32.xlu1 %v38_v28, %s1872_s10 }
  0x3b   :  { %128 = vrot.lane.b32.xlu0 %v22_v29, %s1872_s10 }
  0x3e   :  { %134 = vrot.lane.b32.xlu1 %v39_v30, %s1872_s10 }
  0x3f   :  { %132 = vrot.lane.b32.xlu0 %v23_v31, %s1872_s10  ;;  %s1874_s10 = smov 114  }
  0x42   :  { %219 = vrot.lane.b32.xlu1 %v2031_v32, %s1873_s17 }
  0x43   :  { %217 = vrot.lane.b32.xlu0 %v24_v3, %s1873_s17 }
  0x46   :  { %223 = vrot.lane.b32.xlu1 %v2039_v33, %s1873_s17 }
  0x47   :  { %221 = vrot.lane.b32.xlu0 %v1902_v2, %s1873_s17 }
  0x4a   :  { %227 = vrot.lane.b32.xlu1 %v2048_v34, %s1873_s17 }
  0x4b   :  { %225 = vrot.lane.b32.xlu0 %v1913_v4, %s1873_s17 }
  0x4e   :  { %231 = vrot.lane.b32.xlu1 %v2057_v35, %s1873_s17 }
  0x4f   :  { %229 = vrot.lane.b32.xlu0 %v1924_v6, %s1873_s17  ;;  %v2222_v6 = vld [vmem:[%s4234_s0 + $0x18] sm:$0xff] }
  0x52   :  { %235 = vrot.lane.b32.xlu1 %v2066_v36, %s1873_s17 }
  0x53   :  { %233 = vrot.lane.b32.xlu0 %v28_v8, %s1873_s17 }
  0x56   :  { %239 = vrot.lane.b32.xlu1 %v2074_v37, %s1873_s17 }
  0x57   :  { %237 = vrot.lane.b32.xlu0 %v29_v10, %s1873_s17 }
  0x5a   :  { %243 = vrot.lane.b32.xlu1 %v2082_v38, %s1873_s17 }
  0x5b   :  { %241 = vrot.lane.b32.xlu0 %v30_v12, %s1873_s17  ;;  %v2248_v12 = vld [vmem:[%s4234_s0 + $0x98] sm:$0xff] }
  0x5e   :  { %247 = vrot.lane.b32.xlu1 %v2090_v39, %s1873_s17 }
  0x5f   :  { %245 = vrot.lane.b32.xlu0 %v31_v14, %s1873_s17 }
  0x62   :  { %251 = vrot.lane.b32.xlu1 %v2098_v40, %s1873_s17 }
  0x63   :  { %249 = vrot.lane.b32.xlu0 %v32_v16, %s1873_s17 }
  0x66   :  { %255 = vrot.lane.b32.xlu1 %v2106_v41, %s1873_s17 }
  0x67   :  { %253 = vrot.lane.b32.xlu0 %v33_v18, %s1873_s17  ;;  %v2274_v18 = vld [vmem:[%s4234_s0 + $0x118] sm:$0xff] }
  0x6a   :  { %259 = vrot.lane.b32.xlu1 %v2114_v42, %s1873_s17 }
  0x6b   :  { %257 = vrot.lane.b32.xlu0 %v34_v20, %s1873_s17 }
  0x6e   :  { %263 = vrot.lane.b32.xlu1 %v2122_v43, %s1873_s17 }
  0x6f   :  { %261 = vrot.lane.b32.xlu0 %v35_v22, %s1873_s17 }
  0x72   :  { %267 = vrot.lane.b32.xlu1 %v2130_v44, %s1873_s17 }
  0x73   :  { %265 = vrot.lane.b32.xlu0 %v36_v24, %s1873_s17  ;;  %v2300_v24 = vld [vmem:[%s4234_s0 + $0x198] sm:$0xff] }
  0x74   :  { %v2140_v46 = vpop.permute.xlu1 %76 }
  0x75   :  { %v2142_v47 = vpop.permute.xlu0 %72 }
  0x76   :  { %271 = vrot.lane.b32.xlu1 %v2138_v45, %s1873_s17 }
  0x77   :  { %269 = vrot.lane.b32.xlu0 %v37_v26, %s1873_s17 }
  0x78   :  { %v2152_v49 = vpop.permute.xlu1 %78 }
  0x79   :  { %v2154_v50 = vpop.permute.xlu0 %74 }
  0x7a   :  { %275 = vrot.lane.b32.xlu1 %v2150_v48, %s1873_s17 }
  0x7b   :  { %273 = vrot.lane.b32.xlu0 %v38_v28, %s1873_s17 }
  0x7c   :  { %v2164_v52 = vpop.permute.xlu1 %82 }
  0x7d   :  { %v2166_v53 = vpop.permute.xlu0 %80 }
  0x7e   :  { %279 = vrot.lane.b32.xlu1 %v2162_v51, %s1873_s17 }
  0x7f   :  { %277 = vrot.lane.b32.xlu0 %v39_v30, %s1873_s17  ;;  %v2326_v30 = vld [vmem:[%s4234_s0 + $0x218] sm:$0xff] }
  0x80   :  { %v2171_v54 = vpop.permute.xlu1 %86 }
  0x81   :  { %v2173_v55 = vpop.permute.xlu0 %84 }
  0x82   :  { %332 = vrot.lane.b32.xlu1 %v2039_v33, %s1874_s10 }
  0x83   :  { %330 = vrot.lane.b32.xlu0 %v2031_v32, %s1874_s10 }
  0x84   :  { %v2177_v56 = vpop.permute.xlu1 %90 }
  0x85   :  { %v2179_v57 = vpop.permute.xlu0 %88 }
  0x86   :  { %336 = vrot.lane.b32.xlu1 %v2057_v35, %s1874_s10 }
  0x87   :  { %334 = vrot.lane.b32.xlu0 %v2048_v34, %s1874_s10 }
  0x88   :  { %v2183_v58 = vpop.permute.xlu1 %94 }
  0x89   :  { %v2185_v59 = vpop.permute.xlu0 %92 }
  0x8a   :  { %340 = vrot.lane.b32.xlu1 %v2074_v37, %s1874_s10 }
  0x8b   :  { %338 = vrot.lane.b32.xlu0 %v2066_v36, %s1874_s10 }
  0x8c   :  { %v2189_v60 = vpop.permute.xlu1 %98 }
  0x8d   :  { %v2191_v61 = vpop.permute.xlu0 %96 }
  0x8e   :  { %344 = vrot.lane.b32.xlu1 %v2090_v39, %s1874_s10 }
  0x8f   :  { %342 = vrot.lane.b32.xlu0 %v2082_v38, %s1874_s10 }
  0x90   :  { %v2195_v62 = vpop.permute.xlu1 %102 }
  0x91   :  { %v2197_v63 = vpop.permute.xlu0 %100 }
  0x92   :  { %348 = vrot.lane.b32.xlu1 %v2106_v41, %s1874_s10 }
  0x93   :  { %346 = vrot.lane.b32.xlu0 %v2098_v40, %s1874_s10 }
  0x94   :  { %v2201_v0 = vpop.permute.xlu1 %106 }
  0x95   :  { %v2203_v1 = vpop.permute.xlu0 %104 }
  0x96   :  { %352 = vrot.lane.b32.xlu1 %v2122_v43, %s1874_s10 }
  0x97   :  { %350 = vrot.lane.b32.xlu0 %v2114_v42, %s1874_s10 }
  0x98   :  { %v2207_v2 = vpop.permute.xlu1 %110 }
  0x99   :  { %v2209_v3 = vpop.permute.xlu0 %108 }
  0x9a   :  { %356 = vrot.lane.b32.xlu1 %v2138_v45, %s1874_s10 }
  0x9b   :  { %354 = vrot.lane.b32.xlu0 %v2130_v44, %s1874_s10 }
  0x9c   :  { %v2213_v4 = vpop.permute.xlu1 %114 }
  0x9d   :  { %v2215_v5 = vpop.permute.xlu0 %112 }
  0x9e   :  { %4236 = vst [vmem:[#allocation3_spill] sm:$0xff] %v2215_v5  ;;  %360 = vrot.lane.b32.xlu1 %v2162_v51, %s1874_s10 }
  0x9f   :  { %358 = vrot.lane.b32.xlu0 %v2150_v48, %s1874_s10 }
  0xa0   :  { %v2224_v7 = vpop.permute.xlu1 %118 }
  0xa1   :  { %4237 = vst [vmem:[#allocation4_spill] sm:$0xff] %v2224_v7  ;;  %v2226_v8 = vpop.permute.xlu0 %116 }
  0xa2   :  { %4238 = vst [vmem:[#allocation5_spill] sm:$0xff] %v2226_v8  ;;  %428 = vrot.lane.b32.xlu1 %v2222_v6, %s1875_s21 }
  0xa3   :  { %426 = vrot.lane.b32.xlu0 %v2031_v32, %s1875_s21 }
  0xa4   :  { %v2237_v10 = vpop.permute.xlu1 %122 }
  0xa5   :  { %4239 = vst [vmem:[#allocation6_spill] sm:$0xff] %v2237_v10  ;;  %v2239_v11 = vpop.permute.xlu0 %120 }
  0xa6   :  { %4240 = vst [vmem:[#allocation7_spill] sm:$0xff] %v2239_v11  ;;  %432 = vrot.lane.b32.xlu1 %v2235_v9, %s1875_s21  ;;  %v2521_v11 = vld [vmem:[%s4234_s0 + $0x1e0] sm:$0xff] }
  0xa7   :  { %430 = vrot.lane.b32.xlu0 %v2039_v33, %s1875_s21  ;;  %v2339_v33 = vld [vmem:[%s4234_s0 + $0x258] sm:$0xff] }
  0xa8   :  { %v2250_v13 = vpop.permute.xlu1 %126 }
  0xa9   :  { %4241 = vst [vmem:[#allocation8_spill] sm:$0xff] %v2250_v13  ;;  %v2252_v14 = vpop.permute.xlu0 %124 }
  0xaa   :  { %4242 = vst [vmem:[#allocation9_spill] sm:$0xff] %v2252_v14  ;;  %436 = vrot.lane.b32.xlu1 %v2248_v12, %s1875_s21  ;;  %v2404_v14 = vld [vmem:[%s4234_s0 + $0x398] sm:$0xff] }
  0xab   :  { %434 = vrot.lane.b32.xlu0 %v2048_v34, %s1875_s21 }
  0xac   :  { %v2263_v16 = vpop.permute.xlu1 %130 }
  0xad   :  { %4243 = vst [vmem:[#allocation10_spill] sm:$0xff] %v2263_v16  ;;  %v2265_v17 = vpop.permute.xlu0 %128 }
  0xae   :  { %4244 = vst [vmem:[#allocation11_spill] sm:$0xff] %v2265_v17  ;;  %440 = vrot.lane.b32.xlu1 %v2261_v15, %s1875_s21  ;;  %v2391_v17 = vld [vmem:[%s4234_s0 + $0x358] sm:$0xff] }
  0xaf   :  { %438 = vrot.lane.b32.xlu0 %v2057_v35, %s1875_s21 }
  0xb0   :  { %v2276_v19 = vpop.permute.xlu1 %134 }
  0xb1   :  { %4245 = vst [vmem:[#allocation12_spill] sm:$0xff] %v2276_v19  ;;  %v2278_v20 = vpop.permute.xlu0 %132 }
  0xb2   :  { %4246 = vst [vmem:[#allocation13_spill] sm:$0xff] %v2278_v20  ;;  %444 = vrot.lane.b32.xlu1 %v2274_v18, %s1875_s21  ;;  %v2378_v20 = vld [vmem:[%s4234_s0 + $0x318] sm:$0xff] }
  0xb3   :  { %442 = vrot.lane.b32.xlu0 %v2066_v36, %s1875_s21  ;;  %v2352_v36 = vld [vmem:[%s4234_s0 + $0x298] sm:$0xff] }
  0xb4   :  { %v2289_v22 = vpop.permute.xlu1 %219 }
  0xb5   :  { %v2291_v23 = vpop.permute.xlu0 %217 }
  0xb6   :  { %448 = vrot.lane.b32.xlu1 %v2287_v21, %s1875_s21 }
  0xb7   :  { %446 = vrot.lane.b32.xlu0 %v2074_v37, %s1875_s21 }
  0xb8   :  { %v2302_v25 = vpop.permute.xlu1 %223 }
  0xb9   :  { %v2304_v26 = vpop.permute.xlu0 %221 }
  0xba   :  { %452 = vrot.lane.b32.xlu1 %v2300_v24, %s1875_s21 }
  0xbb   :  { %450 = vrot.lane.b32.xlu0 %v2082_v38, %s1875_s21 }
  0xbc   :  { %v2315_v28 = vpop.permute.xlu1 %227 }
  0xbd   :  { %v2317_v29 = vpop.permute.xlu0 %225 }
  0xbe   :  { %456 = vrot.lane.b32.xlu1 %v2313_v27, %s1875_s21 }
  0xbf   :  { %454 = vrot.lane.b32.xlu0 %v2090_v39, %s1875_s21  ;;  %v2365_v39 = vld [vmem:[%s4234_s0 + $0x2d8] sm:$0xff] }
  0xc0   :  { %v2328_v31 = vpop.permute.xlu1 %231 }
  0xc1   :  { %v2330_v32 = vpop.permute.xlu0 %229 }
  0xc2   :  { %460 = vrot.lane.b32.xlu1 %v2326_v30, %s1875_s21 }
  0xc3   :  { %458 = vrot.lane.b32.xlu0 %v2098_v40, %s1875_s21 }
  0xc4   :  { %v2341_v34 = vpop.permute.xlu1 %235 }
  0xc5   :  { %4247 = vst [vmem:[#allocation14_spill] sm:$0xff] %v2341_v34  ;;  %v2343_v35 = vpop.permute.xlu0 %233  ;;  %v2790_v34 = vld [vmem:[%s4234_s0 + $0x228] sm:$0xff] }
  0xc6   :  { %4248 = vst [vmem:[#allocation15_spill] sm:$0xff] %v2343_v35  ;;  %464 = vrot.lane.b32.xlu1 %v2339_v33, %s1875_s21 }
  0xc7   :  { %462 = vrot.lane.b32.xlu0 %v2106_v41, %s1875_s21 }
  0xc8   :  { %v2354_v37 = vpop.permute.xlu1 %239 }
  0xc9   :  { %4249 = vst [vmem:[#allocation16_spill] sm:$0xff] %v2354_v37  ;;  %v2356_v38 = vpop.permute.xlu0 %237 }
  0xca   :  { %4250 = vst [vmem:[#allocation17_spill] sm:$0xff] %v2356_v38  ;;  %468 = vrot.lane.b32.xlu1 %v2352_v36, %s1875_s21 }
  0xcb   :  { %466 = vrot.lane.b32.xlu0 %v2114_v42, %s1875_s21 }
  0xcc   :  { %v2367_v40 = vpop.permute.xlu1 %243 }
  0xcd   :  { %4251 = vst [vmem:[#allocation18_spill] sm:$0xff] %v2367_v40  ;;  %v2369_v41 = vpop.permute.xlu0 %241  ;;  %v2625_v40 = vld [vmem:[%s4234_s0 + $0x3e0] sm:$0xff] }
  0xce   :  { %4252 = vst [vmem:[#allocation19_spill] sm:$0xff] %v2369_v41  ;;  %472 = vrot.lane.b32.xlu1 %v2365_v39, %s1875_s21 }
  0xcf   :  { %470 = vrot.lane.b32.xlu0 %v2122_v43, %s1875_s21 }
  0xd0   :  { %v2380_v42 = vpop.permute.xlu1 %247 }
  0xd1   :  { %4253 = vst [vmem:[#allocation20_spill] sm:$0xff] %v2380_v42  ;;  %v2382_v19 = vpop.permute.xlu0 %245 }
  0xd2   :  { %4254 = vst [vmem:[#allocation21_spill] sm:$0xff] %v2382_v19  ;;  %476 = vrot.lane.b32.xlu1 %v2378_v20, %s1875_s21  ;;  %v2534_v19 = vld [vmem:[%s4234_s0 + $0x220] sm:$0xff] }
  0xd3   :  { %474 = vrot.lane.b32.xlu0 %v2130_v44, %s1875_s21 }
  0xd4   :  { %v2393_v43 = vpop.permute.xlu1 %251 }
  0xd5   :  { %4255 = vst [vmem:[#allocation22_spill] sm:$0xff] %v2393_v43  ;;  %v2395_v16 = vpop.permute.xlu0 %249 }
  0xd6   :  { %4256 = vst [vmem:[#allocation23_spill] sm:$0xff] %v2395_v16  ;;  %480 = vrot.lane.b32.xlu1 %v2391_v17, %s1875_s21  ;;  %v2417_v16 = vld [vmem:[%s4234_s0 + $0x3d8] sm:$0xff] }
  0xd7   :  { %478 = vrot.lane.b32.xlu0 %v2138_v45, %s1875_s21 }
  0xd8   :  { %v2406_v44 = vpop.permute.xlu1 %255 }
  0xd9   :  { %4257 = vst [vmem:[#allocation24_spill] sm:$0xff] %v2406_v44  ;;  %v2408_v13 = vpop.permute.xlu0 %253 }
  0xda   :  { %4258 = vst [vmem:[#allocation25_spill] sm:$0xff] %v2408_v13  ;;  %484 = vrot.lane.b32.xlu1 %v2404_v14, %s1875_s21  ;;  %v2430_v13 = vld [vmem:[%s4234_s0 + $0x20] sm:$0xff] }
  0xdb   :  { %482 = vrot.lane.b32.xlu0 %v2150_v48, %s1875_s21 }
  0xdc   :  { %v2419_v45 = vpop.permute.xlu1 %259 }
  0xdd   :  { %4259 = vst [vmem:[#allocation26_spill] sm:$0xff] %v2419_v45  ;;  %v2421_v43 = vpop.permute.xlu0 %257 }
  0xde   :  { %4260 = vst [vmem:[#allocation27_spill] sm:$0xff] %v2421_v43  ;;  %488 = vrot.lane.b32.xlu1 %v2417_v16, %s1875_s21 }
  0xdf   :  { %486 = vrot.lane.b32.xlu0 %v2162_v51, %s1875_s21  ;;  %v2443_v51 = vld [vmem:[%s4234_s0 + $0x60] sm:$0xff]  ;;  %s1877_s21 = smov 100  }
  0xe0   :  { %v2432_v48 = vpop.permute.xlu1 %263 }
  0xe1   :  { %4261 = vst [vmem:[#allocation28_spill] sm:$0xff] %v2432_v48  ;;  %v2434_v44 = vpop.permute.xlu0 %261 }
  0xe2   :  { %4262 = vst [vmem:[#allocation29_spill] sm:$0xff] %v2434_v44  ;;  %573 = vrot.lane.b32.xlu1 %v2430_v13, %s1876_s26  ;;  %v2456_v44 = vld [vmem:[%s4234_s0 + $0xa0] sm:$0xff] }
  0xe3   :  { %571 = vrot.lane.b32.xlu0 %v2222_v6, %s1876_s26 }
  0xe4   :  { %v2445_v43 = vpop.permute.xlu1 %267 }
  0xe5   :  { %4263 = vst [vmem:[#allocation30_spill] sm:$0xff] %v2445_v43  ;;  %v2447_v45 = vpop.permute.xlu0 %265 }
  0xe6   :  { %4264 = vst [vmem:[#allocation31_spill] sm:$0xff] %v2447_v45  ;;  %577 = vrot.lane.b32.xlu1 %v2443_v51, %s1876_s26  ;;  %v2469_v45 = vld [vmem:[%s4234_s0 + $0xe0] sm:$0xff] }
  0xe7   :  { %575 = vrot.lane.b32.xlu0 %v2235_v9, %s1876_s26 }
  0xe8   :  { %v2458_v6 = vpop.permute.xlu1 %271 }
  0xe9   :  { %4265 = vst [vmem:[#allocation32_spill] sm:$0xff] %v2458_v6  ;;  %v2460_v48 = vpop.permute.xlu0 %269 }
  0xea   :  { %4266 = vst [vmem:[#allocation33_spill] sm:$0xff] %v2460_v48  ;;  %581 = vrot.lane.b32.xlu1 %v2456_v44, %s1876_s26  ;;  %v2482_v48 = vld [vmem:[%s4234_s0 + $0x120] sm:$0xff] }
  0xeb   :  { %579 = vrot.lane.b32.xlu0 %v2248_v12, %s1876_s26 }
  0xec   :  { %v2471_v9 = vpop.permute.xlu1 %275 }
  0xed   :  { %4267 = vst [vmem:[#allocation34_spill] sm:$0xff] %v2471_v9  ;;  %v2473_v43 = vpop.permute.xlu0 %273 }
  0xee   :  { %4268 = vst [vmem:[#allocation35_spill] sm:$0xff] %v2473_v43  ;;  %585 = vrot.lane.b32.xlu1 %v2469_v45, %s1876_s26  ;;  %v2495_v43 = vld [vmem:[%s4234_s0 + $0x160] sm:$0xff] }
  0xef   :  { %583 = vrot.lane.b32.xlu0 %v2261_v15, %s1876_s26 }
  0xf0   :  { %v2484_v12 = vpop.permute.xlu1 %279 }
  0xf1   :  { %4269 = vst [vmem:[#allocation36_spill] sm:$0xff] %v2484_v12  ;;  %v2486_v6 = vpop.permute.xlu0 %277 }
  0xf2   :  { %4270 = vst [vmem:[#allocation37_spill] sm:$0xff] %v2486_v6  ;;  %589 = vrot.lane.b32.xlu1 %v2482_v48, %s1876_s26  ;;  %v2508_v6 = vld [vmem:[%s4234_s0 + $0x1a0] sm:$0xff] }
  0xf3   :  { %587 = vrot.lane.b32.xlu0 %v2274_v18, %s1876_s26 }
  0xf4   :  { %v2497_v15 = vpop.permute.xlu1 %332 }
  0xf5   :  { %v2499_v9 = vpop.permute.xlu0 %330 }
  0xf6   :  { %593 = vrot.lane.b32.xlu1 %v2495_v43, %s1876_s26 }
  0xf7   :  { %591 = vrot.lane.b32.xlu0 %v2287_v21, %s1876_s26 }
  0xf8   :  { %v2510_v18 = vpop.permute.xlu1 %336 }
  0xf9   :  { %4271 = vst [vmem:[#allocation38_spill] sm:$0xff] %v2510_v18  ;;  %v2512_v12 = vpop.permute.xlu0 %334 }
  0xfa   :  { %4272 = vst [vmem:[#allocation39_spill] sm:$0xff] %v2512_v12  ;;  %597 = vrot.lane.b32.xlu1 %v2508_v6, %s1876_s26 }
  0xfb   :  { %595 = vrot.lane.b32.xlu0 %v2300_v24, %s1876_s26 }
  0xfc   :  { %v2523_v21 = vpop.permute.xlu1 %340 }
  0xfd   :  { %4273 = vst [vmem:[#allocation40_spill] sm:$0xff] %v2523_v21  ;;  %v2525_v10 = vpop.permute.xlu0 %338  ;;  %v2547_v21 = vld [vmem:[%s4234_s0 + $0x260] sm:$0xff] }
  0xfe   :  { %4274 = vst [vmem:[#allocation41_spill] sm:$0xff] %v2525_v10  ;;  %601 = vrot.lane.b32.xlu1 %v2521_v11, %s1876_s26 }
  0xff   :  { %599 = vrot.lane.b32.xlu0 %v2313_v27, %s1876_s26 }
 0x100   :  { %v2536_v24 = vpop.permute.xlu1 %344 }
 0x101   :  { %4275 = vst [vmem:[#allocation42_spill] sm:$0xff] %v2536_v24  ;;  %v2538_v42 = vpop.permute.xlu0 %342  ;;  %v2560_v24 = vld [vmem:[%s4234_s0 + $0x2a0] sm:$0xff] }
 0x102   :  { %4276 = vst [vmem:[#allocation43_spill] sm:$0xff] %v2538_v42  ;;  %605 = vrot.lane.b32.xlu1 %v2534_v19, %s1876_s26 }
 0x103   :  { %603 = vrot.lane.b32.xlu0 %v2326_v30, %s1876_s26 }
 0x104   :  { %v2549_v27 = vpop.permute.xlu1 %348 }
 0x105   :  { %4277 = vst [vmem:[#allocation44_spill] sm:$0xff] %v2549_v27  ;;  %v2551_v41 = vpop.permute.xlu0 %346  ;;  %v2573_v27 = vld [vmem:[%s4234_s0 + $0x2e0] sm:$0xff] }
 0x106   :  { %4278 = vst [vmem:[#allocation45_spill] sm:$0xff] %v2551_v41  ;;  %609 = vrot.lane.b32.xlu1 %v2547_v21, %s1876_s26 }
 0x107   :  { %607 = vrot.lane.b32.xlu0 %v2339_v33, %s1876_s26 }
 0x108   :  { %v2562_v30 = vpop.permute.xlu1 %352 }
 0x109   :  { %4279 = vst [vmem:[#allocation46_spill] sm:$0xff] %v2562_v30  ;;  %v2564_v42 = vpop.permute.xlu0 %350  ;;  %v2586_v30 = vld [vmem:[%s4234_s0 + $0x320] sm:$0xff] }
 0x10a   :  { %4280 = vst [vmem:[#allocation47_spill] sm:$0xff] %v2564_v42  ;;  %613 = vrot.lane.b32.xlu1 %v2560_v24, %s1876_s26 }
 0x10b   :  { %611 = vrot.lane.b32.xlu0 %v2352_v36, %s1876_s26 }
 0x10c   :  { %v2575_v33 = vpop.permute.xlu1 %356 }
 0x10d   :  { %4281 = vst [vmem:[#allocation48_spill] sm:$0xff] %v2575_v33  ;;  %v2577_v41 = vpop.permute.xlu0 %354  ;;  %v2599_v33 = vld [vmem:[%s4234_s0 + $0x360] sm:$0xff] }
 0x10e   :  { %4282 = vst [vmem:[#allocation49_spill] sm:$0xff] %v2577_v41  ;;  %617 = vrot.lane.b32.xlu1 %v2573_v27, %s1876_s26 }
 0x10f   :  { %615 = vrot.lane.b32.xlu0 %v2365_v39, %s1876_s26 }
 0x110   :  { %v2588_v36 = vpop.permute.xlu1 %360 }
 0x111   :  { %4283 = vst [vmem:[#allocation50_spill] sm:$0xff] %v2588_v36  ;;  %v2590_v42 = vpop.permute.xlu0 %358  ;;  %v2612_v36 = vld [vmem:[%s4234_s0 + $0x3a0] sm:$0xff] }
 0x112   :  { %4284 = vst [vmem:[#allocation51_spill] sm:$0xff] %v2590_v42  ;;  %621 = vrot.lane.b32.xlu1 %v2586_v30, %s1876_s26 }
 0x113   :  { %619 = vrot.lane.b32.xlu0 %v2378_v20, %s1876_s26 }
 0x114   :  { %v2601_v39 = vpop.permute.xlu1 %428 }
 0x115   :  { %v2603_v41 = vpop.permute.xlu0 %426 }
 0x116   :  { %625 = vrot.lane.b32.xlu1 %v2599_v33, %s1876_s26 }
 0x117   :  { %623 = vrot.lane.b32.xlu0 %v2391_v17, %s1876_s26 }
 0x118   :  { %v2614_v20 = vpop.permute.xlu1 %432 }
 0x119   :  { %v2616_v42 = vpop.permute.xlu0 %430 }
 0x11a   :  { %629 = vrot.lane.b32.xlu1 %v2612_v36, %s1876_s26 }
 0x11b   :  { %627 = vrot.lane.b32.xlu0 %v2404_v14, %s1876_s26 }
 0x11c   :  { %v2627_v17 = vpop.permute.xlu1 %436 }
 0x11d   :  { %4285 = vst [vmem:[#allocation52_spill] sm:$0xff] %v2627_v17  ;;  %v2629_v10 = vpop.permute.xlu0 %434  ;;  %v3089_v17 = vld [vmem:[%s4234_s0 + $0x3f0] sm:$0xff] }
 0x11e   :  { %4286 = vst [vmem:[#allocation53_spill] sm:$0xff] %v2629_v10  ;;  %633 = vrot.lane.b32.xlu1 %v2625_v40, %s1876_s26 }
 0x11f   :  { %631 = vrot.lane.b32.xlu0 %v2417_v16, %s1876_s26 }
 0x120   :  { %v2635_v8 = vpop.permute.xlu1 %440 }
 0x121   :  { %4287 = vst [vmem:[#allocation54_spill] sm:$0xff] %v2635_v8  ;;  %v2637_v7 = vpop.permute.xlu0 %438  ;;  %v2777_v8 = vld [vmem:[%s4234_s0 + $0x1e8] sm:$0xff] }
 0x122   :  { %4288 = vst [vmem:[#allocation55_spill] sm:$0xff] %v2637_v7  ;;  %686 = vrot.lane.b32.xlu1 %v2443_v51, %s1877_s21 }
 0x123   :  { %684 = vrot.lane.b32.xlu0 %v2430_v13, %s1877_s21 }
 0x124   :  { %v2641_v14 = vpop.permute.xlu1 %444 }
 0x125   :  { %4289 = vst [vmem:[#allocation56_spill] sm:$0xff] %v2641_v14  ;;  %v2643_v38 = vpop.permute.xlu0 %442 }
 0x126   :  { %4290 = vst [vmem:[#allocation57_spill] sm:$0xff] %v2643_v38  ;;  %690 = vrot.lane.b32.xlu1 %v2469_v45, %s1877_s21 }
 0x127   :  { %688 = vrot.lane.b32.xlu0 %v2456_v44, %s1877_s21 }
 0x128   :  { %v2647_v37 = vpop.permute.xlu1 %448 }
 0x129   :  { %4291 = vst [vmem:[#allocation58_spill] sm:$0xff] %v2647_v37  ;;  %v2649_v16 = vpop.permute.xlu0 %446 }
 0x12a   :  { %4292 = vst [vmem:[#allocation59_spill] sm:$0xff] %v2649_v16  ;;  %694 = vrot.lane.b32.xlu1 %v2495_v43, %s1877_s21 }
 0x12b   :  { %692 = vrot.lane.b32.xlu0 %v2482_v48, %s1877_s21 }
 0x12c   :  { %v2653_v18 = vpop.permute.xlu1 %452 }
 0x12d   :  { %4293 = vst [vmem:[#allocation60_spill] sm:$0xff] %v2653_v18  ;;  %v2655_v7 = vpop.permute.xlu0 %450 }
 0x12e   :  { %4294 = vst [vmem:[#allocation61_spill] sm:$0xff] %v2655_v7  ;;  %698 = vrot.lane.b32.xlu1 %v2521_v11, %s1877_s21 }
 0x12f   :  { %696 = vrot.lane.b32.xlu0 %v2508_v6, %s1877_s21 }
 0x130   :  { %v2659_v38 = vpop.permute.xlu1 %456 }
 0x131   :  { %4295 = vst [vmem:[#allocation62_spill] sm:$0xff] %v2659_v38  ;;  %v2661_v14 = vpop.permute.xlu0 %454 }
 0x132   :  { %4296 = vst [vmem:[#allocation63_spill] sm:$0xff] %v2661_v14  ;;  %702 = vrot.lane.b32.xlu1 %v2547_v21, %s1877_s21 }
 0x133   :  { %700 = vrot.lane.b32.xlu0 %v2534_v19, %s1877_s21 }
 0x134   :  { %v2665_v16 = vpop.permute.xlu1 %460 }
 0x135   :  { %4297 = vst [vmem:[#allocation64_spill] sm:$0xff] %v2665_v16  ;;  %v2667_v37 = vpop.permute.xlu0 %458 }
 0x136   :  { %4298 = vst [vmem:[#allocation65_spill] sm:$0xff] %v2667_v37  ;;  %706 = vrot.lane.b32.xlu1 %v2573_v27, %s1877_s21  ;;  %v2686_v37 = vld [vmem:[%s4234_s0 + $0x28] sm:$0xff] }
 0x137   :  { %704 = vrot.lane.b32.xlu0 %v2560_v24, %s1877_s21 }
 0x138   :  { %v2671_v7 = vpop.permute.xlu1 %464 }
 0x139   :  { %4299 = vst [vmem:[#allocation66_spill] sm:$0xff] %v2671_v7  ;;  %v2673_v18 = vpop.permute.xlu0 %462 }
 0x13a   :  { %4300 = vst [vmem:[#allocation67_spill] sm:$0xff] %v2673_v18  ;;  %710 = vrot.lane.b32.xlu1 %v2599_v33, %s1877_s21 }
 0x13b   :  { %708 = vrot.lane.b32.xlu0 %v2586_v30, %s1877_s21 }
 0x13c   :  { %v2677_v14 = vpop.permute.xlu1 %468 }
 0x13d   :  { %4301 = vst [vmem:[#allocation68_spill] sm:$0xff] %v2677_v14  ;;  %v2679_v38 = vpop.permute.xlu0 %466 }
 0x13e   :  { %4302 = vst [vmem:[#allocation69_spill] sm:$0xff] %v2679_v38  ;;  %714 = vrot.lane.b32.xlu1 %v2625_v40, %s1877_s21  ;;  %v2699_v38 = vld [vmem:[%s4234_s0 + $0x68] sm:$0xff] }
 0x13f   :  { %712 = vrot.lane.b32.xlu0 %v2612_v36, %s1877_s21 }
 0x140   :  { %v2688_v7 = vpop.permute.xlu1 %472 }
 0x141   :  { %4303 = vst [vmem:[#allocation70_spill] sm:$0xff] %v2688_v7  ;;  %v2690_v18 = vpop.permute.xlu0 %470 }
 0x142   :  { %4304 = vst [vmem:[#allocation71_spill] sm:$0xff] %v2690_v18  ;;  %782 = vrot.lane.b32.xlu1 %v2686_v37, %s1878_s30  ;;  %v2712_v18 = vld [vmem:[%s4234_s0 + $0xa8] sm:$0xff] }
 0x143   :  { %780 = vrot.lane.b32.xlu0 %v2430_v13, %s1878_s30 }
 0x144   :  { %v2701_v14 = vpop.permute.xlu1 %476 }
 0x145   :  { %4305 = vst [vmem:[#allocation72_spill] sm:$0xff] %v2701_v14  ;;  %v2703_v16 = vpop.permute.xlu0 %474 }
 0x146   :  { %4306 = vst [vmem:[#allocation73_spill] sm:$0xff] %v2703_v16  ;;  %786 = vrot.lane.b32.xlu1 %v2699_v38, %s1878_s30  ;;  %v2725_v16 = vld [vmem:[%s4234_s0 + $0xe8] sm:$0xff] }
 0x147   :  { %784 = vrot.lane.b32.xlu0 %v2443_v51, %s1878_s30 }
 0x148   :  { %v2714_v13 = vpop.permute.xlu1 %480 }
 0x149   :  { %4307 = vst [vmem:[#allocation74_spill] sm:$0xff] %v2714_v13  ;;  %v2716_v7 = vpop.permute.xlu0 %478 }
 0x14a   :  { %4308 = vst [vmem:[#allocation75_spill] sm:$0xff] %v2716_v7  ;;  %790 = vrot.lane.b32.xlu1 %v2712_v18, %s1878_s30  ;;  %v2738_v7 = vld [vmem:[%s4234_s0 + $0x128] sm:$0xff] }
 0x14b   :  { %788 = vrot.lane.b32.xlu0 %v2456_v44, %s1878_s30 }
 0x14c   :  { %v2727_v51 = vpop.permute.xlu1 %484 }
 0x14d   :  { %4309 = vst [vmem:[#allocation76_spill] sm:$0xff] %v2727_v51  ;;  %v2729_v14 = vpop.permute.xlu0 %482 }
 0x14e   :  { %4310 = vst [vmem:[#allocation77_spill] sm:$0xff] %v2729_v14  ;;  %794 = vrot.lane.b32.xlu1 %v2725_v16, %s1878_s30  ;;  %v2751_v14 = vld [vmem:[%s4234_s0 + $0x168] sm:$0xff] }
 0x14f   :  { %792 = vrot.lane.b32.xlu0 %v2469_v45, %s1878_s30 }
 0x150   :  { %v2740_v44 = vpop.permute.xlu1 %488 }
 0x151   :  { %4311 = vst [vmem:[#allocation78_spill] sm:$0xff] %v2740_v44  ;;  %v2742_v13 = vpop.permute.xlu0 %486 }
 0x152   :  { %4312 = vst [vmem:[#allocation79_spill] sm:$0xff] %v2742_v13  ;;  %798 = vrot.lane.b32.xlu1 %v2738_v7, %s1878_s30  ;;  %v2764_v13 = vld [vmem:[%s4234_s0 + $0x1a8] sm:$0xff] }
 0x153   :  { %796 = vrot.lane.b32.xlu0 %v2482_v48, %s1878_s30 }
 0x154   :  { %v2753_v45 = vpop.permute.xlu1 %573 }
 0x155   :  { %v2755_v51 = vpop.permute.xlu0 %571 }
 0x156   :  { %802 = vrot.lane.b32.xlu1 %v2751_v14, %s1878_s30 }
 0x157   :  { %800 = vrot.lane.b32.xlu0 %v2495_v43, %s1878_s30 }
 0x158   :  { %v2766_v48 = vpop.permute.xlu1 %577 }
 0x159   :  { %v2768_v44 = vpop.permute.xlu0 %575 }
 0x15a   :  { %806 = vrot.lane.b32.xlu1 %v2764_v13, %s1878_s30 }
 0x15b   :  { %804 = vrot.lane.b32.xlu0 %v2508_v6, %s1878_s30 }
 0x15c   :  { %v2779_v43 = vpop.permute.xlu1 %581 }
 0x15d   :  { %4313 = vst [vmem:[#allocation80_spill] sm:$0xff] %v2779_v43  ;;  %v2781_v35 = vpop.permute.xlu0 %579 }
 0x15e   :  { %4314 = vst [vmem:[#allocation81_spill] sm:$0xff] %v2781_v35  ;;  %810 = vrot.lane.b32.xlu1 %v2777_v8, %s1878_s30  ;;  %v2803_v35 = vld [vmem:[%s4234_s0 + $0x268] sm:$0xff] }
 0x15f   :  { %808 = vrot.lane.b32.xlu0 %v2521_v11, %s1878_s30 }
 0x160   :  { %v2792_v6 = vpop.permute.xlu1 %585 }
 0x161   :  { %4315 = vst [vmem:[#allocation82_spill] sm:$0xff] %v2792_v6  ;;  %v2794_v12 = vpop.permute.xlu0 %583 }
 0x162   :  { %4316 = vst [vmem:[#allocation83_spill] sm:$0xff] %v2794_v12  ;;  %814 = vrot.lane.b32.xlu1 %v2790_v34, %s1878_s30  ;;  %v2816_v12 = vld [vmem:[%s4234_s0 + $0x2a8] sm:$0xff] }
 0x163   :  { %812 = vrot.lane.b32.xlu0 %v2534_v19, %s1878_s30 }
 0x164   :  { %v2805_v11 = vpop.permute.xlu1 %589 }
 0x165   :  { %4317 = vst [vmem:[#allocation84_spill] sm:$0xff] %v2805_v11  ;;  %v2807_v43 = vpop.permute.xlu0 %587 }
 0x166   :  { %4318 = vst [vmem:[#allocation85_spill] sm:$0xff] %v2807_v43  ;;  %818 = vrot.lane.b32.xlu1 %v2803_v35, %s1878_s30  ;;  %v2829_v43 = vld [vmem:[%s4234_s0 + $0x2e8] sm:$0xff] }
 0x167   :  { %816 = vrot.lane.b32.xlu0 %v2547_v21, %s1878_s30 }
 0x168   :  { %v2818_v19 = vpop.permute.xlu1 %593 }
 0x169   :  { %4319 = vst [vmem:[#allocation86_spill] sm:$0xff] %v2818_v19  ;;  %v2820_v6 = vpop.permute.xlu0 %591 }
 0x16a   :  { %4320 = vst [vmem:[#allocation87_spill] sm:$0xff] %v2820_v6  ;;  %822 = vrot.lane.b32.xlu1 %v2816_v12, %s1878_s30  ;;  %v2842_v6 = vld [vmem:[%s4234_s0 + $0x328] sm:$0xff] }
 0x16b   :  { %820 = vrot.lane.b32.xlu0 %v2560_v24, %s1878_s30 }
 0x16c   :  { %v2831_v21 = vpop.permute.xlu1 %597 }
 0x16d   :  { %4321 = vst [vmem:[#allocation88_spill] sm:$0xff] %v2831_v21  ;;  %v2833_v11 = vpop.permute.xlu0 %595 }
 0x16e   :  { %4322 = vst [vmem:[#allocation89_spill] sm:$0xff] %v2833_v11  ;;  %826 = vrot.lane.b32.xlu1 %v2829_v43, %s1878_s30  ;;  %v2855_v11 = vld [vmem:[%s4234_s0 + $0x368] sm:$0xff] }
 0x16f   :  { %824 = vrot.lane.b32.xlu0 %v2573_v27, %s1878_s30 }
 0x170   :  { %v2844_v24 = vpop.permute.xlu1 %601 }
 0x171   :  { %4323 = vst [vmem:[#allocation90_spill] sm:$0xff] %v2844_v24  ;;  %v2846_v19 = vpop.permute.xlu0 %599 }
 0x172   :  { %4324 = vst [vmem:[#allocation91_spill] sm:$0xff] %v2846_v19  ;;  %830 = vrot.lane.b32.xlu1 %v2842_v6, %s1878_s30  ;;  %v2868_v19 = vld [vmem:[%s4234_s0 + $0x3a8] sm:$0xff] }
 0x173   :  { %828 = vrot.lane.b32.xlu0 %v2586_v30, %s1878_s30 }
 0x174   :  { %v2857_v27 = vpop.permute.xlu1 %605 }
 0x175   :  { %4325 = vst [vmem:[#allocation92_spill] sm:$0xff] %v2857_v27  ;;  %v2859_v21 = vpop.permute.xlu0 %603 }
 0x176   :  { %4326 = vst [vmem:[#allocation93_spill] sm:$0xff] %v2859_v21  ;;  %834 = vrot.lane.b32.xlu1 %v2855_v11, %s1878_s30  ;;  %v2881_v21 = vld [vmem:[%s4234_s0 + $0x3e8] sm:$0xff] }
 0x177   :  { %832 = vrot.lane.b32.xlu0 %v2599_v33, %s1878_s30 }
 0x178   :  { %v2870_v30 = vpop.permute.xlu1 %609 }
 0x179   :  { %4327 = vst [vmem:[#allocation94_spill] sm:$0xff] %v2870_v30  ;;  %v2872_v24 = vpop.permute.xlu0 %607 }
 0x17a   :  { %4328 = vst [vmem:[#allocation95_spill] sm:$0xff] %v2872_v24  ;;  %838 = vrot.lane.b32.xlu1 %v2868_v19, %s1878_s30  ;;  %v2894_v24 = vld [vmem:[%s4234_s0 + $0x30] sm:$0xff] }
 0x17b   :  { %836 = vrot.lane.b32.xlu0 %v2612_v36, %s1878_s30 }
 0x17c   :  { %v2883_v33 = vpop.permute.xlu1 %613 }
 0x17d   :  { %4329 = vst [vmem:[#allocation96_spill] sm:$0xff] %v2883_v33  ;;  %v2885_v27 = vpop.permute.xlu0 %611 }
 0x17e   :  { %4330 = vst [vmem:[#allocation97_spill] sm:$0xff] %v2885_v27  ;;  %842 = vrot.lane.b32.xlu1 %v2881_v21, %s1878_s30 }
 0x17f   :  { %840 = vrot.lane.b32.xlu0 %v2625_v40, %s1878_s30  ;;  %v2907_v40 = vld [vmem:[%s4234_s0 + $0x70] sm:$0xff] }
 0x180   :  { %v2896_v36 = vpop.permute.xlu1 %617 }
 0x181   :  { %4331 = vst [vmem:[#allocation98_spill] sm:$0xff] %v2896_v36  ;;  %v2898_v30 = vpop.permute.xlu0 %615 }
 0x182   :  { %4332 = vst [vmem:[#allocation99_spill] sm:$0xff] %v2898_v30  ;;  %927 = vrot.lane.b32.xlu1 %v2894_v24, %s1879_s6  ;;  %v2920_v30 = vld [vmem:[%s4234_s0 + $0xb0] sm:$0xff] }
 0x183   :  { %925 = vrot.lane.b32.xlu0 %v2686_v37, %s1879_s6 }
 0x184   :  { %v2909_v27 = vpop.permute.xlu1 %621 }
 0x185   :  { %4333 = vst [vmem:[#allocation100_spill] sm:$0xff] %v2909_v27  ;;  %v2911_v33 = vpop.permute.xlu0 %619 }
 0x186   :  { %4334 = vst [vmem:[#allocation101_spill] sm:$0xff] %v2911_v33  ;;  %931 = vrot.lane.b32.xlu1 %v2907_v40, %s1879_s6  ;;  %v2933_v33 = vld [vmem:[%s4234_s0 + $0xf0] sm:$0xff] }
 0x187   :  { %929 = vrot.lane.b32.xlu0 %v2699_v38, %s1879_s6 }
 0x188   :  { %v2922_v37 = vpop.permute.xlu1 %625 }
 0x189   :  { %4335 = vst [vmem:[#allocation102_spill] sm:$0xff] %v2922_v37  ;;  %v2924_v36 = vpop.permute.xlu0 %623 }
 0x18a   :  { %4336 = vst [vmem:[#allocation103_spill] sm:$0xff] %v2924_v36  ;;  %935 = vrot.lane.b32.xlu1 %v2920_v30, %s1879_s6  ;;  %v2946_v36 = vld [vmem:[%s4234_s0 + $0x130] sm:$0xff] }
 0x18b   :  { %933 = vrot.lane.b32.xlu0 %v2712_v18, %s1879_s6 }
 0x18c   :  { %v2935_v38 = vpop.permute.xlu1 %629 }
 0x18d   :  { %4337 = vst [vmem:[#allocation104_spill] sm:$0xff] %v2935_v38  ;;  %v2937_v27 = vpop.permute.xlu0 %627 }
 0x18e   :  { %4338 = vst [vmem:[#allocation105_spill] sm:$0xff] %v2937_v27  ;;  %939 = vrot.lane.b32.xlu1 %v2933_v33, %s1879_s6  ;;  %v2959_v27 = vld [vmem:[%s4234_s0 + $0x170] sm:$0xff] }
 0x18f   :  { %937 = vrot.lane.b32.xlu0 %v2725_v16, %s1879_s6 }
 0x190   :  { %v2948_v18 = vpop.permute.xlu1 %633 }
 0x191   :  { %4339 = vst [vmem:[#allocation106_spill] sm:$0xff] %v2948_v18  ;;  %v2950_v37 = vpop.permute.xlu0 %631 }
 0x192   :  { %4340 = vst [vmem:[#allocation107_spill] sm:$0xff] %v2950_v37  ;;  %943 = vrot.lane.b32.xlu1 %v2946_v36, %s1879_s6  ;;  %v2972_v37 = vld [vmem:[%s4234_s0 + $0x1b0] sm:$0xff] }
 0x193   :  { %941 = vrot.lane.b32.xlu0 %v2738_v7, %s1879_s6 }
 0x194   :  { %v2961_v16 = vpop.permute.xlu1 %686 }
 0x195   :  { %4341 = vst [vmem:[#allocation108_spill] sm:$0xff] %v2961_v16  ;;  %v2963_v38 = vpop.permute.xlu0 %684  ;;  %v2985_v16 = vld [vmem:[%s4234_s0 + $0x1f0] sm:$0xff] }
 0x196   :  { %947 = vrot.lane.b32.xlu1 %v2959_v27, %s1879_s6 }
 0x197   :  { %945 = vrot.lane.b32.xlu0 %v2751_v14, %s1879_s6 }
 0x198   :  { %v2974_v7 = vpop.permute.xlu1 %690 }
 0x199   :  { %4342 = vst [vmem:[#allocation109_spill] sm:$0xff] %v2974_v7  ;;  %v2976_v18 = vpop.permute.xlu0 %688  ;;  %v2998_v7 = vld [vmem:[%s4234_s0 + $0x230] sm:$0xff] }
 0x19a   :  { %4343 = vst [vmem:[#allocation110_spill] sm:$0xff] %v2976_v18  ;;  %951 = vrot.lane.b32.xlu1 %v2972_v37, %s1879_s6 }
 0x19b   :  { %949 = vrot.lane.b32.xlu0 %v2764_v13, %s1879_s6 }
 0x19c   :  { %v2987_v14 = vpop.permute.xlu1 %694 }
 0x19d   :  { %4344 = vst [vmem:[#allocation111_spill] sm:$0xff] %v2987_v14  ;;  %v2989_v10 = vpop.permute.xlu0 %692  ;;  %v3011_v14 = vld [vmem:[%s4234_s0 + $0x270] sm:$0xff] }
 0x19e   :  { %4345 = vst [vmem:[#allocation112_spill] sm:$0xff] %v2989_v10  ;;  %955 = vrot.lane.b32.xlu1 %v2985_v16, %s1879_s6 }
 0x19f   :  { %953 = vrot.lane.b32.xlu0 %v2777_v8, %s1879_s6 }
 0x1a0   :  { %v3000_v13 = vpop.permute.xlu1 %698 }
 0x1a1   :  { %4346 = vst [vmem:[#allocation113_spill] sm:$0xff] %v3000_v13  ;;  %v3002_v18 = vpop.permute.xlu0 %696  ;;  %v3024_v13 = vld [vmem:[%s4234_s0 + $0x2b0] sm:$0xff] }
 0x1a2   :  { %4347 = vst [vmem:[#allocation114_spill] sm:$0xff] %v3002_v18  ;;  %959 = vrot.lane.b32.xlu1 %v2998_v7, %s1879_s6 }
 0x1a3   :  { %957 = vrot.lane.b32.xlu0 %v2790_v34, %s1879_s6 }
 0x1a4   :  { %v3013_v8 = vpop.permute.xlu1 %702 }
 0x1a5   :  { %4348 = vst [vmem:[#allocation115_spill] sm:$0xff] %v3013_v8  ;;  %v3015_v10 = vpop.permute.xlu0 %700  ;;  %v3037_v8 = vld [vmem:[%s4234_s0 + $0x2f0] sm:$0xff] }
 0x1a6   :  { %4349 = vst [vmem:[#allocation116_spill] sm:$0xff] %v3015_v10  ;;  %963 = vrot.lane.b32.xlu1 %v3011_v14, %s1879_s6 }
 0x1a7   :  { %961 = vrot.lane.b32.xlu0 %v2803_v35, %s1879_s6 }
 0x1a8   :  { %v3026_v34 = vpop.permute.xlu1 %706 }
 0x1a9   :  { %4350 = vst [vmem:[#allocation117_spill] sm:$0xff] %v3026_v34  ;;  %v3028_v18 = vpop.permute.xlu0 %704  ;;  %v3050_v34 = vld [vmem:[%s4234_s0 + $0x330] sm:$0xff] }
 0x1aa   :  { %4351 = vst [vmem:[#allocation118_spill] sm:$0xff] %v3028_v18  ;;  %967 = vrot.lane.b32.xlu1 %v3024_v13, %s1879_s6 }
 0x1ab   :  { %965 = vrot.lane.b32.xlu0 %v2816_v12, %s1879_s6 }
 0x1ac   :  { %v3039_v35 = vpop.permute.xlu1 %710 }
 0x1ad   :  { %4352 = vst [vmem:[#allocation119_spill] sm:$0xff] %v3039_v35  ;;  %v3041_v10 = vpop.permute.xlu0 %708  ;;  %v3063_v35 = vld [vmem:[%s4234_s0 + $0x370] sm:$0xff] }
 0x1ae   :  { %4353 = vst [vmem:[#allocation120_spill] sm:$0xff] %v3041_v10  ;;  %971 = vrot.lane.b32.xlu1 %v3037_v8, %s1879_s6 }
 0x1af   :  { %969 = vrot.lane.b32.xlu0 %v2829_v43, %s1879_s6 }
 0x1b0   :  { %v3052_v12 = vpop.permute.xlu1 %714 }
 0x1b1   :  { %4354 = vst [vmem:[#allocation121_spill] sm:$0xff] %v3052_v12  ;;  %v3054_v18 = vpop.permute.xlu0 %712  ;;  %v3076_v12 = vld [vmem:[%s4234_s0 + $0x3b0] sm:$0xff] }
 0x1b2   :  { %4355 = vst [vmem:[#allocation122_spill] sm:$0xff] %v3054_v18  ;;  %975 = vrot.lane.b32.xlu1 %v3050_v34, %s1879_s6 }
 0x1b3   :  { %973 = vrot.lane.b32.xlu0 %v2842_v6, %s1879_s6 }
 0x1b4   :  { %v3065_v43 = vpop.permute.xlu1 %782 }
 0x1b5   :  { %v3067_v10 = vpop.permute.xlu0 %780 }
 0x1b6   :  { %979 = vrot.lane.b32.xlu1 %v3063_v35, %s1879_s6 }
 0x1b7   :  { %977 = vrot.lane.b32.xlu0 %v2855_v11, %s1879_s6 }
 0x1b8   :  { %v3078_v6 = vpop.permute.xlu1 %786 }
 0x1b9   :  { %4356 = vst [vmem:[#allocation123_spill] sm:$0xff] %v3078_v6  ;;  %v3080_v18 = vpop.permute.xlu0 %784 }
 0x1ba   :  { %4357 = vst [vmem:[#allocation124_spill] sm:$0xff] %v3080_v18  ;;  %983 = vrot.lane.b32.xlu1 %v3076_v12, %s1879_s6  ;;  %v1038_v18 = vld [vmem:[%s4234_s0 + $0x38] sm:$0xff] }
 0x1bb   :  { %981 = vrot.lane.b32.xlu0 %v2868_v19, %s1879_s6 }
 0x1bc   :  { %v3091_v11 = vpop.permute.xlu1 %790 }
 0x1bd   :  { %4358 = vst [vmem:[#allocation125_spill] sm:$0xff] %v3091_v11  ;;  %v3093_v5 = vpop.permute.xlu0 %788 }
 0x1be   :  { %4359 = vst [vmem:[#allocation126_spill] sm:$0xff] %v3093_v5  ;;  %987 = vrot.lane.b32.xlu1 %v3089_v17, %s1879_s6  ;;  %v1039_v5 = vld [vmem:[%s4234_s0 + $0x78] sm:$0xff] }
 0x1bf   :  { %985 = vrot.lane.b32.xlu0 %v2881_v21, %s1879_s6 }
 0x1c0   :  { %v3102_v19 = vpop.permute.xlu1 %794 }
 0x1c1   :  { %v3104_v6 = vpop.permute.xlu0 %792 }
 0x1c2   :  { %4360 = vst [vmem:[#allocation127_spill] sm:$0xff] %v3104_v6  ;;  %1072 = vrot.lane.b32.xlu1 %v1038_v18, %s1880_s11  ;;  %v1040_v18 = vld [vmem:[%s4234_s0 + $0xb8] sm:$0xff] }
 0x1c3   :  { %1070 = vrot.lane.b32.xlu0 %v2894_v24, %s1880_s11 }
 0x1c4   :  { %v3112_v11 = vpop.permute.xlu1 %798 }
 0x1c5   :  { %v3114_v21 = vpop.permute.xlu0 %796 }
 0x1c6   :  { %4361 = vst [vmem:[#allocation128_spill] sm:$0xff] %v3114_v21  ;;  %1076 = vrot.lane.b32.xlu1 %v1039_v5, %s1880_s11  ;;  %v1041_v5 = vld [vmem:[%s4234_s0 + $0xf8] sm:$0xff] }
 0x1c7   :  { %1074 = vrot.lane.b32.xlu0 %v2907_v40, %s1880_s11 }
 0x1c8   :  { %v3122_v6 = vpop.permute.xlu1 %802 }
 0x1c9   :  { %4362 = vst [vmem:[#allocation129_spill] sm:$0xff] %v3122_v6  ;;  %v3124_v24 = vpop.permute.xlu0 %800 }
 0x1ca   :  { %4363 = vst [vmem:[#allocation130_spill] sm:$0xff] %v3124_v24  ;;  %1080 = vrot.lane.b32.xlu1 %v1040_v18, %s1880_s11  ;;  %v1042_v18 = vld [vmem:[%s4234_s0 + $0x138] sm:$0xff] }
 0x1cb   :  { %1078 = vrot.lane.b32.xlu0 %v2920_v30, %s1880_s11 }
 0x1cc   :  { %v3132_v21 = vpop.permute.xlu1 %806 }
 0x1cd   :  { %4364 = vst [vmem:[#allocation131_spill] sm:$0xff] %v3132_v21  ;;  %v3134_v40 = vpop.permute.xlu0 %804 }
 0x1ce   :  { %4365 = vst [vmem:[#allocation132_spill] sm:$0xff] %v3134_v40  ;;  %1084 = vrot.lane.b32.xlu1 %v1041_v5, %s1880_s11  ;;  %v1043_v5 = vld [vmem:[%s4234_s0 + $0x178] sm:$0xff] }
 0x1cf   :  { %1082 = vrot.lane.b32.xlu0 %v2933_v33, %s1880_s11 }
 0x1d0   :  { %v3142_v24 = vpop.permute.xlu1 %810 }
 0x1d1   :  { %4366 = vst [vmem:[#allocation133_spill] sm:$0xff] %v3142_v24  ;;  %v3144_v30 = vpop.permute.xlu0 %808 }
 0x1d2   :  { %4367 = vst [vmem:[#allocation134_spill] sm:$0xff] %v3144_v30  ;;  %1088 = vrot.lane.b32.xlu1 %v1042_v18, %s1880_s11  ;;  %v1044_v18 = vld [vmem:[%s4234_s0 + $0x1b8] sm:$0xff] }
 0x1d3   :  { %1086 = vrot.lane.b32.xlu0 %v2946_v36, %s1880_s11 }
 0x1d4   :  { %v3152_v40 = vpop.permute.xlu1 %814 }
 0x1d5   :  { %4368 = vst [vmem:[#allocation135_spill] sm:$0xff] %v3152_v40  ;;  %v3154_v33 = vpop.permute.xlu0 %812 }
 0x1d6   :  { %4369 = vst [vmem:[#allocation136_spill] sm:$0xff] %v3154_v33  ;;  %1092 = vrot.lane.b32.xlu1 %v1043_v5, %s1880_s11  ;;  %v1045_v5 = vld [vmem:[%s4234_s0 + $0x1f8] sm:$0xff] }
 0x1d7   :  { %1090 = vrot.lane.b32.xlu0 %v2959_v27, %s1880_s11 }
 0x1d8   :  { %v3162_v30 = vpop.permute.xlu1 %818 }
 0x1d9   :  { %4370 = vst [vmem:[#allocation137_spill] sm:$0xff] %v3162_v30  ;;  %v3164_v36 = vpop.permute.xlu0 %816 }
 0x1da   :  { %4371 = vst [vmem:[#allocation138_spill] sm:$0xff] %v3164_v36  ;;  %1096 = vrot.lane.b32.xlu1 %v1044_v18, %s1880_s11  ;;  %v1046_v18 = vld [vmem:[%s4234_s0 + $0x238] sm:$0xff] }
 0x1db   :  { %1094 = vrot.lane.b32.xlu0 %v2972_v37, %s1880_s11 }
 0x1dc   :  { %v3172_v33 = vpop.permute.xlu1 %822 }
 0x1dd   :  { %4372 = vst [vmem:[#allocation139_spill] sm:$0xff] %v3172_v33  ;;  %v3174_v27 = vpop.permute.xlu0 %820 }
 0x1de   :  { %4373 = vst [vmem:[#allocation140_spill] sm:$0xff] %v3174_v27  ;;  %1100 = vrot.lane.b32.xlu1 %v1045_v5, %s1880_s11  ;;  %v1047_v5 = vld [vmem:[%s4234_s0 + $0x278] sm:$0xff] }
 0x1df   :  { %1098 = vrot.lane.b32.xlu0 %v2985_v16, %s1880_s11 }
 0x1e0   :  { %v3182_v36 = vpop.permute.xlu1 %826 }
 0x1e1   :  { %4374 = vst [vmem:[#allocation141_spill] sm:$0xff] %v3182_v36  ;;  %v3184_v37 = vpop.permute.xlu0 %824 }
 0x1e2   :  { %4375 = vst [vmem:[#allocation142_spill] sm:$0xff] %v3184_v37  ;;  %1104 = vrot.lane.b32.xlu1 %v1046_v18, %s1880_s11  ;;  %v1048_v18 = vld [vmem:[%s4234_s0 + $0x2b8] sm:$0xff] }
 0x1e3   :  { %1102 = vrot.lane.b32.xlu0 %v2998_v7, %s1880_s11 }
 0x1e4   :  { %v3192_v27 = vpop.permute.xlu1 %830 }
 0x1e5   :  { %4376 = vst [vmem:[#allocation143_spill] sm:$0xff] %v3192_v27  ;;  %v3194_v16 = vpop.permute.xlu0 %828 }
 0x1e6   :  { %4377 = vst [vmem:[#allocation144_spill] sm:$0xff] %v3194_v16  ;;  %1108 = vrot.lane.b32.xlu1 %v1047_v5, %s1880_s11  ;;  %v1049_v5 = vld [vmem:[%s4234_s0 + $0x2f8] sm:$0xff] }
 0x1e7   :  { %1106 = vrot.lane.b32.xlu0 %v3011_v14, %s1880_s11 }
 0x1e8   :  { %v3202_v37 = vpop.permute.xlu1 %834 }
 0x1e9   :  { %4378 = vst [vmem:[#allocation145_spill] sm:$0xff] %v3202_v37  ;;  %v3204_v7 = vpop.permute.xlu0 %832 }
 0x1ea   :  { %4379 = vst [vmem:[#allocation146_spill] sm:$0xff] %v3204_v7  ;;  %1112 = vrot.lane.b32.xlu1 %v1048_v18, %s1880_s11  ;;  %v1050_v18 = vld [vmem:[%s4234_s0 + $0x338] sm:$0xff] }
 0x1eb   :  { %1110 = vrot.lane.b32.xlu0 %v3024_v13, %s1880_s11 }
 0x1ec   :  { %v3212_v16 = vpop.permute.xlu1 %838 }
 0x1ed   :  { %4380 = vst [vmem:[#allocation147_spill] sm:$0xff] %v3212_v16  ;;  %v3214_v14 = vpop.permute.xlu0 %836 }
 0x1ee   :  { %4381 = vst [vmem:[#allocation148_spill] sm:$0xff] %v3214_v14  ;;  %1116 = vrot.lane.b32.xlu1 %v1049_v5, %s1880_s11  ;;  %v1051_v5 = vld [vmem:[%s4234_s0 + $0x378] sm:$0xff] }
 0x1ef   :  { %1114 = vrot.lane.b32.xlu0 %v3037_v8, %s1880_s11 }
 0x1f0   :  { %v3222_v7 = vpop.permute.xlu1 %842 }
 0x1f1   :  { %4382 = vst [vmem:[#allocation149_spill] sm:$0xff] %v3222_v7  ;;  %v3224_v13 = vpop.permute.xlu0 %840 }
 0x1f2   :  { %4383 = vst [vmem:[#allocation150_spill] sm:$0xff] %v3224_v13  ;;  %1120 = vrot.lane.b32.xlu1 %v1050_v18, %s1880_s11  ;;  %v1052_v18 = vld [vmem:[%s4234_s0 + $0x3b8] sm:$0xff] }
 0x1f3   :  { %1118 = vrot.lane.b32.xlu0 %v3050_v34, %s1880_s11 }
 0x1f4   :  { %v3232_v14 = vpop.permute.xlu1 %927 }
 0x1f5   :  { %v3234_v8 = vpop.permute.xlu0 %925 }
 0x1f6   :  { %1124 = vrot.lane.b32.xlu1 %v1051_v5, %s1880_s11  ;;  %v1053_v5 = vld [vmem:[%s4234_s0 + $0x3f8] sm:$0xff] }
 0x1f7   :  { %1122 = vrot.lane.b32.xlu0 %v3063_v35, %s1880_s11 }
 0x1f8   :  { %v3242_v13 = vpop.permute.xlu1 %931 }
 0x1f9   :  { %v3244_v34 = vpop.permute.xlu0 %929 }
 0x1fa   :  { %1128 = vrot.lane.b32.xlu1 %v1052_v18, %s1880_s11 }
 0x1fb   :  { %1126 = vrot.lane.b32.xlu0 %v3076_v12, %s1880_s11 }
 0x1fc   :  { %v3252_v7 = vpop.permute.xlu1 %935 }
 0x1fd   :  { %v3254_v35 = vpop.permute.xlu0 %933 }
 0x1fe   :  { %1132 = vrot.lane.b32.xlu1 %v1053_v5, %s1880_s11 }
 0x1ff   :  { %1130 = vrot.lane.b32.xlu0 %v3089_v17, %s1880_s11 }
 0x200   :  { %v3259_v16 = vpop.permute.xlu1 %939 }
 0x201   :  { %v3261_v37 = vpop.permute.xlu0 %937 }
 0x204   :  { %v3263_v18 = vpop.permute.xlu1 %943 }
 0x205   :  { %v3265_v12 = vpop.permute.xlu0 %941 }
 0x206   :  { %4384 = vst [vmem:[#allocation151_spill] sm:$0xff] %v3265_v12 }
 0x208   :  { %v3267_v27 = vpop.permute.xlu1 %947 }
 0x209   :  { %4385 = vst [vmem:[#allocation152_spill] sm:$0xff] %v3267_v27  ;;  %v3269_v36 = vpop.permute.xlu0 %945 }
 0x20c   :  { %v3271_v33 = vpop.permute.xlu1 %951 }
 0x20d   :  { %4386 = vst [vmem:[#allocation153_spill] sm:$0xff] %v3271_v33  ;;  %v3273_v30 = vpop.permute.xlu0 %949 }
 0x20e   :  { %4387 = vst [vmem:[#allocation154_spill] sm:$0xff] %v3273_v30 }
 0x210   :  { %v3275_v5 = vpop.permute.xlu1 %955 }
 0x211   :  { %v3277_v40 = vpop.permute.xlu0 %953 }
 0x212   :  { %4388 = vst [vmem:[#allocation155_spill] sm:$0xff] %v3277_v40 }
 0x214   :  { %v3279_v17 = vpop.permute.xlu1 %959 }
 0x215   :  { %4389 = vst [vmem:[#allocation156_spill] sm:$0xff] %v3279_v17  ;;  %v3281_v24 = vpop.permute.xlu0 %957  ;;  %v137_v17 = vsel %vm136_vm0, %v2142_v47, %v2154_v50  ;;  %v139_v47 = vsel %vm136_vm0, %v2166_v53, %v2164_v52  ;;  %v140_v50 = vsel %vm136_vm0, %v2173_v55, %v2171_v54  ;;  %v1857_v52 = vld [vmem:[%s4234_s0 + $0x40] sm:$0xff]  ;;  %v3338_v54 = vsel %vm136_vm0, %v2185_v59, %v2183_v58 }
 0x216   :  { %4390 = vst [vmem:[#allocation157_spill] sm:$0xff] %v3281_v24  ;;  %v3343_v55 = vsel %vm136_vm0, %v2191_v61, %v2189_v60  ;;  %v1860_v58 = vld [vmem:[%s4234_s0 + $0x100] sm:$0xff]  ;;  %v636_v60 = vsel %vm635_vm3, %v2755_v51, %v2753_v45  ;;  %v3362_v61 = vsel %vm136_vm0, %v2197_v63, %v2195_v62  ;;  %v284_v45 = vsel %vm281_vm1, %v2317_v29, %v2315_v28 }
 0x217   :  { %v3378_v62 = vld [vmem:[%s4234_s0 + $0x180] sm:$0xff]  ;;  %v3404_v29 = vsel %vm136_vm0, %v2209_v3, %v2207_v2 }
 0x218   :  { %v3283_v21 = vpop.permute.xlu1 %963  ;;  %v175_v63 = vmax.f32 %v3378_v62, %v3343_v55  ;;  %v3423_v3 = vld [vmem:[%s4234_s0 + $0x200] sm:$0xff]  ;;  %v4436_v62 = vld [vmem:[#allocation6_spill] sm:$0xff] }
 0x219   :  { %v3285_v6 = vpop.permute.xlu0 %961 }
 0x21c   :  { %v3287_v12 = vpop.permute.xlu1 %967 }
 0x21d   :  { %4391 = vst [vmem:[#allocation158_spill] sm:$0xff] %v3287_v12  ;;  %v3289_v27 = vpop.permute.xlu0 %965  ;;  %v282_v12 = vsel %vm281_vm1, %v2291_v23, %v2289_v22  ;;  %v3320_v22 = vsel %vm136_vm0, %v2179_v57, %v2177_v56  ;;  %v1858_v57 = vld [vmem:[%s4234_s0 + $0x80] sm:$0xff] }
 0x21e   :  { %4392 = vst [vmem:[#allocation159_spill] sm:$0xff] %v3289_v27  ;;  %v1856_v27 = vld [vmem:[%s4234_s0] sm:$0xff]  ;;  %v173_v59 = vmax.f32 %v1860_v58, %v3320_v22 }
 0x220   :  { %v3291_v33 = vpop.permute.xlu1 %971 }
 0x221   :  { %4393 = vst [vmem:[#allocation160_spill] sm:$0xff] %v3291_v33  ;;  %v3293_v30 = vpop.permute.xlu0 %969  ;;  %v169_v33 = vmax.f32 %v1856_v27, %v137_v17 }
 0x222   :  { %4394 = vst [vmem:[#allocation161_spill] sm:$0xff] %v3293_v30  ;;  %v138_v30 = vsel %vm136_vm0, %v2140_v46, %v2152_v49  ;;  %v283_v46 = vsel %vm281_vm1, %v2304_v26, %v2302_v25  ;;  %v491_v49 = vsel %vm490_vm2, %v2603_v41, %v2601_v39  ;;  %v171_v25 = vmax.f32 %v1858_v57, %v139_v47  ;;  %v1859_v26 = vld [vmem:[%s4234_s0 + $0xc0] sm:$0xff] }
 0x223   :  { %v314_v23 = vmax.f32 %v169_v33, %v282_v12  ;;  %v170_v53 = vmax.f32 %v1857_v52, %v138_v30  ;;  %v172_v41 = vmax.f32 %v1859_v26, %v140_v50  ;;  %v3371_v12 = vld [vmem:[%s4234_s0 + $0x140] sm:$0xff]  ;;  %v492_v47 = vsel %vm490_vm2, %v2616_v42, %v2614_v20 }
 0x224   :  { %v3298_v40 = vpop.permute.xlu1 %975  ;;  %v174_v51 = vmax.f32 %v3371_v12, %v3338_v54  ;;  %v3391_v50 = vsel %vm136_vm0, %v2203_v1, %v2201_v0  ;;  %v637_v0 = vsel %vm635_vm3, %v2768_v44, %v2766_v48  ;;  %v845_v1 = vsel %vm844_vm4, %v3067_v10, %v3065_v43  ;;  %v4395_v44 = vld [vmem:[#allocation3_spill] sm:$0xff] }
 0x225   :  { %v3300_v24 = vpop.permute.xlu0 %973  ;;  %v378_v56 = vmax.f32 %v314_v23, %v2499_v9  ;;  %v315_v9 = vmax.f32 %v170_v53, %v283_v46  ;;  %v3397_v46 = vld [vmem:[%s4234_s0 + $0x1c0] sm:$0xff]  ;;  %v316_v42 = vmax.f32 %v171_v25, %v284_v45  ;;  %v177_v10 = vmax.f32 %v3423_v3, %v3391_v50  ;;  %v4460_v3 = vld [vmem:[#allocation8_spill] sm:$0xff] }
 0x226   :  { %v176_v28 = vmax.f32 %v3397_v46, %v3362_v61  ;;  %v3430_v48 = vsel %vm136_vm0, %v4395_v44, %v2213_v4  ;;  %v990_v43 = vsel %vm989_vm5, %v3234_v8, %v3232_v14  ;;  %v4398_v53 = vld [vmem:[#allocation39_spill] sm:$0xff]  ;;  %v4402_v14 = vld [vmem:[#allocation124_spill] sm:$0xff]  ;;  %v4414_v4 = vld [vmem:[#allocation126_spill] sm:$0xff] }
 0x227   :  { %v523_v39 = vmax.f32 %v378_v56, %v491_v49  ;;  %v379_v22 = vmax.f32 %v315_v9, %v2497_v15  ;;  %v285_v15 = vsel %vm281_vm1, %v2330_v32, %v2328_v31  ;;  %v4396_v31 = vld [vmem:[#allocation52_spill] sm:$0xff]  ;;  %v4397_v32 = vld [vmem:[#allocation53_spill] sm:$0xff]  ;;  %v380_v56 = vmax.f32 %v316_v42, %v4398_v53  ;;  %v3442_v26 = vld [vmem:[%s4234_s0 + $0x240] sm:$0xff] }
 0x228   :  { %v3322_v27 = vpop.permute.xlu1 %979  ;;  %v317_v58 = vmax.f32 %v172_v41, %v285_v15  ;;  %v4400_v9 = vld [vmem:[#allocation81_spill] sm:$0xff]  ;;  %v4401_v45 = vld [vmem:[#allocation123_spill] sm:$0xff] }
 0x229   :  { %v3324_v17 = vpop.permute.xlu0 %977  ;;  %v668_v23 = vmax.f32 %v523_v39, %v636_v60  ;;  %v524_v20 = vmax.f32 %v379_v22, %v492_v47  ;;  %v4399_v60 = vld [vmem:[#allocation80_spill] sm:$0xff]  ;;  %v846_v8 = vsel %vm844_vm4, %v4402_v14, %v4401_v45  ;;  %v4403_v47 = vld [vmem:[#allocation14_spill] sm:$0xff]  ;;  %v4404_v22 = vld [vmem:[#allocation15_spill] sm:$0xff] }
 0x22a   :  { %v638_v39 = vsel %vm635_vm3, %v4400_v9, %v4399_v60  ;;  %v3459_v41 = vld [vmem:[%s4234_s0 + $0x280] sm:$0xff]  ;;  %v4409_v14 = vld [vmem:[#allocation16_spill] sm:$0xff] }
 0x22b   :  { %v732_v49 = vmax.f32 %v668_v23, %v2963_v38  ;;  %v493_v38 = vsel %vm490_vm2, %v4397_v32, %v4396_v31  ;;  %v669_v57 = vmax.f32 %v524_v20, %v637_v0  ;;  %v286_v23 = vsel %vm281_vm1, %v4404_v22, %v4403_v47  ;;  %v4406_v31 = vld [vmem:[#allocation54_spill] sm:$0xff]  ;;  %v4407_v32 = vld [vmem:[#allocation55_spill] sm:$0xff]  ;;  %v4410_v47 = vld [vmem:[#allocation17_spill] sm:$0xff] }
 0x22c   :  { %v3364_v30 = vpop.permute.xlu1 %983  ;;  %v525_v0 = vmax.f32 %v380_v56, %v493_v38  ;;  %v494_v53 = vsel %vm490_vm2, %v4407_v32, %v4406_v31  ;;  %v991_v38 = vsel %vm989_vm5, %v3244_v34, %v3242_v13  ;;  %v4408_v56 = vld [vmem:[#allocation38_spill] sm:$0xff]  ;;  %v318_v45 = vmax.f32 %v173_v59, %v286_v23  ;;  %v4412_v15 = vld [vmem:[#allocation83_spill] sm:$0xff]  ;;  %v4413_v32 = vld [vmem:[#allocation125_spill] sm:$0xff] }
 0x22d   :  { %v3366_v33 = vpop.permute.xlu0 %981  ;;  %v877_v25 = vmax.f32 %v732_v49, %v845_v1  ;;  %v4405_v1 = vld [vmem:[#allocation108_spill] sm:$0xff]  ;;  %v287_v22 = vsel %vm281_vm1, %v4410_v47, %v4409_v14  ;;  %v847_v13 = vsel %vm844_vm4, %v4414_v4, %v4413_v32  ;;  %v992_v4 = vsel %vm989_vm5, %v3254_v35, %v3252_v7  ;;  %v4421_v47 = vld [vmem:[#allocation18_spill] sm:$0xff]  ;;  %v4425_v35 = vld [vmem:[#allocation127_spill] sm:$0xff] }
 0x22e   :  { %v733_v42 = vmax.f32 %v669_v57, %v4405_v1  ;;  %v381_v57 = vmax.f32 %v317_v58, %v4408_v56  ;;  %v4411_v1 = vld [vmem:[#allocation82_spill] sm:$0xff]  ;;  %v4416_v23 = vld [vmem:[#allocation4_spill] sm:$0xff]  ;;  %v319_v14 = vmax.f32 %v174_v51, %v287_v22  ;;  %v3518_v12 = vld [vmem:[%s4234_s0 + $0x2c0] sm:$0xff] }
 0x22f   :  { %v1022_v20 = vmax.f32 %v877_v25, %v990_v43  ;;  %v670_v25 = vmax.f32 %v525_v0, %v638_v39  ;;  %v639_v31 = vsel %vm635_vm3, %v4412_v15, %v4411_v1  ;;  %v4419_v15 = vld [vmem:[#allocation57_spill] sm:$0xff]  ;;  %v4422_v1 = vld [vmem:[#allocation19_spill] sm:$0xff]  ;;  %v4427_v22 = vld [vmem:[#allocation58_spill] sm:$0xff] }
 0x230   :  { %v3416_v52 = vpop.permute.xlu1 %987  ;;  %v878_v60 = vmax.f32 %v733_v42, %v846_v8  ;;  %v526_v34 = vmax.f32 %v381_v57, %v494_v53  ;;  %v4417_v42 = vld [vmem:[#allocation5_spill] sm:$0xff]  ;;  %v288_v32 = vsel %vm281_vm1, %v4422_v1, %v4421_v47  ;;  %v4432_v47 = vld [vmem:[#allocation86_spill] sm:$0xff]  ;;  %v4433_v1 = vld [vmem:[#allocation87_spill] sm:$0xff] }
 0x231   :  { %v3418_v2 = vpop.permute.xlu0 %985  ;;  %v3580_v46 = vld [vmem:[%s4234_s0 + $0x300] sm:$0xff] }
 0x232   :  { %v1023_v39 = vmax.f32 %v878_v60, %v991_v38  ;;  %v4420_v38 = vld [vmem:[#allocation41_spill] sm:$0xff]  ;;  %v671_v57 = vmax.f32 %v526_v34, %v639_v31 }
 0x233   :  { %v382_v56 = vmax.f32 %v318_v45, %v4420_v38  ;;  %v848_v45 = vsel %vm844_vm4, %v4425_v35, %v3102_v19  ;;  %v320_v38 = vmax.f32 %v175_v63, %v288_v32  ;;  %v4437_v63 = vld [vmem:[#allocation7_spill] sm:$0xff] }
 0x234   :  { %v1073_v49 = vpop.permute.xlu1 %1072  ;;  %v3550_v32 = vsel %vm136_vm0, %v4437_v63, %v4436_v62  ;;  %v4452_v62 = vld [vmem:[#allocation42_spill] sm:$0xff] }
 0x235   :  { %v1071_v44 = vpop.permute.xlu0 %1070 }
 0x236   :  { %v1135_v43 = vsel %vm1134_vm6, %v1071_v44, %v1073_v49  ;;  %v4415_v49 = vld [vmem:[#allocation110_spill] sm:$0xff]  ;;  %v4418_v44 = vld [vmem:[#allocation56_spill] sm:$0xff] }
 0x237   :  { %v3471_v9 = vmax.f32 %v1022_v20, %v1135_v43  ;;  %v734_v58 = vmax.f32 %v670_v25, %v4415_v49  ;;  %v3488_v20 = vsel %vm136_vm0, %v4417_v42, %v4416_v23  ;;  %v495_v43 = vsel %vm490_vm2, %v4419_v15, %v4418_v44  ;;  %v4423_v49 = vld [vmem:[#allocation84_spill] sm:$0xff]  ;;  %v4424_v23 = vld [vmem:[#allocation85_spill] sm:$0xff] }
 0x238   :  { %v1077_v8 = vpop.permute.xlu1 %1076  ;;  %v640_v7 = vsel %vm635_vm3, %v4424_v23, %v4423_v49  ;;  %v527_v31 = vmax.f32 %v382_v56, %v495_v43  ;;  %v180_v51 = vmax.f32 %v3518_v12, %v3488_v20  ;;  %v4429_v44 = vld [vmem:[#allocation40_spill] sm:$0xff]  ;;  %v1870_v12 = vld [vmem:[%s4234_s0 + $0x380] sm:$0xff] }
 0x239   :  { %v1075_v0 = vpop.permute.xlu0 %1074  ;;  %v1185_v59 = vsel %vm844_vm4, %v3471_v9, -inf  ;;  %v879_v25 = vmax.f32 %v734_v58, %v847_v13  ;;  %v4426_v13 = vld [vmem:[#allocation109_spill] sm:$0xff]  ;;  %v383_v15 = vmax.f32 %v319_v14, %v4429_v44  ;;  %v4430_v56 = vld [vmem:[#allocation20_spill] sm:$0xff]  ;;  %v4442_v44 = vld [vmem:[#allocation22_spill] sm:$0xff] }
 0x23a   :  { %v1136_v53 = vsel %vm1134_vm6, %v1075_v0, %v1077_v8  ;;  %1186 = vmax.xlane.f32.xlu0 %v1185_v59  ;;  %v735_v34 = vmax.f32 %v671_v57, %v4426_v13  ;;  %v4428_v0 = vld [vmem:[#allocation59_spill] sm:$0xff]  ;;  %v993_v59 = vsel %vm989_vm5, %v3261_v37, %v3259_v16  ;;  %v672_v43 = vmax.f32 %v527_v31, %v640_v7  ;;  %v4431_v57 = vld [vmem:[#allocation21_spill] sm:$0xff]  ;;  %v4434_v16 = vld [vmem:[#allocation128_spill] sm:$0xff] }
 0x23b   :  { %v3498_v60 = vmax.f32 %v1023_v39, %v1136_v53  ;;  %v1024_v58 = vmax.f32 %v879_v25, %v992_v4  ;;  %v496_v19 = vsel %vm490_vm2, %v4428_v0, %v4427_v22  ;;  %v289_v25 = vsel %vm281_vm1, %v4431_v57, %v4430_v56  ;;  %v4435_v23 = vld [vmem:[#allocation112_spill] sm:$0xff]  ;;  %v4445_v56 = vld [vmem:[#allocation89_spill] sm:$0xff] }
 0x23c   :  { %v1081_v39 = vpop.permute.xlu1 %1080  ;;  %v880_v4 = vmax.f32 %v735_v34, %v848_v45  ;;  %v641_v37 = vsel %vm635_vm3, %v4433_v1, %v4432_v47  ;;  %v849_v14 = vsel %vm844_vm4, %v4434_v16, %v3112_v11  ;;  %v528_v49 = vmax.f32 %v383_v15, %v496_v19  ;;  %v4438_v13 = vld [vmem:[#allocation60_spill] sm:$0xff]  ;;  %v4439_v34 = vld [vmem:[#allocation61_spill] sm:$0xff]  ;;  %v4440_v11 = vld [vmem:[#allocation151_spill] sm:$0xff] }
 0x23d   :  { %v1079_v8 = vpop.permute.xlu0 %1078  ;;  %v1188_v54 = vsel %vm844_vm4, %v3498_v60, -inf  ;;  %v736_v7 = vmax.f32 %v672_v43, %v4435_v23  ;;  %v4443_v15 = vld [vmem:[#allocation23_spill] sm:$0xff]  ;;  %v4446_v57 = vld [vmem:[#allocation129_spill] sm:$0xff]  ;;  %v4447_v47 = vld [vmem:[#allocation130_spill] sm:$0xff] }
 0x23e   :  { %v1137_v42 = vsel %vm1134_vm6, %v1079_v8, %v1081_v39  ;;  %1189 = vmax.xlane.f32.xlu1 %v1188_v54  ;;  %v1025_v35 = vmax.f32 %v880_v4, %v993_v59  ;;  %v994_v39 = vsel %vm989_vm5, %v4440_v11, %v3263_v18  ;;  %v4441_v54 = vld [vmem:[#allocation43_spill] sm:$0xff]  ;;  %v673_v0 = vmax.f32 %v528_v49, %v641_v37  ;;  %v4444_v4 = vld [vmem:[#allocation88_spill] sm:$0xff] }
 0x23f   :  { %v3530_v53 = vmax.f32 %v1024_v58, %v1137_v42  ;;  %v497_v58 = vsel %vm490_vm2, %v4439_v34, %v4438_v13  ;;  %v384_v22 = vmax.f32 %v320_v38, %v4441_v54  ;;  %v881_v19 = vmax.f32 %v736_v7, %v849_v14  ;;  %v4448_v37 = vld [vmem:[#allocation111_spill] sm:$0xff] }
 0x240   :  { %v1085_v45 = vpop.permute.xlu1 %1084  ;;  %v321_v42 = vmax.f32 %v176_v28, %v289_v25  ;;  %v290_v43 = vsel %vm281_vm1, %v4443_v15, %v4442_v44  ;;  %v642_v18 = vsel %vm635_vm3, %v4445_v56, %v4444_v4  ;;  %v850_v38 = vsel %vm844_vm4, %v4447_v47, %v4446_v57  ;;  %v4449_v25 = vld [vmem:[#allocation62_spill] sm:$0xff]  ;;  %v4450_v7 = vld [vmem:[#allocation63_spill] sm:$0xff]  ;;  %v4458_v44 = vld [vmem:[#allocation132_spill] sm:$0xff] }
 0x241   :  { %v1083_v31 = vpop.permute.xlu0 %1082  ;;  %v1191_v55 = vsel %vm844_vm4, %v3530_v53, -inf  ;;  %v529_v1 = vmax.f32 %v384_v22, %v497_v58  ;;  %v737_v16 = vmax.f32 %v673_v0, %v4448_v37  ;;  %v1026_v14 = vmax.f32 %v881_v19, %v994_v39  ;;  %v4453_v39 = vld [vmem:[#allocation24_spill] sm:$0xff]  ;;  %v4455_v22 = vld [vmem:[#allocation90_spill] sm:$0xff]  ;;  %v4456_v0 = vld [vmem:[#allocation91_spill] sm:$0xff] }
 0x242   :  { %v1138_v8 = vsel %vm1134_vm6, %v1083_v31, %v1085_v45  ;;  %1192 = vmax.xlane.f32.xlu0 %v1191_v55  ;;  %v181_v28 = vmax.f32 %v3580_v46, %v3550_v32  ;;  %v4451_v45 = vld [vmem:[#allocation152_spill] sm:$0xff]  ;;  %v385_v63 = vmax.f32 %v321_v42, %v4452_v62  ;;  %v322_v11 = vmax.f32 %v177_v10, %v290_v43  ;;  %v4457_v19 = vld [vmem:[#allocation131_spill] sm:$0xff]  ;;  %v4459_v4 = vld [vmem:[#allocation114_spill] sm:$0xff] }
 0x243   :  { %v3560_v59 = vmax.f32 %v1025_v35, %v1138_v8  ;;  %v498_v35 = vsel %vm490_vm2, %v4450_v7, %v4449_v25  ;;  %v995_v31 = vsel %vm989_vm5, %v3269_v36, %v4451_v45  ;;  %v674_v13 = vmax.f32 %v529_v1, %v642_v18  ;;  %v4454_v8 = vld [vmem:[#allocation25_spill] sm:$0xff]  ;;  %v4468_v62 = vld [vmem:[#allocation26_spill] sm:$0xff]  ;;  %v4511_v46 = vld [vmem:[#allocation12_spill] sm:$0xff] }
 0x244   :  { %v1089_v49 = vpop.permute.xlu1 %1088  ;;  %v882_v34 = vmax.f32 %v737_v16, %v850_v38  ;;  %v291_v54 = vsel %vm281_vm1, %v4454_v8, %v4453_v39  ;;  %v643_v36 = vsel %vm635_vm3, %v4456_v0, %v4455_v22  ;;  %v851_v42 = vsel %vm844_vm4, %v4458_v44, %v4457_v19  ;;  %v4461_v10 = vld [vmem:[#allocation9_spill] sm:$0xff]  ;;  %v4462_v38 = vld [vmem:[#allocation64_spill] sm:$0xff]  ;;  %v4473_v0 = vld [vmem:[#allocation134_spill] sm:$0xff] }
 0x245   :  { %v1087_v23 = vpop.permute.xlu0 %1086  ;;  %v1194_v61 = vsel %vm844_vm4, %v3560_v59, -inf  ;;  %v530_v15 = vmax.f32 %v385_v63, %v498_v35  ;;  %v738_v56 = vmax.f32 %v674_v13, %v4459_v4  ;;  %v3612_v43 = vsel %vm136_vm0, %v4461_v10, %v4460_v3  ;;  %v4463_v1 = vld [vmem:[#allocation65_spill] sm:$0xff]  ;;  %v4469_v63 = vld [vmem:[#allocation27_spill] sm:$0xff]  ;;  %v4478_v10 = vld [vmem:[#allocation44_spill] sm:$0xff] }
 0x246   :  { %v1139_v55 = vsel %vm1134_vm6, %v1087_v23, %v1089_v49  ;;  %1195 = vmax.xlane.f32.xlu0 %v1194_v61  ;;  %v1027_v18 = vmax.f32 %v882_v34, %v995_v31  ;;  %v499_v37 = vsel %vm490_vm2, %v4463_v1, %v4462_v38  ;;  %v4464_v16 = vld [vmem:[#allocation153_spill] sm:$0xff]  ;;  %v4467_v31 = vmax.f32 %v3442_v26, %v3404_v29  ;;  %v4470_v34 = vld [vmem:[#allocation92_spill] sm:$0xff]  ;;  %v3642_v26 = vld [vmem:[%s4234_s0 + $0x340] sm:$0xff] }
 0x247   :  { %v3592_v58 = vmax.f32 %v1026_v14, %v1139_v55  ;;  %v4465_v14 = vld [vmem:[#allocation154_spill] sm:$0xff]  ;;  %v4466_v61 = vld [vmem:[#allocation45_spill] sm:$0xff]  ;;  %v675_v7 = vmax.f32 %v530_v15, %v643_v36  ;;  %v883_v35 = vmax.f32 %v738_v56, %v851_v42  ;;  %v292_v13 = vsel %vm281_vm1, %v4469_v63, %v4468_v62  ;;  %v4485_v62 = vld [vmem:[#allocation136_spill] sm:$0xff] }
 0x248   :  { %v1093_v57 = vpop.permute.xlu1 %1092  ;;  %v996_v49 = vsel %vm989_vm5, %v4465_v14, %v4464_v16  ;;  %v386_v25 = vmax.f32 %v322_v11, %v4466_v61  ;;  %v323_v55 = vmax.f32 %v4467_v31, %v291_v54  ;;  %v4471_v39 = vld [vmem:[#allocation93_spill] sm:$0xff]  ;;  %v182_v54 = vmax.f32 %v3642_v26, %v3612_v43  ;;  %v4475_v56 = vld [vmem:[#allocation66_spill] sm:$0xff]  ;;  %v4484_v31 = vld [vmem:[#allocation135_spill] sm:$0xff] }
 0x249   :  { %v1091_v47 = vpop.permute.xlu0 %1090  ;;  %v1197_v50 = vsel %vm844_vm4, %v3592_v58, -inf  ;;  %v644_v8 = vsel %vm635_vm3, %v4471_v39, %v4470_v34  ;;  %v4472_v22 = vld [vmem:[#allocation133_spill] sm:$0xff]  ;;  %v1028_v42 = vmax.f32 %v883_v35, %v996_v49  ;;  %v4479_v14 = vmax.f32 %v3459_v41, %v3430_v48  ;;  %v4483_v35 = vld [vmem:[#allocation95_spill] sm:$0xff]  ;;  %v4486_v34 = vld [vmem:[#allocation116_spill] sm:$0xff] }
 0x24a   :  { %v1140_v23 = vsel %vm1134_vm6, %v1091_v47, %v1093_v57  ;;  %1198 = vmax.xlane.f32.xlu1 %v1197_v50  ;;  %v852_v11 = vsel %vm844_vm4, %v4473_v0, %v4472_v22  ;;  %v531_v36 = vmax.f32 %v386_v25, %v499_v37  ;;  %v4474_v19 = vld [vmem:[#allocation113_spill] sm:$0xff]  ;;  %v4477_v47 = vld [vmem:[#allocation155_spill] sm:$0xff]  ;;  %v387_v38 = vmax.f32 %v323_v55, %v4478_v10  ;;  %v4487_v41 = vld [vmem:[#allocation10_spill] sm:$0xff] }
 0x24b   :  { %v3622_v45 = vmax.f32 %v1027_v18, %v1140_v23  ;;  %v739_v44 = vmax.f32 %v675_v7, %v4474_v19  ;;  %v4476_v18 = vld [vmem:[#allocation67_spill] sm:$0xff]  ;;  %v997_v50 = vsel %vm989_vm5, %v4477_v47, %v3275_v5  ;;  %v324_v49 = vmax.f32 %v4479_v14, %v292_v13  ;;  %v4480_v23 = vld [vmem:[#allocation28_spill] sm:$0xff]  ;;  %v4481_v61 = vld [vmem:[#allocation29_spill] sm:$0xff] }
 0x24c   :  { %v1097_v15 = vpop.permute.xlu1 %1096  ;;  %v500_v57 = vsel %vm490_vm2, %v4476_v18, %v4475_v56  ;;  %v676_v1 = vmax.f32 %v531_v36, %v644_v8  ;;  %v293_v25 = vsel %vm281_vm1, %v4481_v61, %v4480_v23  ;;  %v4482_v7 = vld [vmem:[#allocation94_spill] sm:$0xff]  ;;  %v853_v55 = vsel %vm844_vm4, %v4485_v62, %v4484_v31  ;;  %v4488_v13 = vld [vmem:[#allocation11_spill] sm:$0xff]  ;;  %v4489_v36 = vld [vmem:[#allocation68_spill] sm:$0xff] }
 0x24d   :  { %v1095_v4 = vpop.permute.xlu0 %1094  ;;  %v1200_v29 = vsel %vm844_vm4, %v3622_v45, -inf  ;;  %v884_v37 = vmax.f32 %v739_v44, %v852_v11  ;;  %v645_v5 = vsel %vm635_vm3, %v4483_v35, %v4482_v7  ;;  %v532_v63 = vmax.f32 %v387_v38, %v500_v57  ;;  %v4490_v19 = vld [vmem:[#allocation69_spill] sm:$0xff]  ;;  %v4493_v56 = vld [vmem:[#allocation47_spill] sm:$0xff]  ;;  %v4494_v10 = vld [vmem:[#allocation30_spill] sm:$0xff] }
 0x24e   :  { %v1141_v3 = vsel %vm1134_vm6, %v1095_v4, %v1097_v15  ;;  %1201 = vmax.xlane.f32.xlu0 %v1200_v29  ;;  %v740_v39 = vmax.f32 %v676_v1, %v4486_v34  ;;  %v3674_v11 = vsel %vm136_vm0, %v4488_v13, %v4487_v41  ;;  %v501_v44 = vsel %vm490_vm2, %v4490_v19, %v4489_v36  ;;  %v4492_v15 = vld [vmem:[#allocation157_spill] sm:$0xff]  ;;  %v4495_v38 = vld [vmem:[#allocation31_spill] sm:$0xff]  ;;  %v4499_v7 = vld [vmem:[#allocation138_spill] sm:$0xff] }
 0x24f   :  { %v3654_v16 = vmax.f32 %v1028_v42, %v1141_v3  ;;  %v1029_v8 = vmax.f32 %v884_v37, %v997_v50  ;;  %v4491_v42 = vld [vmem:[#allocation156_spill] sm:$0xff]  ;;  %v388_v18 = vmax.f32 %v324_v49, %v4493_v56  ;;  %v677_v57 = vmax.f32 %v532_v63, %v645_v5  ;;  %v4497_v14 = vld [vmem:[#allocation97_spill] sm:$0xff]  ;;  %v4500_v5 = vld [vmem:[#allocation115_spill] sm:$0xff] }
 0x250   :  { %v1101_v22 = vpop.permute.xlu1 %1100  ;;  %v998_v4 = vsel %vm989_vm5, %v4492_v15, %v4491_v42  ;;  %v885_v47 = vmax.f32 %v740_v39, %v853_v55  ;;  %v325_v3 = vmax.f32 %v180_v51, %v293_v25  ;;  %v294_v1 = vsel %vm281_vm1, %v4495_v38, %v4494_v10  ;;  %v4496_v37 = vld [vmem:[#allocation96_spill] sm:$0xff]  ;;  %v4498_v61 = vld [vmem:[#allocation137_spill] sm:$0xff]  ;;  %v4501_v25 = vld [vmem:[#allocation70_spill] sm:$0xff] }
 0x251   :  { %v1099_v0 = vpop.permute.xlu0 %1098  ;;  %v1203_v48 = vsel %vm844_vm4, %v3654_v16, -inf  ;;  %v646_v23 = vsel %vm635_vm3, %v4497_v14, %v4496_v37  ;;  %v854_v49 = vsel %vm844_vm4, %v4499_v7, %v4498_v61  ;;  %v533_v35 = vmax.f32 %v388_v18, %v501_v44  ;;  %v4502_v34 = vld [vmem:[#allocation71_spill] sm:$0xff]  ;;  %v4504_v19 = vld [vmem:[#allocation32_spill] sm:$0xff]  ;;  %v4505_v44 = vld [vmem:[#allocation33_spill] sm:$0xff] }
 0x252   :  { %v1142_v29 = vsel %vm1134_vm6, %v1099_v0, %v1101_v22  ;;  %1204 = vmax.xlane.f32.xlu1 %v1203_v48  ;;  %v741_v31 = vmax.f32 %v677_v57, %v4500_v5  ;;  %v1030_v62 = vmax.f32 %v885_v47, %v998_v4  ;;  %v183_v51 = vmax.f32 %v1870_v12, %v3674_v11  ;;  %v4503_v0 = vld [vmem:[#allocation46_spill] sm:$0xff]  ;;  %v4507_v4 = vld [vmem:[#allocation99_spill] sm:$0xff]  ;;  %v4513_v37 = vld [vmem:[#allocation72_spill] sm:$0xff] }
 0x253   :  { %v3684_v50 = vmax.f32 %v1029_v8, %v1142_v29  ;;  %v502_v39 = vsel %vm490_vm2, %v4502_v34, %v4501_v25  ;;  %v999_v8 = vsel %vm989_vm5, %v3285_v6, %v3283_v21  ;;  %v389_v48 = vmax.f32 %v325_v3, %v4503_v0  ;;  %v4506_v15 = vld [vmem:[#allocation98_spill] sm:$0xff]  ;;  %v4508_v21 = vld [vmem:[#allocation139_spill] sm:$0xff]  ;;  %v4509_v29 = vld [vmem:[#allocation140_spill] sm:$0xff] }
 0x254   :  { %v1105_v55 = vpop.permute.xlu1 %1104  ;;  %v678_v41 = vmax.f32 %v533_v35, %v646_v23  ;;  %v886_v13 = vmax.f32 %v741_v31, %v854_v49  ;;  %v326_v11 = vmax.f32 %v181_v28, %v294_v1  ;;  %v295_v42 = vsel %vm281_vm1, %v4505_v44, %v4504_v19  ;;  %v4510_v57 = vld [vmem:[#allocation118_spill] sm:$0xff]  ;;  %v4512_v28 = vld [vmem:[#allocation13_spill] sm:$0xff]  ;;  %v4516_v7 = vld [vmem:[#allocation159_spill] sm:$0xff] }
 0x255   :  { %v1103_v63 = vpop.permute.xlu0 %1102  ;;  %v1206_v20 = vsel %vm844_vm4, %v3684_v50, -inf  ;;  %v647_v6 = vsel %vm635_vm3, %v4507_v4, %v4506_v15  ;;  %v855_v56 = vsel %vm844_vm4, %v4509_v29, %v4508_v21  ;;  %v534_v18 = vmax.f32 %v389_v48, %v502_v39  ;;  %v4514_v14 = vld [vmem:[#allocation73_spill] sm:$0xff]  ;;  %v4515_v61 = vld [vmem:[#allocation158_spill] sm:$0xff]  ;;  %v4519_v25 = vld [vmem:[#allocation35_spill] sm:$0xff] }
 0x256   :  { %v1143_v22 = vsel %vm1134_vm6, %v1103_v63, %v1105_v55  ;;  %1207 = vmax.xlane.f32.xlu0 %v1206_v20  ;;  %v742_v47 = vmax.f32 %v678_v41, %v4510_v57  ;;  %v1031_v3 = vmax.f32 %v886_v13, %v999_v8  ;;  %v152_v1 = vsel %vm136_vm0, %v4512_v28, %v4511_v46  ;;  %v4517_v5 = vld [vmem:[#allocation49_spill] sm:$0xff]  ;;  %v4518_v12 = vld [vmem:[#allocation34_spill] sm:$0xff]  ;;  %v4520_v39 = vld [vmem:[#allocation100_spill] sm:$0xff] }
 0x257   :  { %v3713_v36 = vmax.f32 %v1030_v62, %v1143_v22  ;;  %v503_v23 = vsel %vm490_vm2, %v4514_v14, %v4513_v37  ;;  %v1000_v49 = vsel %vm989_vm5, %v4516_v7, %v4515_v61  ;;  %v390_v31 = vmax.f32 %v326_v11, %v4517_v5  ;;  %v4521_v8 = vld [vmem:[#allocation101_spill] sm:$0xff]  ;;  %v4523_v48 = vld [vmem:[#allocation142_spill] sm:$0xff]  ;;  %v4525_v26 = vld [vmem:[#allocation36_spill] sm:$0xff] }
 0x258   :  { %v1109_v10 = vpop.permute.xlu1 %1108  ;;  %v679_v62 = vmax.f32 %v534_v18, %v647_v6  ;;  %v887_v55 = vmax.f32 %v742_v47, %v855_v56  ;;  %v327_v20 = vmax.f32 %v182_v54, %v295_v42  ;;  %v296_v34 = vsel %vm281_vm1, %v4519_v25, %v4518_v12  ;;  %v4522_v0 = vld [vmem:[#allocation141_spill] sm:$0xff]  ;;  %v4527_v6 = vld [vmem:[#allocation74_spill] sm:$0xff]  ;;  %v4528_v21 = vld [vmem:[#allocation75_spill] sm:$0xff] }
 0x259   :  { %v1107_v38 = vpop.permute.xlu0 %1106  ;;  %v1209_v32 = vsel %vm844_vm4, %v3713_v36, -inf  ;;  %v648_v22 = vsel %vm635_vm3, %v4521_v8, %v4520_v39  ;;  %v856_v41 = vsel %vm844_vm4, %v4523_v48, %v4522_v0  ;;  %v535_v13 = vmax.f32 %v390_v31, %v503_v23  ;;  %v4524_v11 = vld [vmem:[#allocation117_spill] sm:$0xff]  ;;  %v4529_v56 = vld [vmem:[#allocation160_spill] sm:$0xff]  ;;  %v1871_v28 = vld [vmem:[%s4234_s0 + $0x3c0] sm:$0xff] }
 0x25a   :  { %v1144_v35 = vsel %vm1134_vm6, %v1107_v38, %v1109_v10  ;;  %1210 = vmax.xlane.f32.xlu1 %v1209_v32  ;;  %v743_v19 = vmax.f32 %v679_v62, %v4524_v11  ;;  %v1032_v44 = vmax.f32 %v887_v55, %v1000_v49  ;;  %v4526_v54 = vld [vmem:[#allocation37_spill] sm:$0xff]  ;;  %v504_v29 = vsel %vm490_vm2, %v4528_v21, %v4527_v6  ;;  %v4532_v23 = vld [vmem:[#allocation102_spill] sm:$0xff]  ;;  %v4533_v61 = vld [vmem:[#allocation103_spill] sm:$0xff] }
 0x25b   :  { %v3741_v63 = vmax.f32 %v1031_v3, %v1144_v35  ;;  %v297_v42 = vsel %vm281_vm1, %v4526_v54, %v4525_v26  ;;  %v4530_v18 = vld [vmem:[#allocation161_spill] sm:$0xff]  ;;  %v4531_v3 = vld [vmem:[#allocation48_spill] sm:$0xff]  ;;  %v680_v38 = vmax.f32 %v535_v13, %v648_v22  ;;  %v184_v37 = vmax.f32 %v1871_v28, %v152_v1  ;;  %v4534_v49 = vld [vmem:[#allocation143_spill] sm:$0xff] }
 0x25c   :  { %v1113_v15 = vpop.permute.xlu1 %1112  ;;  %v1001_v57 = vsel %vm989_vm5, %v4530_v18, %v4529_v56  ;;  %v391_v10 = vmax.f32 %v327_v20, %v4531_v3  ;;  %v888_v32 = vmax.f32 %v743_v19, %v856_v41  ;;  %v328_v14 = vmax.f32 %v183_v51, %v296_v34  ;;  %v4535_v35 = vld [vmem:[#allocation144_spill] sm:$0xff]  ;;  %v4538_v51 = vld [vmem:[#allocation77_spill] sm:$0xff]  ;;  %v4539_v48 = vld [vmem:[#allocation51_spill] sm:$0xff] }
 0x25d   :  { %v1111_v4 = vpop.permute.xlu0 %1110  ;;  %v1212_v43 = vsel %vm844_vm4, %v3741_v63, -inf  ;;  %v649_v7 = vsel %vm635_vm3, %v4533_v61, %v4532_v23  ;;  %v857_v5 = vsel %vm844_vm4, %v4535_v35, %v4534_v49  ;;  %v4536_v62 = vld [vmem:[#allocation120_spill] sm:$0xff]  ;;  %v329_v8 = vmax.f32 %v184_v37, %v297_v42  ;;  %v4543_v54 = vld [vmem:[#allocation145_spill] sm:$0xff]  ;;  %v4544_v42 = vld [vmem:[#allocation146_spill] sm:$0xff] }
 0x25e   :  { %v1145_v47 = vsel %vm1134_vm6, %v1111_v4, %v1113_v15  ;;  %1213 = vmax.xlane.f32.xlu0 %v1212_v43  ;;  %v536_v31 = vmax.f32 %v391_v10, %v504_v29  ;;  %v744_v55 = vmax.f32 %v680_v38, %v4536_v62  ;;  %v1033_v20 = vmax.f32 %v888_v32, %v1001_v57  ;;  %v4537_v1 = vld [vmem:[#allocation76_spill] sm:$0xff]  ;;  %v4542_v43 = vld [vmem:[#allocation105_spill] sm:$0xff]  ;;  %v4547_v3 = vld [vmem:[#allocation79_spill] sm:$0xff] }
 0x25f   :  { %v3769_v46 = vmax.f32 %v1032_v44, %v1145_v47  ;;  %v505_v34 = vsel %vm490_vm2, %v4538_v51, %v4537_v1  ;;  %v1002_v22 = vsel %vm989_vm5, %v3300_v24, %v3298_v40  ;;  %v392_v41 = vmax.f32 %v328_v14, %v4539_v48  ;;  %v4540_v44 = vld [vmem:[#allocation50_spill] sm:$0xff]  ;;  %v4541_v4 = vld [vmem:[#allocation104_spill] sm:$0xff]  ;;  %v4545_v40 = vld [vmem:[#allocation119_spill] sm:$0xff] }
 0x260   :  { %v1117_v12 = vpop.permute.xlu1 %1116  ;;  %v681_v13 = vmax.f32 %v536_v31, %v649_v7  ;;  %v889_v11 = vmax.f32 %v744_v55, %v857_v5  ;;  %v393_v15 = vmax.f32 %v329_v8, %v4540_v44  ;;  %v650_v26 = vsel %vm635_vm3, %v4542_v43, %v4541_v4  ;;  %v4546_v47 = vld [vmem:[#allocation78_spill] sm:$0xff]  ;;  %v4549_v7 = vld [vmem:[#allocation107_spill] sm:$0xff]  ;;  %v4551_v5 = vld [vmem:[#allocation148_spill] sm:$0xff] }
 0x261   :  { %v1115_v25 = vpop.permute.xlu0 %1114  ;;  %v1215_v39 = vsel %vm844_vm4, %v3769_v46, -inf  ;;  %v858_v6 = vsel %vm844_vm4, %v4544_v42, %v4543_v54  ;;  %v537_v24 = vmax.f32 %v392_v41, %v505_v34  ;;  %v506_v10 = vsel %vm490_vm2, %v4547_v3, %v4546_v47  ;;  %v4548_v61 = vld [vmem:[#allocation106_spill] sm:$0xff]  ;;  %v4550_v35 = vld [vmem:[#allocation147_spill] sm:$0xff] }
 0x262   :  { %v1146_v0 = vsel %vm1134_vm6, %v1115_v25, %v1117_v12  ;;  %1216 = vmax.xlane.f32.xlu1 %v1215_v39  ;;  %v745_v21 = vmax.f32 %v681_v13, %v4545_v40  ;;  %v1034_v29 = vmax.f32 %v889_v11, %v1002_v22  ;;  %v1003_v38 = vsel %vm989_vm5, %v3324_v17, %v3322_v27  ;;  %v4552_v31 = vld [vmem:[#allocation122_spill] sm:$0xff]  ;;  %v4555_v13 = vld [vmem:[#allocation121_spill] sm:$0xff] }
 0x263   :  { %v3791_v19 = vmax.f32 %v1033_v20, %v1146_v0  ;;  %v682_v28 = vmax.f32 %v537_v24, %v650_v26  ;;  %v651_v49 = vsel %vm635_vm3, %v4549_v7, %v4548_v61  ;;  %v859_v27 = vsel %vm844_vm4, %v4551_v5, %v4550_v35  ;;  %v4553_v0 = vld [vmem:[#allocation149_spill] sm:$0xff]  ;;  %v4554_v48 = vld [vmem:[#allocation150_spill] sm:$0xff] }
 0x264   :  { %v1121_v56 = vpop.permute.xlu1 %1120  ;;  %v890_v37 = vmax.f32 %v745_v21, %v858_v6  ;;  %v538_v17 = vmax.f32 %v393_v15, %v506_v10  ;;  %v1004_v39 = vsel %vm989_vm5, %v3366_v33, %v3364_v30  ;;  %v860_v41 = vsel %vm844_vm4, %v4554_v48, %v4553_v0 }
 0x265   :  { %v1119_v18 = vpop.permute.xlu0 %1118  ;;  %v1218_v57 = vsel %vm844_vm4, %v3791_v19, -inf  ;;  %v3814_v23 = vsel %vm1712_vm7, %v3791_v19, -inf  ;;  %v746_v62 = vmax.f32 %v682_v28, %v4552_v31  ;;  %v1005_v4 = vsel %vm989_vm5, %v3418_v2, %v3416_v52 }
 0x266   :  { %v1147_v32 = vsel %vm1134_vm6, %v1119_v18, %v1121_v56  ;;  %1219 = vmax.xlane.f32.xlu0 %v1218_v57  ;;  %v1035_v55 = vmax.f32 %v890_v37, %v1003_v38  ;;  %v683_v1 = vmax.f32 %v538_v17, %v651_v49  ;;  %v1251_v56 = vsel %vm1250_vm8, %v3471_v9, -inf }
 0x267   :  { %v3810_v14 = vmax.f32 %v1034_v29, %v1147_v32  ;;  %v891_v51 = vmax.f32 %v746_v62, %v859_v27  ;;  %v1257_v47 = vsel %vm1250_vm8, %v3530_v53, -inf  ;;  %v1254_v3 = vsel %vm1250_vm8, %v3498_v60, -inf }
 0x268   :  { %v1125_v20 = vpop.permute.xlu1 %1124  ;;  %v747_v11 = vmax.f32 %v683_v1, %v4555_v13  ;;  %v1263_v10 = vsel %vm1250_vm8, %v3592_v58, -inf  ;;  %v1260_v38 = vsel %vm1250_vm8, %v3560_v59, -inf  ;;  %v1269_v32 = vsel %vm1250_vm8, %v3654_v16, -inf }
 0x269   :  { %v1123_v12 = vpop.permute.xlu0 %1122  ;;  %v1221_v25 = vsel %vm844_vm4, %v3810_v14, -inf  ;;  %v3833_v22 = vsel %vm1712_vm7, %v3810_v14, -inf  ;;  %v1036_v44 = vmax.f32 %v891_v51, %v1004_v39  ;;  %v1266_v28 = vsel %vm1250_vm8, %v3622_v45, -inf }
 0x26a   :  { %v1148_v8 = vsel %vm1134_vm6, %v1123_v12, %v1125_v20  ;;  %1222 = vmax.xlane.f32.xlu1 %v1221_v25  ;;  %v892_v26 = vmax.f32 %v747_v11, %v860_v41  ;;  %v1275_v37 = vsel %vm1250_vm8, %v3713_v36, -inf  ;;  %v1272_v61 = vsel %vm1250_vm8, %v3684_v50, -inf }
 0x26b   :  { %v3829_v34 = vmax.f32 %v1035_v55, %v1148_v8  ;;  %v1281_v7 = vsel %vm1250_vm8, %v3769_v46, -inf  ;;  %v1278_v49 = vsel %vm1250_vm8, %v3741_v63, -inf  ;;  %v1287_v35 = vsel %vm1250_vm8, %v3810_v14, -inf }
 0x26c   :  { %v1129_v15 = vpop.permute.xlu1 %1128  ;;  %v1037_v6 = vmax.f32 %v892_v26, %v1005_v4  ;;  %v1284_v5 = vsel %vm1250_vm8, %v3791_v19, -inf  ;;  %v1317_v31 = vsel %vm1316_vm9, %v3471_v9, -inf  ;;  %v1323_v55 = vsel %vm1316_vm9, %v3530_v53, -inf }
 0x26d   :  { %v1127_v30 = vpop.permute.xlu0 %1126  ;;  %v1224_v33 = vsel %vm844_vm4, %v3829_v34, -inf  ;;  %v3849_v42 = vsel %vm1712_vm7, %v3829_v34, -inf  ;;  %v1290_v17 = vsel %vm1250_vm8, %v3829_v34, -inf  ;;  %v1320_v20 = vsel %vm1316_vm9, %v3498_v60, -inf }
 0x26e   :  { %v1149_v43 = vsel %vm1134_vm6, %v1127_v30, %v1129_v15  ;;  %1225 = vmax.xlane.f32.xlu0 %v1224_v33  ;;  %v1329_v12 = vsel %vm1316_vm9, %v3592_v58, -inf  ;;  %v1326_v25 = vsel %vm1316_vm9, %v3560_v59, -inf  ;;  %v1335_v39 = vsel %vm1316_vm9, %v3654_v16, -inf }
 0x26f   :  { %v3845_v54 = vmax.f32 %v1036_v44, %v1149_v43  ;;  %v1332_v8 = vsel %vm1316_vm9, %v3622_v45, -inf  ;;  %v1341_v1 = vsel %vm1316_vm9, %v3713_v36, -inf  ;;  %v1338_v51 = vsel %vm1316_vm9, %v3684_v50, -inf }
 0x270   :  { %v1133_v24 = vpop.permute.xlu1 %1132  ;;  %v1347_v0 = vsel %vm1316_vm9, %v3769_v46, -inf  ;;  %v1344_v48 = vsel %vm1316_vm9, %v3741_v63, -inf  ;;  %v1353_v41 = vsel %vm1316_vm9, %v3810_v14, -inf  ;;  %v1350_v13 = vsel %vm1316_vm9, %v3791_v19, -inf }
 0x271   :  { %v1131_v40 = vpop.permute.xlu0 %1130  ;;  %v1227_v21 = vsel %vm844_vm4, %v3845_v54, -inf  ;;  %v3858_v2 = vsel %vm1712_vm7, %v3845_v54, -inf  ;;  %v1293_v27 = vsel %vm1250_vm8, %v3845_v54, -inf  ;;  %v1359_v11 = vsel %vm1316_vm9, %v3845_v54, -inf }
 0x272   :  { %v1150_v29 = vsel %vm1134_vm6, %v1131_v40, %v1133_v24  ;;  %1228 = vmax.xlane.f32.xlu1 %v1227_v21  ;;  %v1356_v44 = vsel %vm1316_vm9, %v3829_v34, -inf  ;;  %v1383_v15 = vsel %vm1382_vm10, %v3471_v9, -inf  ;;  %v1389_v33 = vsel %vm1382_vm10, %v3530_v53, -inf }
 0x273   :  { %v3854_v52 = vmax.f32 %v1037_v6, %v1150_v29  ;;  %v1386_v4 = vsel %vm1382_vm10, %v3498_v60, -inf  ;;  %v1395_v43 = vsel %vm1382_vm10, %v3592_v58, -inf  ;;  %v1392_v26 = vsel %vm1382_vm10, %v3560_v59, -inf }
 0x274   :  { %v1401_v6 = vsel %vm1382_vm10, %v3654_v16, -inf  ;;  %v1398_v24 = vsel %vm1382_vm10, %v3622_v45, -inf  ;;  %v1407_v40 = vsel %vm1382_vm10, %v3713_v36, -inf  ;;  %v1404_v21 = vsel %vm1382_vm10, %v3684_v50, -inf }
 0x275   :  { %v1230_v18 = vsel %vm844_vm4, %v3854_v52, -inf  ;;  %v3866_v57 = vsel %vm1712_vm7, %v3854_v52, -inf  ;;  %v1296_v62 = vsel %vm1250_vm8, %v3854_v52, -inf  ;;  %v1362_v30 = vsel %vm1316_vm9, %v3854_v52, -inf }
 0x276   :  { %1252 = vmax.xlane.f32.xlu1 %v1251_v56  ;;  %1231 = vmax.xlane.f32.xlu0 %v1230_v18  ;;  %v1413_v29 = vsel %vm1382_vm10, %v3769_v46, -inf  ;;  %v1410_v56 = vsel %vm1382_vm10, %v3741_v63, -inf  ;;  %v1419_v18 = vsel %vm1382_vm10, %v3810_v14, -inf  ;;  %vm1646_vm1 = vcmask 654896  }
 0x277   :  { %vm1778_vm8 = vcmask 72704  }
 0x27a   :  { %1258 = vmax.xlane.f32.xlu1 %v1257_v47  ;;  %1255 = vmax.xlane.f32.xlu0 %v1254_v3  ;;  %v1416_v47 = vsel %vm1382_vm10, %v3791_v19, -inf  ;;  %v1425_v3 = vsel %vm1382_vm10, %v3845_v54, -inf }
 0x27e   :  { %1264 = vmax.xlane.f32.xlu1 %v1263_v10  ;;  %1261 = vmax.xlane.f32.xlu0 %v1260_v38  ;;  %v1422_v10 = vsel %vm1382_vm10, %v3829_v34, -inf  ;;  %v1449_v38 = vsel %vm1448_vm11, %v3471_v9, -inf }
 0x282   :  { %1270 = vmax.xlane.f32.xlu1 %v1269_v32  ;;  %1267 = vmax.xlane.f32.xlu0 %v1266_v28  ;;  %v1428_v32 = vsel %vm1382_vm10, %v3854_v52, -inf }
 0x286   :  { %1276 = vmax.xlane.f32.xlu1 %v1275_v37  ;;  %1273 = vmax.xlane.f32.xlu0 %v1272_v61  ;;  %v1455_v37 = vsel %vm1448_vm11, %v3530_v53, -inf  ;;  %v1452_v61 = vsel %vm1448_vm11, %v3498_v60, -inf }
 0x28a   :  { %1282 = vmax.xlane.f32.xlu1 %v1281_v7  ;;  %1279 = vmax.xlane.f32.xlu0 %v1278_v49  ;;  %v1461_v49 = vsel %vm1448_vm11, %v3592_v58, -inf }
 0x28e   :  { %1288 = vmax.xlane.f32.xlu1 %v1287_v35  ;;  %1285 = vmax.xlane.f32.xlu0 %v1284_v5  ;;  %v1458_v35 = vsel %vm1448_vm11, %v3560_v59, -inf  ;;  %v1467_v5 = vsel %vm1448_vm11, %v3654_v16, -inf }
 0x292   :  { %1294 = vmax.xlane.f32.xlu1 %v1293_v27  ;;  %1291 = vmax.xlane.f32.xlu0 %v1290_v17  ;;  %v1464_v27 = vsel %vm1448_vm11, %v3622_v45, -inf }
 0x296   :  { %1318 = vmax.xlane.f32.xlu1 %v1317_v31  ;;  %1297 = vmax.xlane.f32.xlu0 %v1296_v62  ;;  %v1473_v62 = vsel %vm1448_vm11, %v3713_v36, -inf }
 0x29a   :  { %1324 = vmax.xlane.f32.xlu1 %v1323_v55  ;;  %1321 = vmax.xlane.f32.xlu0 %v1320_v20  ;;  %v1470_v55 = vsel %vm1448_vm11, %v3684_v50, -inf }
 0x29e   :  { %1330 = vmax.xlane.f32.xlu1 %v1329_v12  ;;  %1327 = vmax.xlane.f32.xlu0 %v1326_v25  ;;  %v1479_v25 = vsel %vm1448_vm11, %v3769_v46, -inf }
 0x2a2   :  { %1336 = vmax.xlane.f32.xlu1 %v1335_v39  ;;  %1333 = vmax.xlane.f32.xlu0 %v1332_v8  ;;  %v1476_v39 = vsel %vm1448_vm11, %v3741_v63, -inf  ;;  %v1183_v8 = vlaneseq }
 0x2a6   :  { %1342 = vmax.xlane.f32.xlu1 %v1341_v1  ;;  %1339 = vmax.xlane.f32.xlu0 %v1338_v51 }
 0x2aa   :  { %1348 = vmax.xlane.f32.xlu1 %v1347_v0  ;;  %1345 = vmax.xlane.f32.xlu0 %v1344_v48  ;;  %v1485_v0 = vsel %vm1448_vm11, %v3810_v14, -inf  ;;  %v1482_v48 = vsel %vm1448_vm11, %v3791_v19, -inf }
 0x2ae   :  { %1354 = vmax.xlane.f32.xlu1 %v1353_v41  ;;  %1351 = vmax.xlane.f32.xlu0 %v1350_v13  ;;  %v3996_v41 = vand.u32 127, %v1183_v8 }
 0x2b0   :  { %vm1233_vm13 = vcmp.eq.s32.totalorder %v3996_v41, 0  ;;  %vm1299_vm15 = vcmp.eq.s32.totalorder %v3996_v41, 1  ;;  %vm1365_vm0 = vcmp.eq.s32.totalorder %v3996_v41, 2  ;;  %vm1431_vm2 = vcmp.eq.s32.totalorder %v3996_v41, 3 }
 0x2b1   :  { %vm1497_vm3 = vcmp.eq.s32.totalorder %v3996_v41, 4  ;;  %vm1563_vm4 = vcmp.eq.s32.totalorder %v3996_v41, 5  ;;  %vm1629_vm5 = vcmp.eq.s32.totalorder %v3996_v41, 6  ;;  %vm1695_vm6 = vcmp.eq.s32.totalorder %v3996_v41, 7 }
 0x2b2   :  { %1360 = vmax.xlane.f32.xlu1 %v1359_v11  ;;  %1357 = vmax.xlane.f32.xlu0 %v1356_v44  ;;  %v1491_v44 = vsel %vm1448_vm11, %v3845_v54, -inf }
 0x2b6   :  { %1384 = vmax.xlane.f32.xlu1 %v1383_v15  ;;  %1363 = vmax.xlane.f32.xlu0 %v1362_v30  ;;  %v1488_v15 = vsel %vm1448_vm11, %v3829_v34, -inf }
 0x2ba   :  { %1390 = vmax.xlane.f32.xlu1 %v1389_v33  ;;  %1387 = vmax.xlane.f32.xlu0 %v1386_v4  ;;  %v1515_v4 = vsel %vm1514_vm12, %v3471_v9, -inf }
 0x2be   :  { %1396 = vmax.xlane.f32.xlu1 %v1395_v43  ;;  %1393 = vmax.xlane.f32.xlu0 %v1392_v26  ;;  %v1494_v43 = vsel %vm1448_vm11, %v3854_v52, -inf }
 0x2c2   :  { %1402 = vmax.xlane.f32.xlu1 %v1401_v6  ;;  %1399 = vmax.xlane.f32.xlu0 %v1398_v24  ;;  %v1521_v6 = vsel %vm1514_vm12, %v3530_v53, -inf  ;;  %v1518_v24 = vsel %vm1514_vm12, %v3498_v60, -inf }
 0x2c6   :  { %1408 = vmax.xlane.f32.xlu1 %v1407_v40  ;;  %1405 = vmax.xlane.f32.xlu0 %v1404_v21  ;;  %v1527_v21 = vsel %vm1514_vm12, %v3592_v58, -inf }
 0x2c7   :  { %v3964_v28 = vpop.xlane.xlu0 %1186 }
 0x2ca   :  { %1414 = vmax.xlane.f32.xlu1 %v1413_v29  ;;  %1411 = vmax.xlane.f32.xlu0 %v1410_v56  ;;  %v1524_v29 = vsel %vm1514_vm12, %v3560_v59, -inf }
 0x2cb   :  { %v3980_v17 = vpop.xlane.xlu1 %1189 }
 0x2ce   :  { %1420 = vmax.xlane.f32.xlu1 %v1419_v18  ;;  %1417 = vmax.xlane.f32.xlu0 %v1416_v47  ;;  %v1533_v18 = vsel %vm1514_vm12, %v3654_v16, -inf  ;;  %v1530_v47 = vsel %vm1514_vm12, %v3622_v45, -inf }
 0x2cf   :  { %v3970_v7 = vpop.xlane.xlu0 %1192 }
 0x2d2   :  { %1426 = vmax.xlane.f32.xlu1 %v1425_v3  ;;  %1423 = vmax.xlane.f32.xlu0 %v1422_v10 }
 0x2d3   :  { %v3982_v31 = vpop.xlane.xlu0 %1195 }
 0x2d6   :  { %1450 = vmax.xlane.f32.xlu1 %v1449_v38  ;;  %1429 = vmax.xlane.f32.xlu0 %v1428_v32  ;;  %v1539_v38 = vsel %vm1514_vm12, %v3713_v36, -inf  ;;  %v1536_v32 = vsel %vm1514_vm12, %v3684_v50, -inf }
 0x2d7   :  { %v1199_v20 = vpop.xlane.xlu1 %1198 }
 0x2da   :  { %1456 = vmax.xlane.f32.xlu1 %v1455_v37  ;;  %1453 = vmax.xlane.f32.xlu0 %v1452_v61 }
 0x2db   :  { %v1202_v12 = vpop.xlane.xlu0 %1201 }
 0x2de   :  { %1462 = vmax.xlane.f32.xlu1 %v1461_v49  ;;  %1459 = vmax.xlane.f32.xlu0 %v1458_v35  ;;  %v1545_v49 = vsel %vm1514_vm12, %v3769_v46, -inf  ;;  %v1542_v35 = vsel %vm1514_vm12, %v3741_v63, -inf }
 0x2df   :  { %v1205_v1 = vpop.xlane.xlu1 %1204 }
 0x2e2   :  { %1468 = vmax.xlane.f32.xlu1 %v1467_v5  ;;  %1465 = vmax.xlane.f32.xlu0 %v1464_v27 }
 0x2e3   :  { %v1208_v51 = vpop.xlane.xlu0 %1207 }
 0x2e4   :  { %v1581_v51 = vsel %vm1580_vm14, %v3471_v9, -inf }
 0x2e6   :  { %1474 = vmax.xlane.f32.xlu1 %v1473_v62  ;;  %1471 = vmax.xlane.f32.xlu0 %v1470_v55  ;;  %v1551_v62 = vsel %vm1514_vm12, %v3810_v14, -inf  ;;  %v1548_v55 = vsel %vm1514_vm12, %v3791_v19, -inf }
 0x2e7   :  { %v1211_v13 = vpop.xlane.xlu1 %1210 }
 0x2ea   :  { %1480 = vmax.xlane.f32.xlu1 %v1479_v25  ;;  %1477 = vmax.xlane.f32.xlu0 %v1476_v39  ;;  %v1557_v25 = vsel %vm1514_vm12, %v3845_v54, -inf  ;;  %v1554_v39 = vsel %vm1514_vm12, %v3829_v34, -inf }
 0x2eb   :  { %v1214_v11 = vpop.xlane.xlu0 %1213 }
 0x2ec   :  { %v1587_v11 = vsel %vm1580_vm14, %v3530_v53, -inf }
 0x2ee   :  { %1486 = vmax.xlane.f32.xlu1 %v1485_v0  ;;  %1483 = vmax.xlane.f32.xlu0 %v1482_v48  ;;  %v1560_v0 = vsel %vm1514_vm12, %v3854_v52, -inf }
 0x2ef   :  { %v1217_v30 = vpop.xlane.xlu1 %1216 }
 0x2f2   :  { %1492 = vmax.xlane.f32.xlu1 %v1491_v44  ;;  %1489 = vmax.xlane.f32.xlu0 %v1488_v15  ;;  %v1584_v44 = vsel %vm1580_vm14, %v3498_v60, -inf }
 0x2f3   :  { %v1220_v33 = vpop.xlane.xlu0 %1219 }
 0x2f4   :  { %v1593_v33 = vsel %vm1580_vm14, %v3592_v58, -inf }
 0x2f6   :  { %1516 = vmax.xlane.f32.xlu1 %v1515_v4  ;;  %1495 = vmax.xlane.f32.xlu0 %v1494_v43  ;;  %v1590_v4 = vsel %vm1580_vm14, %v3560_v59, -inf }
 0x2f7   :  { %v1223_v26 = vpop.xlane.xlu1 %1222 }
 0x2fa   :  { %1522 = vmax.xlane.f32.xlu1 %v1521_v6  ;;  %1519 = vmax.xlane.f32.xlu0 %v1518_v24  ;;  %v1599_v6 = vsel %vm1580_vm14, %v3654_v16, -inf  ;;  %v1596_v24 = vsel %vm1580_vm14, %v3622_v45, -inf }
 0x2fb   :  { %v1226_v40 = vpop.xlane.xlu0 %1225 }
 0x2fc   :  { %v1234_v40 = vsel %vm1233_vm13, %v3964_v28, 0.0  ;;  %v1235_v28 = vsel %vm1233_vm13, %v3980_v17, 0.0 }
 0x2fe   :  { %1528 = vmax.xlane.f32.xlu1 %v1527_v21  ;;  %1525 = vmax.xlane.f32.xlu0 %v1524_v29 }
 0x2ff   :  { %v1229_v56 = vpop.xlane.xlu1 %1228 }
 0x302   :  { %1534 = vmax.xlane.f32.xlu1 %v1533_v18  ;;  %1531 = vmax.xlane.f32.xlu0 %v1530_v47  ;;  %v1650_v47 = vsel %vm1646_vm1, %v3498_v60, -inf }
 0x303   :  { %v1253_v3 = vpop.xlane.xlu1 %1252  ;;  %v1232_v10 = vpop.xlane.xlu0 %1231 }
 0x304   :  { %v1300_v21 = vsel %vm1299_vm15, %v1253_v3, %v1234_v40  ;;  %v1647_v10 = vsel %vm1646_vm1, %v3471_v9, -inf }
 0x306   :  { %1540 = vmax.xlane.f32.xlu1 %v1539_v38  ;;  %1537 = vmax.xlane.f32.xlu0 %v1536_v32  ;;  %v1236_v38 = vsel %vm1233_vm13, %v3970_v7, 0.0  ;;  %v1653_v7 = vsel %vm1646_vm1, %v3530_v53, -inf }
 0x307   :  { %v1259_v37 = vpop.xlane.xlu1 %1258  ;;  %v1256_v61 = vpop.xlane.xlu0 %1255 }
 0x308   :  { %v1302_v3 = vsel %vm1299_vm15, %v1259_v37, %v1236_v38  ;;  %v1301_v32 = vsel %vm1299_vm15, %v1256_v61, %v1235_v28  ;;  %v1237_v37 = vsel %vm1233_vm13, %v3982_v31, 0.0  ;;  %v1665_v38 = vsel %vm1646_vm1, %v3654_v16, -inf }
 0x30a   :  { %1546 = vmax.xlane.f32.xlu1 %v1545_v49  ;;  %1543 = vmax.xlane.f32.xlu0 %v1542_v35 }
 0x30b   :  { %v1265_v5 = vpop.xlane.xlu1 %1264  ;;  %v1262_v27 = vpop.xlane.xlu0 %1261 }
 0x30c   :  { %v1303_v61 = vsel %vm1299_vm15, %v1262_v27, %v1237_v37  ;;  %v1719_v27 = vsel %vm1712_vm7, %v3530_v53, -inf  ;;  %v1608_v53 = vsel %vm1580_vm14, %v3741_v63, -inf  ;;  %v1674_v37 = vsel %vm1646_vm1, %v3741_v63, -inf }
 0x30e   :  { %1552 = vmax.xlane.f32.xlu1 %v1551_v62  ;;  %1549 = vmax.xlane.f32.xlu0 %v1548_v55  ;;  %v1656_v62 = vsel %vm1646_vm1, %v3560_v59, -inf }
 0x30f   :  { %v1271_v20 = vpop.xlane.xlu1 %1270  ;;  %v1268_v12 = vpop.xlane.xlu0 %1267 }
 0x312   :  { %1558 = vmax.xlane.f32.xlu1 %v1557_v25  ;;  %1555 = vmax.xlane.f32.xlu0 %v1554_v39  ;;  %v1716_v25 = vsel %vm1712_vm7, %v3498_v60, -inf  ;;  %v1713_v39 = vsel %vm1712_vm7, %v3471_v9, -inf  ;;  %v1605_v60 = vsel %vm1580_vm14, %v3713_v36, -inf  ;;  %v1602_v9 = vsel %vm1580_vm14, %v3684_v50, -inf }
 0x313   :  { %v1277_v8 = vpop.xlane.xlu1 %1276  ;;  %v1274_v1 = vpop.xlane.xlu0 %1273 }
 0x314   :  { %v1722_v1 = vsel %vm1712_vm7, %v3560_v59, -inf  ;;  %v1611_v59 = vsel %vm1580_vm14, %v3769_v46, -inf }
 0x316   :  { %1582 = vmax.xlane.f32.xlu1 %v1581_v51  ;;  %1561 = vmax.xlane.f32.xlu0 %v1560_v0 }
 0x317   :  { %v1283_v48 = vpop.xlane.xlu1 %1282  ;;  %v1280_v13 = vpop.xlane.xlu0 %1279 }
 0x31a   :  { %1588 = vmax.xlane.f32.xlu1 %v1587_v11  ;;  %1585 = vmax.xlane.f32.xlu0 %v1584_v44 }
 0x31b   :  { %v1289_v15 = vpop.xlane.xlu1 %1288  ;;  %v1286_v30 = vpop.xlane.xlu0 %1285 }
 0x31c   :  { %v1617_v15 = vsel %vm1580_vm14, %v3810_v14, -inf  ;;  %v1614_v30 = vsel %vm1580_vm14, %v3791_v19, -inf }
 0x31e   :  { %1594 = vmax.xlane.f32.xlu1 %v1593_v33  ;;  %1591 = vmax.xlane.f32.xlu0 %v1590_v4 }
 0x31f   :  { %v1295_v43 = vpop.xlane.xlu1 %1294  ;;  %v1292_v26 = vpop.xlane.xlu0 %1291 }
 0x320   :  { %v1623_v43 = vsel %vm1580_vm14, %v3845_v54, -inf  ;;  %v1620_v26 = vsel %vm1580_vm14, %v3829_v34, -inf }
 0x322   :  { %1600 = vmax.xlane.f32.xlu1 %v1599_v6  ;;  %1597 = vmax.xlane.f32.xlu0 %v1596_v24 }
 0x323   :  { %v1319_v29 = vpop.xlane.xlu1 %1318  ;;  %v1298_v56 = vpop.xlane.xlu0 %1297 }
 0x324   :  { %v1366_v18 = vsel %vm1365_vm0, %v1319_v29, %v1300_v21  ;;  %v1659_v21 = vsel %vm1646_vm1, %v3592_v58, -inf  ;;  %v1626_v29 = vsel %vm1580_vm14, %v3854_v52, -inf }
 0x326   :  { %1651 = vmax.xlane.f32.xlu1 %v1650_v47  ;;  %1648 = vmax.xlane.f32.xlu0 %v1647_v10 }
 0x327   :  { %v1325_v49 = vpop.xlane.xlu1 %1324  ;;  %v1322_v35 = vpop.xlane.xlu0 %1321 }
 0x328   :  { %v1368_v5 = vsel %vm1365_vm0, %v1325_v49, %v1302_v3  ;;  %v1367_v17 = vsel %vm1365_vm0, %v1322_v35, %v1301_v32  ;;  %v1671_v35 = vsel %vm1646_vm1, %v3713_v36, -inf }
 0x32a   :  { %1657 = vmax.xlane.f32.xlu1 %v1656_v62  ;;  %1654 = vmax.xlane.f32.xlu0 %v1653_v7  ;;  %v1677_v7 = vsel %vm1646_vm1, %v3769_v46, -inf }
 0x32b   :  { %v1331_v55 = vpop.xlane.xlu1 %1330  ;;  %v1328_v20 = vpop.xlane.xlu0 %1327 }
 0x32c   :  { %v1369_v12 = vsel %vm1365_vm0, %v1328_v20, %v1303_v61  ;;  %v1683_v20 = vsel %vm1646_vm1, %v3810_v14, -inf  ;;  %v1725_v14 = vsel %vm1712_vm7, %v3592_v58, -inf }
 0x32e   :  { %1717 = vmax.xlane.f32.xlu1 %v1716_v25  ;;  %1714 = vmax.xlane.f32.xlu0 %v1713_v39 }
 0x32f   :  { %v1337_v8 = vpop.xlane.xlu1 %1336  ;;  %v1334_v31 = vpop.xlane.xlu0 %1333 }
 0x330   :  { %v1689_v8 = vsel %vm1646_vm1, %v3845_v54, -inf  ;;  %v1686_v31 = vsel %vm1646_vm1, %v3829_v34, -inf  ;;  %v1731_v54 = vsel %vm1712_vm7, %v3654_v16, -inf  ;;  %v1728_v34 = vsel %vm1712_vm7, %v3622_v45, -inf }
 0x332   :  { %1723 = vmax.xlane.f32.xlu1 %v1722_v1  ;;  %1720 = vmax.xlane.f32.xlu0 %v1719_v27 }
 0x333   :  { %v1343_v51 = vpop.xlane.xlu1 %1342  ;;  %v1340_v0 = vpop.xlane.xlu0 %1339 }
 0x336   :  { %1606 = vmax.xlane.f32.xlu1 %v1605_v60  ;;  %1603 = vmax.xlane.f32.xlu0 %v1602_v9 }
 0x337   :  { %v1349_v48 = vpop.xlane.xlu1 %1348  ;;  %v1346_v13 = vpop.xlane.xlu0 %1345 }
 0x338   :  { %v1734_v48 = vsel %vm1712_vm7, %v3684_v50, -inf }
 0x33a   :  { %1612 = vmax.xlane.f32.xlu1 %v1611_v59  ;;  %1609 = vmax.xlane.f32.xlu0 %v1608_v53  ;;  %v1743_v53 = vsel %vm1712_vm7, %v3769_v46, -inf }
 0x33b   :  { %v1355_v11 = vpop.xlane.xlu1 %1354  ;;  %v1352_v44 = vpop.xlane.xlu0 %1351 }
 0x33e   :  { %1618 = vmax.xlane.f32.xlu1 %v1617_v15  ;;  %1615 = vmax.xlane.f32.xlu0 %v1614_v30 }
 0x33f   :  { %v1361_v33 = vpop.xlane.xlu1 %1360  ;;  %v1358_v4 = vpop.xlane.xlu0 %1357 }
 0x342   :  { %1624 = vmax.xlane.f32.xlu1 %v1623_v43  ;;  %1621 = vmax.xlane.f32.xlu0 %v1620_v26 }
 0x343   :  { %v1385_v6 = vpop.xlane.xlu1 %1384  ;;  %v1364_v24 = vpop.xlane.xlu0 %1363 }
 0x344   :  { %v1432_v40 = vsel %vm1431_vm2, %v1385_v6, %v1366_v18  ;;  %v1662_v18 = vsel %vm1646_vm1, %v3622_v45, -inf }
 0x346   :  { %1660 = vmax.xlane.f32.xlu1 %v1659_v21  ;;  %1627 = vmax.xlane.f32.xlu0 %v1626_v29 }
 0x347   :  { %v1391_v56 = vpop.xlane.xlu1 %1390  ;;  %v1388_v47 = vpop.xlane.xlu0 %1387 }
 0x348   :  { %v1434_v10 = vsel %vm1431_vm2, %v1391_v56, %v1368_v5  ;;  %v1433_v28 = vsel %vm1431_vm2, %v1388_v47, %v1367_v17  ;;  %v1668_v5 = vsel %vm1646_vm1, %v3684_v50, -inf }
 0x34a   :  { %1666 = vmax.xlane.f32.xlu1 %v1665_v38  ;;  %1663 = vmax.xlane.f32.xlu0 %v1662_v18 }
 0x34b   :  { %v1397_v3 = vpop.xlane.xlu1 %1396  ;;  %v1394_v32 = vpop.xlane.xlu0 %1393 }
 0x34c   :  { %v1435_v49 = vsel %vm1431_vm2, %v1394_v32, %v1369_v12  ;;  %v1680_v12 = vsel %vm1646_vm1, %v3791_v19, -inf  ;;  %v1692_v19 = vsel %vm1646_vm1, %v3854_v52, -inf  ;;  %v1737_v52 = vsel %vm1712_vm7, %v3713_v36, -inf }
 0x34d   :  { %v1740_v36 = vsel %vm1712_vm7, %v3741_v63, -inf  ;;  %vm1761_vm7 = vcmp.eq.s32.totalorder %v3996_v41, 8 }
 0x34e   :  { %1672 = vmax.xlane.f32.xlu1 %v1671_v35  ;;  %1669 = vmax.xlane.f32.xlu0 %v1668_v5 }
 0x34f   :  { %v1403_v17 = vpop.xlane.xlu1 %1402  ;;  %v1400_v62 = vpop.xlane.xlu0 %1399 }
 0x352   :  { %1678 = vmax.xlane.f32.xlu1 %v1677_v7  ;;  %1675 = vmax.xlane.f32.xlu0 %v1674_v37 }
 0x353   :  { %v1409_v61 = vpop.xlane.xlu1 %1408  ;;  %v1406_v55 = vpop.xlane.xlu0 %1405 }
 0x356   :  { %1684 = vmax.xlane.f32.xlu1 %v1683_v20  ;;  %1681 = vmax.xlane.f32.xlu0 %v1680_v12 }
 0x357   :  { %v1415_v25 = vpop.xlane.xlu1 %1414  ;;  %v1412_v39 = vpop.xlane.xlu0 %1411 }
 0x35a   :  { %1690 = vmax.xlane.f32.xlu1 %v1689_v8  ;;  %1687 = vmax.xlane.f32.xlu0 %v1686_v31 }
 0x35b   :  { %v1421_v1 = vpop.xlane.xlu1 %1420  ;;  %v1418_v27 = vpop.xlane.xlu0 %1417 }
 0x35e   :  { %1726 = vmax.xlane.f32.xlu1 %v1725_v14  ;;  %1693 = vmax.xlane.f32.xlu0 %v1692_v19 }
 0x35f   :  { %v1427_v51 = vpop.xlane.xlu1 %1426  ;;  %v1424_v0 = vpop.xlane.xlu0 %1423 }
 0x362   :  { %1732 = vmax.xlane.f32.xlu1 %v1731_v54  ;;  %1729 = vmax.xlane.f32.xlu0 %v1728_v34 }
 0x363   :  { %v1451_v60 = vpop.xlane.xlu1 %1450  ;;  %v1430_v9 = vpop.xlane.xlu0 %1429 }
 0x364   :  { %v4157_v58 = vsel %vm1497_vm3, %v1451_v60, %v1432_v40 }
 0x366   :  { %1738 = vmax.xlane.f32.xlu1 %v1737_v52  ;;  %1735 = vmax.xlane.f32.xlu0 %v1734_v48 }
 0x367   :  { %v1457_v16 = vpop.xlane.xlu1 %1456  ;;  %v1454_v45 = vpop.xlane.xlu0 %1453 }
 0x368   :  { %v4165_v13 = vsel %vm1497_vm3, %v1457_v16, %v1434_v10  ;;  %v1499_v59 = vsel %vm1497_vm3, %v1454_v45, %v1433_v28 }
 0x36a   :  { %1744 = vmax.xlane.f32.xlu1 %v1743_v53  ;;  %1741 = vmax.xlane.f32.xlu0 %v1740_v36 }
 0x36b   :  { %v1463_v50 = vpop.xlane.xlu1 %1462  ;;  %v1460_v11 = vpop.xlane.xlu0 %1459 }
 0x36c   :  { %v1501_v44 = vsel %vm1497_vm3, %v1460_v11, %v1435_v49 }
 0x36e   :  { %1750 = vmax.xlane.f32.xlu1 %v3833_v22  ;;  %1747 = vmax.xlane.f32.xlu0 %v3814_v23 }
 0x36f   :  { %v1469_v15 = vpop.xlane.xlu1 %1468  ;;  %v1466_v30 = vpop.xlane.xlu0 %1465 }
 0x372   :  { %1756 = vmax.xlane.f32.xlu1 %v3858_v2  ;;  %1753 = vmax.xlane.f32.xlu0 %v3849_v42 }
 0x373   :  { %v1475_v46 = vpop.xlane.xlu1 %1474  ;;  %v1472_v33 = vpop.xlane.xlu0 %1471 }
 0x376   :  { %1759 = vmax.xlane.f32.xlu0 %v3866_v57 }
 0x377   :  { %v1481_v63 = vpop.xlane.xlu1 %1480  ;;  %v1478_v4 = vpop.xlane.xlu0 %1477 }
 0x37b   :  { %v1487_v43 = vpop.xlane.xlu1 %1486  ;;  %v1484_v26 = vpop.xlane.xlu0 %1483 }
 0x37f   :  { %v1493_v6 = vpop.xlane.xlu1 %1492  ;;  %v1490_v24 = vpop.xlane.xlu0 %1489 }
 0x383   :  { %v1517_v40 = vpop.xlane.xlu1 %1516  ;;  %v1496_v22 = vpop.xlane.xlu0 %1495 }
 0x384   :  { %v1564_v39 = vsel %vm1563_vm4, %v1517_v40, %v4157_v58 }
 0x387   :  { %v1523_v21 = vpop.xlane.xlu1 %1522  ;;  %v1520_v23 = vpop.xlane.xlu0 %1519 }
 0x388   :  { %v1565_v8 = vsel %vm1563_vm4, %v1520_v23, %v1499_v59  ;;  %v1566_v34 = vsel %vm1563_vm4, %v1523_v21, %v4165_v13 }
 0x38b   :  { %v1529_v29 = vpop.xlane.xlu1 %1528  ;;  %v1526_v2 = vpop.xlane.xlu0 %1525 }
 0x38c   :  { %v1567_v60 = vsel %vm1563_vm4, %v1526_v2, %v1501_v44 }
 0x38f   :  { %v1535_v56 = vpop.xlane.xlu1 %1534  ;;  %v1532_v42 = vpop.xlane.xlu0 %1531 }
 0x393   :  { %v1541_v47 = vpop.xlane.xlu1 %1540  ;;  %v1538_v10 = vpop.xlane.xlu0 %1537 }
 0x397   :  { %v1547_v28 = vpop.xlane.xlu1 %1546  ;;  %v1544_v57 = vpop.xlane.xlu0 %1543 }
 0x39b   :  { %v1553_v38 = vpop.xlane.xlu1 %1552  ;;  %v1550_v18 = vpop.xlane.xlu0 %1549 }
 0x39f   :  { %v1559_v3 = vpop.xlane.xlu1 %1558  ;;  %v1556_v32 = vpop.xlane.xlu0 %1555 }
 0x3a3   :  { %v1583_v49 = vpop.xlane.xlu1 %1582  ;;  %v1562_v35 = vpop.xlane.xlu0 %1561 }
 0x3a4   :  { %v1630_v31 = vsel %vm1629_vm5, %v1583_v49, %v1564_v39 }
 0x3a7   :  { %v1589_v5 = vpop.xlane.xlu1 %1588  ;;  %v1586_v17 = vpop.xlane.xlu0 %1585 }
 0x3a8   :  { %v1631_v1 = vsel %vm1629_vm5, %v1586_v17, %v1565_v8  ;;  %v1632_v9 = vsel %vm1629_vm5, %v1589_v5, %v1566_v34 }
 0x3ab   :  { %v1595_v62 = vpop.xlane.xlu1 %1594  ;;  %v1592_v7 = vpop.xlane.xlu0 %1591 }
 0x3ac   :  { %v1633_v58 = vsel %vm1629_vm5, %v1592_v7, %v1567_v60 }
 0x3af   :  { %v1601_v37 = vpop.xlane.xlu1 %1600  ;;  %v1598_v61 = vpop.xlane.xlu0 %1597 }
 0x3b3   :  { %v1652_v55 = vpop.xlane.xlu1 %1651  ;;  %v1649_v20 = vpop.xlane.xlu0 %1648 }
 0x3b4   :  { %v1697_v27 = vsel %vm1695_vm6, %v1652_v55, %v1631_v1  ;;  %v1696_v14 = vsel %vm1695_vm6, %v1649_v20, %v1630_v31 }
 0x3b7   :  { %v1658_v12 = vpop.xlane.xlu1 %1657  ;;  %v1655_v25 = vpop.xlane.xlu0 %1654 }
 0x3b8   :  { %v1699_v52 = vsel %vm1695_vm6, %v1658_v12, %v1633_v58  ;;  %v1698_v48 = vsel %vm1695_vm6, %v1655_v25, %v1632_v9 }
 0x3bb   :  { %v1718_v19 = vpop.xlane.xlu1 %1717  ;;  %v1715_v51 = vpop.xlane.xlu0 %1714 }
 0x3bc   :  { %v1763_v0 = vsel %vm1761_vm7, %v1718_v19, %v1697_v27  ;;  %v1762_v54 = vsel %vm1761_vm7, %v1715_v51, %v1696_v14 }
 0x3bd   :  { %1780 = vst.msk [vmem:[#allocation2 + $0x8] sm:$0xff] %vm1778_vm8, %v1763_v0  ;;  %1779 = vst.msk [vmem:[#allocation2] sm:$0xff] %vm1778_vm8, %v1762_v54 }
 0x3bf   :  { %v1724_v16 = vpop.xlane.xlu1 %1723  ;;  %v1721_v45 = vpop.xlane.xlu0 %1720 }
 0x3c0   :  { %v1765_v13 = vsel %vm1761_vm7, %v1724_v16, %v1699_v52  ;;  %v1764_v59 = vsel %vm1761_vm7, %v1721_v45, %v1698_v48 }
 0x3c1   :  { %1782 = vst.msk [vmem:[#allocation2 + $0x18] sm:$0xff] %vm1778_vm8, %v1765_v13  ;;  %1781 = vst.msk [vmem:[#allocation2 + $0x10] sm:$0xff] %vm1778_vm8, %v1764_v59 }
 0x3c3   :  { %v1607_v53 = vpop.xlane.xlu1 %1606  ;;  %v1604_v36 = vpop.xlane.xlu0 %1603 }
 0x3c4   :  { %v1832_v50 = vld [vmem:[#allocation2 + $0x8] sm:$0xff]  ;;  %v1830_v11 = vld [vmem:[#allocation2] sm:$0xff] }
 0x3c5   :  { %1833 = vst [vmem:[%s4235_s1 + $0x8] sm:$0xff] %v1832_v50  ;;  %1831 = vst [vmem:[%s4235_s1] sm:$0xff] %v1830_v11 }
 0x3c7   :  { %v1613_v44 = vpop.xlane.xlu1 %1612  ;;  %v1610_v15 = vpop.xlane.xlu0 %1609 }
 0x3c8   :  { %v1836_v41 = vld [vmem:[#allocation2 + $0x18] sm:$0xff]  ;;  %v1834_v30 = vld [vmem:[#allocation2 + $0x10] sm:$0xff] }
 0x3c9   :  { %1837 = vst [vmem:[%s4235_s1 + $0x18] sm:$0xff] %v1836_v41  ;;  %1835 = vst [vmem:[%s4235_s1 + $0x10] sm:$0xff] %v1834_v30 }
 0x3cb   :  { %v1619_v46 = vpop.xlane.xlu1 %1618  ;;  %v1616_v33 = vpop.xlane.xlu0 %1615 }
 0x3cf   :  { %v1625_v63 = vpop.xlane.xlu1 %1624  ;;  %v1622_v4 = vpop.xlane.xlu0 %1621 }
 0x3d3   :  { %v1661_v43 = vpop.xlane.xlu1 %1660  ;;  %v1628_v26 = vpop.xlane.xlu0 %1627 }
 0x3d7   :  { %v1667_v6 = vpop.xlane.xlu1 %1666  ;;  %v1664_v24 = vpop.xlane.xlu0 %1663 }
 0x3db   :  { %v1673_v40 = vpop.xlane.xlu1 %1672  ;;  %v1670_v22 = vpop.xlane.xlu0 %1669 }
 0x3df   :  { %v1679_v21 = vpop.xlane.xlu1 %1678  ;;  %v1676_v23 = vpop.xlane.xlu0 %1675 }
 0x3e3   :  { %v1685_v29 = vpop.xlane.xlu1 %1684  ;;  %v1682_v2 = vpop.xlane.xlu0 %1681 }
 0x3e7   :  { %v1691_v56 = vpop.xlane.xlu1 %1690  ;;  %v1688_v42 = vpop.xlane.xlu0 %1687 }
 0x3eb   :  { %v1727_v47 = vpop.xlane.xlu1 %1726  ;;  %v1694_v10 = vpop.xlane.xlu0 %1693 }
 0x3ef   :  { %v1733_v28 = vpop.xlane.xlu1 %1732  ;;  %v1730_v57 = vpop.xlane.xlu0 %1729 }
 0x3f3   :  { %v1739_v38 = vpop.xlane.xlu1 %1738  ;;  %v1736_v18 = vpop.xlane.xlu0 %1735 }
 0x3f7   :  { %v1745_v3 = vpop.xlane.xlu1 %1744  ;;  %v1742_v32 = vpop.xlane.xlu0 %1741 }
 0x3fb   :  { %v1751_v49 = vpop.xlane.xlu1 %1750  ;;  %v1748_v35 = vpop.xlane.xlu0 %1747 }
 0x3ff   :  { %v1757_v5 = vpop.xlane.xlu1 %1756  ;;  %v1754_v17 = vpop.xlane.xlu0 %1753 }
 0x403   :  { %v1760_v62 = vpop.xlane.xlu0 %1759 }

// kernel: model_forward.3
= control target key start
LH: loop header
LB: loop body
LE: loop exit
PB: predicated region body
PF: predicated region fallthrough
CT: control target
= control target key end

     0   :  { %18 = vsyncpa [#allocation3], 0  ;;  %s2540_s0 = inlined_call_operand.vmem [shape: f32[2,144], index: 0, kind: input, shape index: {}]   ;;  %s2541_s1 = inlined_call_operand.vmem [shape: f32[2,6], index: 1, kind: input, shape index: {}]   ;;  %s2542_s2 = inlined_call_operand.hbm [shape: f32[2,256], index: 2, kind: input, shape index: {}, may-alias: {2,12}]   ;;  %s2543_s3 = inlined_call_operand.vmem [shape: f32[144,256], index: 3, kind: input, shape index: {}]   ;;  %s2544_s4 = inlined_call_operand.vmem [shape: f32[6,256], index: 4, kind: input, shape index: {}]   ;;  %s2545_s5 = inlined_call_operand.vmem [shape: f32[1,256], index: 5, kind: input, shape index: {}]   ;;  %s2546_s6 = inlined_call_operand.hbm [shape: f32[256,768], index: 6, kind: input, shape index: {}]   ;;  %s2547_s7 = inlined_call_operand.vmem [shape: f32[1,768], index: 7, kind: input, shape index: {}]   ;;  %s2548_s8 = inlined_call_operand.hbm [shape: f32[256,768], index: 8, kind: input, shape index: {}]   ;;  %s2549_s9 = inlined_call_operand.vmem [shape: f32[1,768], index: 9, kind: input, shape index: {}]   ;;  %s2550_s10 = inlined_call_operand.vmem [shape: f32[256,4], index: 10, kind: input, shape index: {}]   ;;  %s2551_s11 = inlined_call_operand.hbm [shape: f32[2,4], index: 11, kind: output, shape index: {0}]   ;;  %s2552_s12 = inlined_call_operand.hbm [shape: f32[2,256], index: 12, kind: output, shape index: {1}, may-alias: {2,12}]  }
   0x1   :  { %19 = vsyncpa [#allocation6], 0 }
   0x2   :  { %20 = vsyncpa [#allocation4], 0 }
   0x3   :  { %21 = vsyncpa [#allocation10], 0 }
   0x4   :  { %30 = vsyncadd [#allocation3], 192  ;;  %s2104_s21 = smov [#allocation5]   ;;  %s1986_s25 = scalar_lea.hbm %s2546_s6, 24576 }
   0x5   :  { %s49_s22 = sshll.u32 %s2104_s21, 4  ;;  %p1987_p0 = scmp.ne.s32.totalorder %s2546_s6, %s1986_s25  ;;  %s50_s22 = int_to_ptr.vmem [resolvable:$true] %s49_s22 }
   0x6   :  { %p1990_p1 = scmp.lt.u32.totalorder %s1986_s25, %s2546_s6 }
   0x8   :  { %p1992_p2 = pnand %p1990_p1, %p1987_p0 }
   0xa   :  { %1995 = shalt.err (!%p1992_p2)
}
   0xb   :  { %s1996_s30 = scalar_lea.vmem %s50_s22, 24576  ;;  %p2001_p4 = scmp.lt.s32.totalorder %s50_s22, %s50_s22 }
   0xc   :  { %p1997_p3 = scmp.ne.s32.totalorder %s50_s22, %s1996_s30  ;;  %p2002_p5 = scmp.lt.s32.totalorder %s1996_s30, %s1996_s30 }
   0xe   :  { %p2003_p6 = por %p2002_p5, %p2001_p4 }
  0x10   :  { %p2004_p7 = pnand %p2003_p6, %p1997_p3 }
  0x12   :  { %2007 = shalt.err (!%p2004_p7)
}
  0x13   :  { %s2105_s13 = smov 768   ;;  %s2106_s14 = smov 48  }
  0x14   :  { %55 = dma.hbm_to_vmem [thread:$0]  %s2546_s6, 24576, %s50_s22, [#allocation6], %s2105_s13, %s2105_s13, %s2106_s14  }
  0x15   :  { %s2107_s17 = smov [#allocation2]   ;;  %s2008_s21 = scalar_lea.hbm %s2542_s2, 64 }
  0x16   :  { %s31_s18 = sshll.u32 %s2107_s17, 4  ;;  %p2009_p8 = scmp.ne.s32.totalorder %s2542_s2, %s2008_s21  ;;  %s32_s18 = int_to_ptr.vmem [resolvable:$true] %s31_s18 }
  0x17   :  { %p2012_p9 = scmp.lt.u32.totalorder %s2008_s21, %s2542_s2 }
  0x19   :  { %p2014_p10 = pnand %p2012_p9, %p2009_p8 }
  0x1b   :  { %2017 = shalt.err (!%p2014_p10)
}
  0x1c   :  { %s2018_s27 = scalar_lea.vmem %s32_s18, 64  ;;  %s2022_s6 = scalar_lea.vmem %s32_s18, 256 }
  0x1d   :  { %p2019_p11 = scmp.ne.s32.totalorder %s32_s18, %s2018_s27  ;;  %p2023_p12 = scmp.lt.s32.totalorder %s32_s18, %s32_s18 }
  0x1e   :  { %p2024_p13 = scmp.lt.s32.totalorder %s2022_s6, %s2018_s27 }
  0x20   :  { %p2025_p0 = por %p2024_p13, %p2023_p12 }
  0x22   :  { %p2026_p1 = pnand %p2025_p0, %p2019_p11 }
  0x24   :  { %2029 = shalt.err (!%p2026_p1)
}
  0x25   :  { %s2108_s22 = smov 64   ;;  %s2109_s28 = smov 4  }
  0x26   :  { %37 = dma.hbm_to_vmem [thread:$0]  %s2542_s2, 64, %s32_s18, [#allocation3], %s2108_s22, %s2108_s22, %s2109_s28  }
  0x27   :  { %s2110_s15 = smov [#allocation7]   ;;  %s2030_s20 = scalar_lea.hbm %s2548_s8, 24576 }
  0x28   :  { %s63_s16 = sshll.u32 %s2110_s15, 4  ;;  %p2031_p2 = scmp.ne.s32.totalorder %s2548_s8, %s2030_s20  ;;  %s64_s16 = int_to_ptr.vmem [resolvable:$true] %s63_s16 }
  0x29   :  { %p2034_p3 = scmp.lt.u32.totalorder %s2030_s20, %s2548_s8 }
  0x2b   :  { %p2036_p4 = pnand %p2034_p3, %p2031_p2 }
  0x2d   :  { %2039 = shalt.err (!%p2036_p4)
}
  0x2e   :  { %s2040_s26 = scalar_lea.vmem %s64_s16, 24576  ;;  %p2045_p6 = scmp.lt.s32.totalorder %s64_s16, %s64_s16 }
  0x2f   :  { %p2041_p5 = scmp.ne.s32.totalorder %s64_s16, %s2040_s26  ;;  %p2046_p7 = scmp.lt.s32.totalorder %s2040_s26, %s2040_s26 }
  0x31   :  { %p2047_p8 = por %p2046_p7, %p2045_p6 }
  0x33   :  { %p2048_p9 = pnand %p2047_p8, %p2041_p5 }
  0x35   :  { %2051 = shalt.err (!%p2048_p9)
}
  0x36   :  { %69 = dma.hbm_to_vmem [thread:$0]  %s2548_s8, 24576, %s64_s16, [#allocation6], %s2105_s13, %s2105_s13, %s2106_s14  }
  0x37   :  { %2096 = dma.done.wait [#allocation3], 256  }
  0x38   :  { %2097 = vsyncadd [#allocation3], 4294967040 }
  0x39   :  { %2098 = dma.done.wait [#allocation6], 49152  }
  0x3a   :  { %2099 = vsyncadd [#allocation6], 4294918144  ;;  %v2111_v0 = vmov 0.0   ;;  %v88_v1 = vld [vmem:[%s2543_s3 + $0x8] sm:$0xff]  ;;  %v90_v2 = vld [vmem:[%s2543_s3 + $0x18] sm:$0xff]  ;;  %v217_v17 = vlaneseq  ;;  %vm130_vm0 = vcmask 1045504  }
  0x3b   :  { %201 = vmatprep.mubr.f32.mxu1 %v2111_v0  ;;  %v87_v3 = vld [vmem:[%s2543_s3] sm:$0xff]  ;;  %v1477_v4 = vpack.c.bf16 %v90_v2, %v88_v1  ;;  %v89_v5 = vld [vmem:[%s2543_s3 + $0x10] sm:$0xff]  ;;  %v92_v6 = vld [vmem:[%s2543_s3 + $0x28] sm:$0xff]  ;;  %v2112_v15 = vmov 1983009808   ;;  %vm126_vm1 = vcmask 48128  }
  0x3c   :  { %v94_v7 = vld [vmem:[%s2543_s3 + $0x38] sm:$0xff]  ;;  %v1479_v8 = vpack.c.bf16 %v89_v5, %v87_v3  ;;  %v91_v10 = vld [vmem:[%s2543_s3 + $0x20] sm:$0xff]  ;;  %v93_v11 = vld [vmem:[%s2543_s3 + $0x30] sm:$0xff]  ;;  %v215_v16 = vunpack.c.l.s4 %v2112_v15  ;;  %v2269_v25 = vshrl.u32 %v217_v17, 7  ;;  %vm231_vm2 = vcmask 130048  }
  0x3d   :  { %v1481_v9 = vpack.c.bf16 %v94_v7, %v92_v6  ;;  %v96_v12 = vld [vmem:[%s2543_s3 + $0x48] sm:$0xff]  ;;  %1478 = vmatprep.subr.bf16.mxu0 %v1477_v4  ;;  %v98_v13 = vld [vmem:[%s2543_s3 + $0x58] sm:$0xff]  ;;  %v1483_v14 = vpack.c.bf16 %v93_v11, %v91_v10  ;;  %v95_v19 = vld [vmem:[%s2543_s3 + $0x40] sm:$0xff]  ;;  %vm1396_vm3 = vcmask 31744  }
  0x3e   :  { %1480 = vmatpush1.bf16.msra.mxu0 %v1479_v8  ;;  %v1485_v18 = vpack.c.bf16 %v98_v13, %v96_v12  ;;  %v97_v20 = vld [vmem:[%s2543_s3 + $0x50] sm:$0xff]  ;;  %v100_v21 = vld [vmem:[%s2543_s3 + $0x68] sm:$0xff]  ;;  %v102_v22 = vld [vmem:[%s2543_s3 + $0x78] sm:$0xff]  ;;  %v216_v24 = vunpack.c.0.s8 %v215_v16 }
  0x3f   :  { %1482 = vmatprep.subr.bf16.mxu0 %v1481_v9  ;;  %v1487_v23 = vpack.c.bf16 %v97_v20, %v95_v19  ;;  %v1489_v26 = vpack.c.bf16 %v102_v22, %v100_v21  ;;  %v99_v27 = vld [vmem:[%s2543_s3 + $0x60] sm:$0xff]  ;;  %v101_v28 = vld [vmem:[%s2543_s3 + $0x70] sm:$0xff]  ;;  %v104_v29 = vld [vmem:[%s2543_s3 + $0x88] sm:$0xff] }
  0x40   :  { %v106_v30 = vld [vmem:[%s2543_s3 + $0x98] sm:$0xff]  ;;  %v103_v31 = vld [vmem:[%s2543_s3 + $0x80] sm:$0xff]  ;;  %v105_v32 = vld [vmem:[%s2543_s3 + $0x90] sm:$0xff]  ;;  %v1491_v34 = vpack.c.bf16 %v101_v28, %v99_v27  ;;  %v2306_v39 = vsub.s32 %v216_v24, %v2269_v25 }
  0x41   :  { %v125_v33 = vld [vmem:[%s2544_s4 + $0x8] sm:$0x3f]  ;;  %v110_v36 = vld [vmem:[%s2543_s3 + $0xb8] sm:$0xff]  ;;  %v124_v37 = vld [vmem:[%s2544_s4] sm:$0x3f]  ;;  %v1493_v40 = vpack.c.bf16 %v106_v30, %v104_v29  ;;  %v1495_v45 = vpack.c.bf16 %v105_v32, %v103_v31 }
  0x42   :  { %1484 = vmatpush1.bf16.msra.mxu0 %v1483_v14  ;;  %v108_v35 = vld [vmem:[%s2543_s3 + $0xa8] sm:$0xff]  ;;  %1432 = vmatprep.subr.msk.mxu1 %vm130_vm0, %v125_v33  ;;  %v123_v38 = vld [vmem:[%s2541_s1] sm:$0xff]  ;;  %v326_v43 = vld [vmem:[#allocation5 + $0x8] sm:$0xff] }
  0x43   :  { %1486 = vmatprep.subr.bf16.mxu0 %v1485_v18  ;;  %1433 = vmatpush1.msk.msra.mxu1 %vm130_vm0, %v124_v37  ;;  %v2312_v41 = vld.sshfl [vmem:[%s2540_s0] sm:$0xff pattern:$0x76325410]  ;;  %v2317_v42 = vld.sshfl [vmem:[%s2540_s0 + $0x8] sm:$0xff pattern:$0x76325410]  ;;  %v1497_v49 = vpack.c.bf16 %v110_v36, %v108_v35 }
  0x44   :  { %1434 = vmatmul.mubr.msk.f32.vlgmr.msra.gmra.mrb[0].mxu1 %vm126_vm1, %v123_v38  ;;  %v332_v44 = vld [vmem:[#allocation5 + $0x38] sm:$0xff]  ;;  %v325_v47 = vld [vmem:[#allocation5] sm:$0xff]  ;;  %v331_v48 = vld [vmem:[#allocation5 + $0x30] sm:$0xff]  ;;  %v229_v56 = vcombine.high %v2312_v41, %v2317_v42 }
  0x45   :  { %v1513_v46 = vpack.c.bf16 %v332_v44, %v326_v43  ;;  %v107_v50 = vld [vmem:[%s2543_s3 + $0xa0] sm:$0xff]  ;;  %v109_v51 = vld [vmem:[%s2543_s3 + $0xb0] sm:$0xff]  ;;  %v1515_v52 = vpack.c.bf16 %v331_v48, %v325_v47  ;;  %v338_v53 = vld [vmem:[#allocation5 + $0x68] sm:$0xff] }
  0x46   :  { %1488 = vmatpush1.bf16.msra.mxu0 %v1487_v23  ;;  %v112_v54 = vld [vmem:[%s2543_s3 + $0xc8] sm:$0xff]  ;;  %v114_v55 = vld [vmem:[%s2543_s3 + $0xd8] sm:$0xff]  ;;  %v337_v59 = vld [vmem:[#allocation5 + $0x60] sm:$0xff]  ;;  %v1499_v61 = vpack.c.bf16 %v109_v51, %v107_v50  ;;  %1435 = vmatprep.mubr.msk.f32.mxu0 %vm231_vm2, %v229_v56  ;;  %v228_v51 = vcombine.low %v2312_v41, %v2317_v42 }
  0x47   :  { %1490 = vmatprep.subr.bf16.mxu0 %v1489_v26  ;;  %1514 = vmatprep.subr.bf16.mxu1 %v1513_v46  ;;  %v344_v57 = vld [vmem:[#allocation5 + $0x98] sm:$0xff]  ;;  %v343_v60 = vld [vmem:[#allocation5 + $0x90] sm:$0xff]  ;;  %v350_v63 = vld [vmem:[#allocation5 + $0xc8] sm:$0xff]  ;;  %v1501_v1 = vpack.c.bf16 %v114_v55, %v112_v54 }
  0x48   :  { %1516 = vmatpush1.bf16.msra.mxu1 %v1515_v52  ;;  %v1517_v58 = vpack.c.bf16 %v344_v57, %v338_v53  ;;  %v1519_v62 = vpack.c.bf16 %v343_v60, %v337_v59  ;;  %v356_v0 = vld [vmem:[#allocation5 + $0xf8] sm:$0xff]  ;;  %v111_v2 = vld [vmem:[%s2543_s3 + $0xc0] sm:$0xff]  ;;  %v113_v3 = vld [vmem:[%s2543_s3 + $0xd0] sm:$0xff] }
  0x49   :  { %v1521_v4 = vpack.c.bf16 %v356_v0, %v350_v63  ;;  %v349_v5 = vld [vmem:[#allocation5 + $0xc0] sm:$0xff]  ;;  %v116_v6 = vld [vmem:[%s2543_s3 + $0xe8] sm:$0xff]  ;;  %v118_v7 = vld [vmem:[%s2543_s3 + $0xf8] sm:$0xff]  ;;  %v1503_v12 = vpack.c.bf16 %v113_v3, %v111_v2 }
  0x4a   :  { %1492 = vmatpush1.bf16.msra.mxu0 %v1491_v34  ;;  %1518 = vmatprep.subr.bf16.mxu1 %v1517_v58  ;;  %v355_v8 = vld [vmem:[#allocation5 + $0xf0] sm:$0xff]  ;;  %v362_v10 = vld [vmem:[#allocation5 + $0x128] sm:$0xff]  ;;  %v368_v11 = vld [vmem:[#allocation5 + $0x158] sm:$0xff]  ;;  %v1505_v16 = vpack.c.bf16 %v118_v7, %v116_v6 }
  0x4b   :  { %1494 = vmatprep.subr.bf16.mxu0 %v1493_v40  ;;  %v1523_v9 = vpack.c.bf16 %v355_v8, %v349_v5  ;;  %v1525_v13 = vpack.c.bf16 %v368_v11, %v362_v10  ;;  %v361_v14 = vld [vmem:[#allocation5 + $0x120] sm:$0xff]  ;;  %v367_v15 = vld [vmem:[#allocation5 + $0x150] sm:$0xff]  ;;  %v374_v19 = vld [vmem:[#allocation5 + $0x188] sm:$0xff] }
  0x4c   :  { %1520 = vmatpush1.bf16.msra.mxu1 %v1519_v62  ;;  %v115_v17 = vld [vmem:[%s2543_s3 + $0xe0] sm:$0xff]  ;;  %v117_v18 = vld [vmem:[%s2543_s3 + $0xf0] sm:$0xff]  ;;  %v120_v20 = vld [vmem:[%s2543_s3 + $0x108] sm:$0xff]  ;;  %v1527_v23 = vpack.c.bf16 %v367_v15, %v361_v14 }
  0x4d   :  { %1522 = vmatprep.subr.bf16.mxu1 %v1521_v4  ;;  %v122_v21 = vld [vmem:[%s2543_s3 + $0x118] sm:$0xff]  ;;  %v380_v22 = vld [vmem:[#allocation5 + $0x1b8] sm:$0xff]  ;;  %v1507_v24 = vpack.c.bf16 %v117_v18, %v115_v17  ;;  %v119_v26 = vld [vmem:[%s2543_s3 + $0x100] sm:$0xff] }
  0x4e   :  { %1496 = vmatpush1.bf16.msra.mxu0 %v1495_v45  ;;  %v1529_v27 = vpack.c.bf16 %v380_v22, %v374_v19  ;;  %v373_v28 = vld [vmem:[#allocation5 + $0x180] sm:$0xff]  ;;  %v379_v29 = vld [vmem:[#allocation5 + $0x1b0] sm:$0xff]  ;;  %v1509_v30 = vpack.c.bf16 %v122_v21, %v120_v20  ;;  %v386_v32 = vld [vmem:[#allocation5 + $0x1e8] sm:$0xff] }
  0x4f   :  { %1498 = vmatprep.subr.bf16.mxu0 %v1497_v49  ;;  %v121_v31 = vld [vmem:[%s2543_s3 + $0x110] sm:$0xff]  ;;  %v392_v33 = vld [vmem:[#allocation5 + $0x218] sm:$0xff]  ;;  %v334_v35 = vld [vmem:[#allocation5 + $0x48] sm:$0xff]  ;;  %v1531_v36 = vpack.c.bf16 %v379_v29, %v373_v28 }
  0x50   :  { %1524 = vmatpush1.bf16.msra.mxu1 %v1523_v9  ;;  %v328_v34 = vld [vmem:[#allocation5 + $0x18] sm:$0xff]  ;;  %v1511_v37 = vpack.c.bf16 %v121_v31, %v119_v26  ;;  %v327_v38 = vld [vmem:[#allocation5 + $0x10] sm:$0xff]  ;;  %v1533_v40 = vpack.c.bf16 %v392_v33, %v386_v32  ;;  %v385_v43 = vld [vmem:[#allocation5 + $0x1e0] sm:$0xff] }
  0x51   :  { %1526 = vmatprep.subr.bf16.mxu1 %v1525_v13  ;;  %v391_v44 = vld [vmem:[#allocation5 + $0x210] sm:$0xff]  ;;  %v1577_v45 = vpack.c.bf16 %v334_v35, %v328_v34  ;;  %v333_v46 = vld [vmem:[#allocation5 + $0x40] sm:$0xff]  ;;  %v398_v47 = vld [vmem:[#allocation5 + $0x248] sm:$0xff] }
  0x52   :  { %1500 = vmatpush1.bf16.msra.mxu0 %v1499_v61  ;;  %v404_v48 = vld [vmem:[#allocation5 + $0x278] sm:$0xff]  ;;  %v346_v50 = vld [vmem:[#allocation5 + $0xa8] sm:$0xff]  ;;  %v1535_v52 = vpack.c.bf16 %v391_v44, %v385_v43  ;;  %v1579_v53 = vpack.c.bf16 %v333_v46, %v327_v38  ;;  %v339_v54 = vld [vmem:[#allocation5 + $0x70] sm:$0xff] }
  0x53   :  { %1502 = vmatprep.subr.bf16.mxu0 %v1501_v1  ;;  %v340_v49 = vld [vmem:[#allocation5 + $0x78] sm:$0xff]  ;;  %v1537_v55 = vpack.c.bf16 %v404_v48, %v398_v47  ;;  %v397_v56 = vld [vmem:[#allocation5 + $0x240] sm:$0xff]  ;;  %v403_v57 = vld [vmem:[#allocation5 + $0x270] sm:$0xff] }
  0x54   :  { %1528 = vmatpush1.bf16.msra.mxu1 %v1527_v23  ;;  %v1581_v58 = vpack.c.bf16 %v346_v50, %v340_v49  ;;  %v345_v59 = vld [vmem:[#allocation5 + $0xa0] sm:$0xff]  ;;  %v410_v60 = vld [vmem:[#allocation5 + $0x2a8] sm:$0xff]  ;;  %v416_v61 = vld [vmem:[#allocation5 + $0x2d8] sm:$0xff]  ;;  %v1539_v0 = vpack.c.bf16 %v403_v57, %v397_v56 }
  0x55   :  { %1530 = vmatprep.subr.bf16.mxu1 %v1529_v27  ;;  %v352_v62 = vld [vmem:[#allocation5 + $0xd8] sm:$0xff]  ;;  %v358_v63 = vld [vmem:[#allocation5 + $0x108] sm:$0xff]  ;;  %v1583_v41 = vpack.c.bf16 %v345_v59, %v339_v54  ;;  %v351_v42 = vld [vmem:[#allocation5 + $0xd0] sm:$0xff]  ;;  %v1541_v1 = vpack.c.bf16 %v416_v61, %v410_v60 }
  0x56   :  { %1504 = vmatpush1.bf16.msra.mxu0 %v1503_v12  ;;  %v409_v2 = vld [vmem:[#allocation5 + $0x2a0] sm:$0xff]  ;;  %v415_v3 = vld [vmem:[#allocation5 + $0x2d0] sm:$0xff]  ;;  %v1585_v4 = vpack.c.bf16 %v358_v63, %v352_v62  ;;  %v422_v6 = vld [vmem:[#allocation5 + $0x308] sm:$0xff] }
  0x57   :  { %1506 = vmatprep.subr.bf16.mxu0 %v1505_v16  ;;  %v357_v5 = vld [vmem:[#allocation5 + $0x100] sm:$0xff]  ;;  %v428_v7 = vld [vmem:[#allocation5 + $0x338] sm:$0xff]  ;;  %v370_v9 = vld [vmem:[#allocation5 + $0x168] sm:$0xff]  ;;  %v1543_v10 = vpack.c.bf16 %v415_v3, %v409_v2 }
  0x58   :  { %1532 = vmatpush1.bf16.msra.mxu1 %v1531_v36  ;;  %v364_v8 = vld [vmem:[#allocation5 + $0x138] sm:$0xff]  ;;  %v1587_v11 = vpack.c.bf16 %v357_v5, %v351_v42  ;;  %v363_v12 = vld [vmem:[#allocation5 + $0x130] sm:$0xff]  ;;  %v1545_v13 = vpack.c.bf16 %v428_v7, %v422_v6  ;;  %v421_v14 = vld [vmem:[#allocation5 + $0x300] sm:$0xff] }
  0x59   :  { %1534 = vmatprep.subr.bf16.mxu1 %v1533_v40  ;;  %v427_v15 = vld [vmem:[#allocation5 + $0x330] sm:$0xff]  ;;  %v1589_v16 = vpack.c.bf16 %v370_v9, %v364_v8  ;;  %v369_v17 = vld [vmem:[#allocation5 + $0x160] sm:$0xff]  ;;  %v434_v18 = vld [vmem:[#allocation5 + $0x368] sm:$0xff] }
  0x5a   :  { %1508 = vmatpush1.bf16.msra.mxu0 %v1507_v24  ;;  %v440_v19 = vld [vmem:[#allocation5 + $0x398] sm:$0xff]  ;;  %v382_v21 = vld [vmem:[#allocation5 + $0x1c8] sm:$0xff]  ;;  %v1547_v22 = vpack.c.bf16 %v427_v15, %v421_v14  ;;  %v1591_v23 = vpack.c.bf16 %v369_v17, %v363_v12  ;;  %v375_v24 = vld [vmem:[#allocation5 + $0x190] sm:$0xff] }
  0x5b   :  { %1510 = vmatprep.subr.bf16.mxu0 %v1509_v30  ;;  %v376_v20 = vld [vmem:[#allocation5 + $0x198] sm:$0xff]  ;;  %v1549_v26 = vpack.c.bf16 %v440_v19, %v434_v18  ;;  %v433_v27 = vld [vmem:[#allocation5 + $0x360] sm:$0xff]  ;;  %v439_v28 = vld [vmem:[#allocation5 + $0x390] sm:$0xff] }
  0x5c   :  { %1536 = vmatpush1.bf16.msra.mxu1 %v1535_v52  ;;  %v1593_v29 = vpack.c.bf16 %v382_v21, %v376_v20  ;;  %v381_v30 = vld [vmem:[#allocation5 + $0x1c0] sm:$0xff]  ;;  %v446_v31 = vld [vmem:[#allocation5 + $0x3c8] sm:$0xff]  ;;  %v452_v32 = vld [vmem:[#allocation5 + $0x3f8] sm:$0xff] }
  0x5d   :  { %1538 = vmatprep.subr.bf16.mxu1 %v1537_v55  ;;  %v388_v33 = vld [vmem:[#allocation5 + $0x1f8] sm:$0xff]  ;;  %v394_v34 = vld [vmem:[#allocation5 + $0x228] sm:$0xff]  ;;  %v387_v35 = vld [vmem:[#allocation5 + $0x1f0] sm:$0xff]  ;;  %v1595_v43 = vpack.c.bf16 %v381_v30, %v375_v24  ;;  %v1553_v44 = vpack.c.bf16 %v452_v32, %v446_v31 }
  0x5e   :  { %1512 = vmatpush1.bf16.msra.mxu0 %v1511_v37  ;;  %v393_v36 = vld [vmem:[#allocation5 + $0x220] sm:$0xff]  ;;  %v1551_v37 = vpack.c.bf16 %v439_v28, %v433_v27  ;;  %v451_v40 = vld [vmem:[#allocation5 + $0x3f0] sm:$0xff]  ;;  %v1597_v46 = vpack.c.bf16 %v394_v34, %v388_v33  ;;  %v464_v47 = vld [vmem:[#allocation5 + $0x458] sm:$0xff] }
  0x5f   :  { %1578 = vmatprep.subr.bf16.mxu0 %v1577_v45  ;;  %v445_v38 = vld [vmem:[#allocation5 + $0x3c0] sm:$0xff]  ;;  %v458_v45 = vld [vmem:[#allocation5 + $0x428] sm:$0xff]  ;;  %v400_v48 = vld [vmem:[#allocation5 + $0x258] sm:$0xff] }
  0x60   :  { %1540 = vmatpush1.bf16.msra.mxu1 %v1539_v0  ;;  %v406_v49 = vld [vmem:[#allocation5 + $0x288] sm:$0xff]  ;;  %v1555_v50 = vpack.c.bf16 %v451_v40, %v445_v38  ;;  %v399_v52 = vld [vmem:[#allocation5 + $0x250] sm:$0xff]  ;;  %v457_v54 = vld [vmem:[#allocation5 + $0x420] sm:$0xff] }
  0x61   :  { %299 = vmatmul.mubr.f32.vlgmr.msra.gmra.mrb[0].mxu0 %v228_v51  ;;  %1542 = vmatprep.subr.bf16.mxu1 %v1541_v1  ;;  %v1599_v51 = vpack.c.bf16 %v393_v36, %v387_v35  ;;  %v463_v55 = vld [vmem:[#allocation5 + $0x450] sm:$0xff]  ;;  %v1601_v56 = vpack.c.bf16 %v406_v49, %v400_v48  ;;  %v405_v57 = vld [vmem:[#allocation5 + $0x280] sm:$0xff]  ;;  %v476_v59 = vld [vmem:[#allocation5 + $0x4b8] sm:$0xff] }
  0x62   :  { %1580 = vmatpush1.bf16.msra.mxu0 %v1579_v53  ;;  %v1557_v53 = vpack.c.bf16 %v464_v47, %v458_v45  ;;  %v412_v60 = vld [vmem:[#allocation5 + $0x2b8] sm:$0xff]  ;;  %v418_v61 = vld [vmem:[#allocation5 + $0x2e8] sm:$0xff]  ;;  %v1559_v62 = vpack.c.bf16 %v463_v55, %v457_v54  ;;  %v1603_v63 = vpack.c.bf16 %v405_v57, %v399_v52  ;;  %v411_v0 = vld [vmem:[#allocation5 + $0x2b0] sm:$0xff] }
  0x63   :  { %1582 = vmatprep.subr.bf16.mxu0 %v1581_v58  ;;  %v470_v58 = vld [vmem:[#allocation5 + $0x488] sm:$0xff]  ;;  %v469_v42 = vld [vmem:[#allocation5 + $0x480] sm:$0xff]  ;;  %v475_v1 = vld [vmem:[#allocation5 + $0x4b0] sm:$0xff]  ;;  %v1605_v2 = vpack.c.bf16 %v418_v61, %v412_v60 }
  0x64   :  { %1544 = vmatpush1.bf16.msra.mxu1 %v1543_v10  ;;  %v417_v3 = vld [vmem:[#allocation5 + $0x2e0] sm:$0xff]  ;;  %v488_v5 = vld [vmem:[#allocation5 + $0x518] sm:$0xff]  ;;  %v430_v7 = vld [vmem:[#allocation5 + $0x348] sm:$0xff]  ;;  %v1563_v8 = vpack.c.bf16 %v475_v1, %v469_v42 }
  0x65   :  { %1546 = vmatprep.subr.bf16.mxu1 %v1545_v13  ;;  %v424_v6 = vld [vmem:[#allocation5 + $0x318] sm:$0xff]  ;;  %v1607_v9 = vpack.c.bf16 %v417_v3, %v411_v0  ;;  %v487_v12 = vld [vmem:[#allocation5 + $0x510] sm:$0xff]  ;;  %v429_v15 = vld [vmem:[#allocation5 + $0x340] sm:$0xff] }
  0x66   :  { %1584 = vmatpush1.bf16.msra.mxu0 %v1583_v41  ;;  %v1561_v41 = vpack.c.bf16 %v476_v59, %v470_v58  ;;  %v1609_v13 = vpack.c.bf16 %v430_v7, %v424_v6  ;;  %v423_v14 = vld [vmem:[#allocation5 + $0x310] sm:$0xff]  ;;  %v442_v17 = vld [vmem:[#allocation5 + $0x3a8] sm:$0xff]  ;;  %v460_v30 = vld [vmem:[#allocation5 + $0x438] sm:$0xff] }
  0x67   :  { %1586 = vmatprep.subr.bf16.mxu0 %v1585_v4  ;;  %v482_v4 = vld [vmem:[#allocation5 + $0x4e8] sm:$0xff]  ;;  %v1611_v19 = vpack.c.bf16 %v429_v15, %v423_v14  ;;  %v435_v21 = vld [vmem:[#allocation5 + $0x370] sm:$0xff]  ;;  %v465_v35 = vld [vmem:[#allocation5 + $0x460] sm:$0xff] }
  0x68   :  { %1548 = vmatpush1.bf16.msra.mxu1 %v1547_v22  ;;  %v1565_v10 = vpack.c.bf16 %v488_v5, %v482_v4  ;;  %v441_v22 = vld [vmem:[#allocation5 + $0x3a0] sm:$0xff]  ;;  %v454_v24 = vld [vmem:[#allocation5 + $0x408] sm:$0xff]  ;;  %v447_v28 = vld [vmem:[#allocation5 + $0x3d0] sm:$0xff] }
  0x69   :  { %1550 = vmatprep.subr.bf16.mxu1 %v1549_v26  ;;  %v1615_v26 = vpack.c.bf16 %v441_v22, %v435_v21  ;;  %v466_v31 = vld [vmem:[#allocation5 + $0x468] sm:$0xff]  ;;  %v459_v34 = vld [vmem:[#allocation5 + $0x430] sm:$0xff]  ;;  %v472_v36 = vld [vmem:[#allocation5 + $0x498] sm:$0xff] }
  0x6a   :  { %1588 = vmatpush1.bf16.msra.mxu0 %v1587_v11  ;;  %v481_v11 = vld [vmem:[#allocation5 + $0x4e0] sm:$0xff]  ;;  %v1621_v33 = vpack.c.bf16 %v466_v31, %v460_v30  ;;  %v1623_v38 = vpack.c.bf16 %v465_v35, %v459_v34  ;;  %v484_v45 = vld [vmem:[#allocation5 + $0x4f8] sm:$0xff]  ;;  %v483_v49 = vld [vmem:[#allocation5 + $0x4f0] sm:$0xff] }
  0x6b   :  { %1590 = vmatprep.subr.bf16.mxu0 %v1589_v16  ;;  %v436_v16 = vld [vmem:[#allocation5 + $0x378] sm:$0xff]  ;;  %v1567_v18 = vpack.c.bf16 %v487_v12, %v481_v11  ;;  %v494_v52 = vld [vmem:[#allocation5 + $0x548] sm:$0xff]  ;;  %v493_v57 = vld [vmem:[#allocation5 + $0x540] sm:$0xff] }
  0x6c   :  { %1552 = vmatpush1.bf16.msra.mxu1 %v1551_v37  ;;  %v1613_v20 = vpack.c.bf16 %v442_v17, %v436_v16  ;;  %v478_v37 = vld [vmem:[#allocation5 + $0x4c8] sm:$0xff]  ;;  %v496_v54 = vld [vmem:[#allocation5 + $0x558] sm:$0xff]  ;;  %v499_v58 = vld [vmem:[#allocation5 + $0x570] sm:$0xff] }
  0x6d   :  { %1554 = vmatprep.subr.bf16.mxu1 %v1553_v44  ;;  %v1625_v40 = vpack.c.bf16 %v478_v37, %v472_v36  ;;  %v477_v44 = vld [vmem:[#allocation5 + $0x4c0] sm:$0xff]  ;;  %v1571_v60 = vpack.c.bf16 %v499_v58, %v493_v57  ;;  %v495_v61 = vld [vmem:[#allocation5 + $0x550] sm:$0xff]  ;;  %v506_v0 = vld [vmem:[#allocation5 + $0x5a8] sm:$0xff] }
  0x6e   :  { %1592 = vmatpush1.bf16.msra.mxu0 %v1591_v23  ;;  %v448_v23 = vld [vmem:[#allocation5 + $0x3d8] sm:$0xff]  ;;  %v505_v3 = vld [vmem:[#allocation5 + $0x5a0] sm:$0xff]  ;;  %v511_v4 = vld [vmem:[#allocation5 + $0x5d0] sm:$0xff] }
  0x6f   :  { %1594 = vmatprep.subr.bf16.mxu0 %v1593_v29  ;;  %v1617_v27 = vpack.c.bf16 %v454_v24, %v448_v23  ;;  %v453_v29 = vld [vmem:[#allocation5 + $0x400] sm:$0xff]  ;;  %v508_v42 = vld [vmem:[#allocation5 + $0x5b8] sm:$0xff]  ;;  %v1575_v6 = vpack.c.bf16 %v511_v4, %v505_v3  ;;  %v507_v7 = vld [vmem:[#allocation5 + $0x5b0] sm:$0xff] }
  0x70   :  { %1556 = vmatpush1.bf16.msra.mxu1 %v1555_v50  ;;  %v1619_v32 = vpack.c.bf16 %v453_v29, %v447_v28  ;;  %v489_v50 = vld [vmem:[#allocation5 + $0x520] sm:$0xff]  ;;  %v336_v11 = vld [vmem:[#allocation5 + $0x58] sm:$0xff]  ;;  %v771_v14 = vld [vmem:[#allocation7 + $0x48] sm:$0xff] }
  0x71   :  { %1558 = vmatprep.subr.bf16.mxu1 %v1557_v53  ;;  %v500_v53 = vld [vmem:[#allocation5 + $0x578] sm:$0xff]  ;;  %v2376_v24 = vld.sshfl [vmem:[#allocation2] sm:$0xff pattern:$0x76325410]  ;;  %v329_v30 = vld [vmem:[#allocation5 + $0x20] sm:$0xff] }
  0x72   :  { %1596 = vmatpush1.bf16.msra.mxu0 %v1595_v43  ;;  %v471_v43 = vld [vmem:[#allocation5 + $0x490] sm:$0xff]  ;;  %v1569_v55 = vpack.c.bf16 %v500_v53, %v494_v52  ;;  %v765_v12 = vld [vmem:[#allocation7 + $0x18] sm:$0xff]  ;;  %v770_v34 = vld [vmem:[#allocation7 + $0x40] sm:$0xff] }
  0x73   :  { %1598 = vmatprep.subr.bf16.mxu0 %v1597_v46  ;;  %v490_v46 = vld [vmem:[#allocation5 + $0x528] sm:$0xff]  ;;  %v1627_v47 = vpack.c.bf16 %v477_v44, %v471_v43  ;;  %v1769_v15 = vpack.c.bf16 %v771_v14, %v765_v12  ;;  %v348_v37 = vld [vmem:[#allocation5 + $0xb8] sm:$0xff] }
  0x74   :  { %1560 = vmatpush1.bf16.msra.mxu1 %v1559_v62  ;;  %v1629_v48 = vpack.c.bf16 %v490_v46, %v484_v45  ;;  %v501_v62 = vld [vmem:[#allocation5 + $0x580] sm:$0xff]  ;;  %v342_v36 = vld [vmem:[#allocation5 + $0x88] sm:$0xff]  ;;  %v813_v14 = vld [vmem:[#allocation7 + $0x198] sm:$0xff] }
  0x75   :  { %1562 = vmatprep.subr.bf16.mxu1 %v1561_v41  ;;  %v512_v41 = vld [vmem:[#allocation5 + $0x5d8] sm:$0xff]  ;;  %v341_v46 = vld [vmem:[#allocation5 + $0x80] sm:$0xff]  ;;  %v354_v52 = vld [vmem:[#allocation5 + $0xe8] sm:$0xff] }
  0x76   :  { %1600 = vmatpush1.bf16.msra.mxu0 %v1599_v51  ;;  %v1631_v51 = vpack.c.bf16 %v489_v50, %v483_v49  ;;  %v1573_v1 = vpack.c.bf16 %v512_v41, %v506_v0  ;;  %v1645_v49 = vpack.c.bf16 %v348_v37, %v342_v36  ;;  %v776_v50 = vld [vmem:[#allocation7 + $0x70] sm:$0xff]  ;;  %v794_v41 = vld [vmem:[#allocation7 + $0x100] sm:$0xff]  ;;  %v807_v3 = vld [vmem:[#allocation7 + $0x168] sm:$0xff] }
  0x77   :  { %1602 = vmatprep.subr.bf16.mxu0 %v1601_v56  ;;  %v502_v56 = vld [vmem:[#allocation5 + $0x588] sm:$0xff]  ;;  %v788_v0 = vld [vmem:[#allocation7 + $0xd0] sm:$0xff] }
  0x78   :  { %1564 = vmatpush1.bf16.msra.mxu1 %v1563_v8  ;;  %v1633_v59 = vpack.c.bf16 %v502_v56, %v496_v54  ;;  %v513_v8 = vld [vmem:[#allocation5 + $0x5e0] sm:$0xff]  ;;  %v360_v54 = vld [vmem:[#allocation5 + $0x118] sm:$0xff]  ;;  %v795_v56 = vld [vmem:[#allocation7 + $0x108] sm:$0xff] }
  0x79   :  { %1566 = vmatprep.subr.bf16.mxu1 %v1565_v10  ;;  %v330_v10 = vld [vmem:[#allocation5 + $0x28] sm:$0xff]  ;;  %v395_v36 = vld [vmem:[#allocation5 + $0x230] sm:$0xff] }
  0x7a   :  { %1604 = vmatpush1.bf16.msra.mxu0 %v1603_v63  ;;  %v1635_v63 = vpack.c.bf16 %v501_v62, %v495_v61  ;;  %v359_v61 = vld [vmem:[#allocation5 + $0x110] sm:$0xff]  ;;  %v1649_v62 = vpack.c.bf16 %v360_v54, %v354_v52  ;;  %v378_v12 = vld [vmem:[#allocation5 + $0x1a8] sm:$0xff] }
  0x7b   :  { %1606 = vmatprep.subr.bf16.mxu0 %v1605_v2  ;;  %v514_v2 = vld [vmem:[#allocation5 + $0x5e8] sm:$0xff]  ;;  %v407_v52 = vld [vmem:[#allocation5 + $0x290] sm:$0xff] }
  0x7c   :  { %1568 = vmatpush1.bf16.msra.mxu1 %v1567_v18  ;;  %v1637_v5 = vpack.c.bf16 %v514_v2, %v508_v42  ;;  %v2366_v18 = vsub.s32 0, %v2269_v25  ;;  %v366_v42 = vld [vmem:[#allocation5 + $0x148] sm:$0xff]  ;;  %v801_v2 = vld [vmem:[#allocation7 + $0x138] sm:$0xff] }
  0x7d   :  { %1570 = vmatprep.subr.bf16.mxu1 %v1569_v55  ;;  %v789_v55 = vld [vmem:[#allocation7 + $0xd8] sm:$0xff] }
  0x7e   :  { %1608 = vmatpush1.bf16.msra.mxu0 %v1607_v9  ;;  %v1639_v9 = vpack.c.bf16 %v513_v8, %v507_v7  ;;  %v371_v7 = vld [vmem:[#allocation5 + $0x170] sm:$0xff] }
  0x7f   :  { %1610 = vmatprep.subr.bf16.mxu0 %v1609_v13  ;;  %v1641_v13 = vpack.c.bf16 %v336_v11, %v330_v10  ;;  %v800_v10 = vld [vmem:[#allocation7 + $0x130] sm:$0xff]  ;;  %v806_v11 = vld [vmem:[#allocation7 + $0x160] sm:$0xff] }
  0x80   :  { %1572 = vmatpush1.bf16.msra.mxu1 %v1571_v60  ;;  %v353_v60 = vld [vmem:[#allocation5 + $0xe0] sm:$0xff] }
  0x81   :  { %1574 = vmatprep.subr.bf16.mxu1 %v1573_v1  ;;  %v372_v1 = vld [vmem:[#allocation5 + $0x178] sm:$0xff]  ;;  %v1651_v4 = vpack.c.bf16 %v359_v61, %v353_v60  ;;  %v855_v61 = vld [vmem:[#allocation7 + $0x2e8] sm:$0xff] }
  0x82   :  { %1612 = vmatpush1.bf16.msra.mxu0 %v1611_v19  ;;  %v305_v19 = vld [vmem:[%s2545_s5] sm:$0x3]  ;;  %v1653_v8 = vpack.c.bf16 %v372_v1, %v366_v42  ;;  %v849_v60 = vld [vmem:[#allocation7 + $0x2b8] sm:$0xff] }
  0x83   :  { %1614 = vmatprep.subr.bf16.mxu0 %v1613_v20  ;;  %v2372_v20 = vsub.s32 1, %v2269_v25  ;;  %v310_v21 = vrot.slane %v305_v19, %v2366_v18  ;;  %v1797_v1 = vpack.c.bf16 %v855_v61, %v849_v60  ;;  %v896_v60 = vld [vmem:[#allocation7 + $0x430] sm:$0xff]  ;;  %v902_v61 = vld [vmem:[#allocation7 + $0x460] sm:$0xff] }
  0x84   :  { %1576 = vmatpush1.bf16.msra.mxu1 %v1575_v6  ;;  %v365_v6 = vld [vmem:[#allocation5 + $0x140] sm:$0xff] }
  0x85   :  { %1642 = vmatprep.subr.bf16.mxu1 %v1641_v13  ;;  %v314_v23 = vrot.slane %v305_v19, %v2372_v20  ;;  %v384_v13 = vld [vmem:[#allocation5 + $0x1d8] sm:$0xff]  ;;  %v377_v19 = vld [vmem:[#allocation5 + $0x1a0] sm:$0xff] }
  0x86   :  { %1616 = vmatpush1.bf16.msra.mxu0 %v1615_v26  ;;  %v2378_v26 = vld.sshfl [vmem:[#allocation2 + $0x8] sm:$0xff pattern:$0x76325410] }
  0x87   :  { %1618 = vmatprep.subr.bf16.mxu0 %v1617_v27  ;;  %v2384_v57 = vcombine.high %v2376_v24, %v2378_v26 }
  0x8a   :  { %1620 = vmatpush1.bf16.msra.mxu0 %v1619_v32  ;;  %v335_v32 = vld [vmem:[#allocation5 + $0x50] sm:$0xff] }
  0x8b   :  { %1622 = vmatprep.subr.bf16.mxu0 %v1621_v33  ;;  %v764_v33 = vld [vmem:[#allocation7 + $0x10] sm:$0xff]  ;;  %v1643_v44 = vpack.c.bf16 %v335_v32, %v329_v30  ;;  %v396_v30 = vld [vmem:[#allocation5 + $0x238] sm:$0xff]  ;;  %v831_v32 = vld [vmem:[#allocation7 + $0x228] sm:$0xff] }
  0x8c   :  { %v1771_v45 = vpack.c.bf16 %v770_v34, %v764_v33 }
  0x8e   :  { %1624 = vmatpush1.bf16.msra.mxu0 %v1623_v38  ;;  %v777_v38 = vld [vmem:[#allocation7 + $0x78] sm:$0xff] }
  0x8f   :  { %1626 = vmatprep.subr.bf16.mxu0 %v1625_v40  ;;  %v783_v40 = vld [vmem:[#allocation7 + $0xa8] sm:$0xff] }
  0x90   :  { %v1773_v53 = vpack.c.bf16 %v783_v40, %v777_v38  ;;  %v824_v40 = vld [vmem:[#allocation7 + $0x1f0] sm:$0xff] }
  0x92   :  { %1628 = vmatpush1.bf16.msra.mxu0 %v1627_v47  ;;  %v347_v47 = vld [vmem:[#allocation5 + $0xb0] sm:$0xff] }
  0x93   :  { %1630 = vmatprep.subr.bf16.mxu0 %v1629_v48  ;;  %v1647_v58 = vpack.c.bf16 %v347_v47, %v341_v46  ;;  %v837_v46 = vld [vmem:[#allocation7 + $0x258] sm:$0xff]  ;;  %v843_v47 = vld [vmem:[#allocation7 + $0x288] sm:$0xff] }
  0x94   :  { %v1793_v54 = vpack.c.bf16 %v843_v47, %v837_v46  ;;  %v884_v46 = vld [vmem:[#allocation7 + $0x3d0] sm:$0xff]  ;;  %v890_v47 = vld [vmem:[#allocation7 + $0x400] sm:$0xff] }
  0x96   :  { %1632 = vmatpush1.bf16.msra.mxu0 %v1631_v51  ;;  %v782_v51 = vld [vmem:[#allocation7 + $0xa0] sm:$0xff] }
  0x97   :  { %1634 = vmatprep.subr.bf16.mxu0 %v1633_v59  ;;  %v1775_v59 = vpack.c.bf16 %v782_v51, %v776_v50  ;;  %v401_v51 = vld [vmem:[#allocation5 + $0x260] sm:$0xff] }
  0x9a   :  { %1636 = vmatpush1.bf16.msra.mxu0 %v1635_v63  ;;  %v1777_v63 = vpack.c.bf16 %v795_v56, %v789_v55  ;;  %v836_v55 = vld [vmem:[#allocation7 + $0x250] sm:$0xff]  ;;  %v842_v56 = vld [vmem:[#allocation7 + $0x280] sm:$0xff] }
  0x9b   :  { %1638 = vmatprep.subr.bf16.mxu0 %v1637_v5  ;;  %v1779_v5 = vpack.c.bf16 %v794_v41, %v788_v0  ;;  %v413_v0 = vld [vmem:[#allocation5 + $0x2c0] sm:$0xff]  ;;  %v419_v41 = vld [vmem:[#allocation5 + $0x2f0] sm:$0xff] }
  0x9e   :  { %1640 = vmatpush1.bf16.msra.mxu0 %v1639_v9  ;;  %v1781_v9 = vpack.c.bf16 %v807_v3, %v801_v2  ;;  %v848_v2 = vld [vmem:[#allocation7 + $0x2b0] sm:$0xff]  ;;  %v854_v3 = vld [vmem:[#allocation7 + $0x2e0] sm:$0xff] }
  0x9f   :  { %1770 = vmatprep.subr.bf16.mxu0 %v1769_v15  ;;  %v819_v15 = vld [vmem:[#allocation7 + $0x1c8] sm:$0xff] }
 0x117   :  { %v203_v16 = vpop.f32.mrb[0].mxu1 }
 0x118   :  { %v205_v17 = vpop.f32.mrb[1].mxu1 }
 0x134   :  { %v300_v22 = vpop.f32.mrb[0].mxu0 }
 0x135   :  { %v301_v27 = vadd.f32 %v300_v22, %v203_v16  ;;  %v302_v28 = vpop.f32.mrb[1].mxu0  ;;  %v1655_v16 = vpack.c.bf16 %v371_v7, %v365_v6  ;;  %v1657_v22 = vpack.c.bf16 %v384_v13, %v378_v12  ;;  %v861_v6 = vld [vmem:[#allocation7 + $0x318] sm:$0xff]  ;;  %v867_v7 = vld [vmem:[#allocation7 + $0x348] sm:$0xff] }
 0x136   :  { %v303_v29 = vadd.f32 %v302_v28, %v205_v17  ;;  %v1783_v17 = vpack.c.bf16 %v806_v11, %v800_v10  ;;  %v818_v28 = vld [vmem:[#allocation7 + $0x1c0] sm:$0xff]  ;;  %v431_v11 = vld [vmem:[#allocation5 + $0x350] sm:$0xff]  ;;  %v1801_v13 = vpack.c.bf16 %v867_v7, %v861_v6 }
 0x137   :  { %v317_v31 = vadd.f32 %v310_v21, %v301_v27  ;;  %v383_v21 = vld [vmem:[#allocation5 + $0x1d0] sm:$0xff]  ;;  %v425_v10 = vld [vmem:[#allocation5 + $0x320] sm:$0xff] }
 0x138   :  { %v318_v35 = vadd.f32 %v314_v23, %v303_v29  ;;  %v1785_v23 = vpack.c.bf16 %v819_v15, %v813_v14  ;;  %v812_v27 = vld [vmem:[#allocation7 + $0x190] sm:$0xff]  ;;  %v390_v29 = vld [vmem:[#allocation5 + $0x208] sm:$0xff]  ;;  %v1659_v33 = vpack.c.bf16 %v383_v21, %v377_v19  ;;  %v866_v15 = vld [vmem:[#allocation7 + $0x340] sm:$0xff] }
 0x139   :  { %v2380_v48 = vmax.f32 %v317_v31, 0.0  ;;  %v825_v31 = vld [vmem:[#allocation7 + $0x1f8] sm:$0xff]  ;;  %v1787_v34 = vpack.c.bf16 %v818_v28, %v812_v27  ;;  %v1661_v37 = vpack.c.bf16 %v396_v30, %v390_v29  ;;  %v860_v14 = vld [vmem:[#allocation7 + $0x310] sm:$0xff]  ;;  %v879_v21 = vld [vmem:[#allocation7 + $0x3a8] sm:$0xff] }
 0x13a   :  { %v320_v43 = vmax.f32 %v318_v35, 0.0  ;;  %v389_v35 = vld [vmem:[#allocation5 + $0x200] sm:$0xff]  ;;  %v1789_v38 = vpack.c.bf16 %v831_v32, %v825_v31  ;;  %v873_v19 = vld [vmem:[#allocation7 + $0x378] sm:$0xff]  ;;  %v443_v28 = vld [vmem:[#allocation5 + $0x3b0] sm:$0xff] }
 0x13b   :  { %v437_v27 = vld [vmem:[#allocation5 + $0x380] sm:$0xff]  ;;  %v1805_v30 = vpack.c.bf16 %v879_v21, %v873_v19  ;;  %v872_v31 = vld [vmem:[#allocation7 + $0x370] sm:$0xff] }
 0x13c   :  { %613 = vmatprep.mubr.f32.mxu1 %v320_v43  ;;  %684 = vmatprep.mubr.f32.mxu0 %v320_v43  ;;  %v878_v32 = vld [vmem:[#allocation7 + $0x3a0] sm:$0xff]  ;;  %v908_v6 = vld [vmem:[#allocation7 + $0x490] sm:$0xff] }
 0x13d   :  { %614 = vmatmul.mubr.f32.vlgmr.msra.gmra.mrb[2].mxu1 %v2380_v48  ;;  %685 = vmatmul.mubr.f32.vlgmr.msra.gmra.mrb[2].mxu0 %v2380_v48  ;;  %v914_v7 = vld [vmem:[#allocation7 + $0x4c0] sm:$0xff]  ;;  %v920_v19 = vld [vmem:[#allocation7 + $0x4f0] sm:$0xff] }
 0x13e   :  { %1644 = vmatpush1.bf16.msra.mxu1 %v1643_v44  ;;  %1772 = vmatpush1.bf16.msra.mxu0 %v1771_v45  ;;  %v402_v44 = vld [vmem:[#allocation5 + $0x268] sm:$0xff]  ;;  %v408_v45 = vld [vmem:[#allocation5 + $0x298] sm:$0xff]  ;;  %v926_v21 = vld [vmem:[#allocation7 + $0x520] sm:$0xff] }
 0x13f   :  { %755 = vmatprep.mubr.f32.mxu1 %v320_v43  ;;  %1646 = vmatprep.subr.bf16.mxu1 %v1645_v49  ;;  %v830_v43 = vld [vmem:[#allocation7 + $0x220] sm:$0xff]  ;;  %v1663_v49 = vpack.c.bf16 %v395_v36, %v389_v35  ;;  %v885_v35 = vld [vmem:[#allocation7 + $0x3d8] sm:$0xff]  ;;  %v891_v36 = vld [vmem:[#allocation7 + $0x408] sm:$0xff] }
 0x140   :  { %1774 = vmatprep.subr.bf16.mxu0 %v1773_v53  ;;  %1145 = vmatprep.mubr.f32.mxu0 %v2384_v57  ;;  %v1791_v50 = vpack.c.bf16 %v830_v43, %v824_v40  ;;  %v1665_v53 = vpack.c.bf16 %v408_v45, %v402_v44  ;;  %v449_v40 = vld [vmem:[#allocation5 + $0x3e0] sm:$0xff]  ;;  %v455_v43 = vld [vmem:[#allocation5 + $0x410] sm:$0xff]  ;;  %v1809_v45 = vpack.c.bf16 %v891_v36, %v885_v35 }
 0x141   :  { %v932_v35 = vld [vmem:[#allocation7 + $0x550] sm:$0xff]  ;;  %v938_v36 = vld [vmem:[#allocation7 + $0x580] sm:$0xff] }
 0x142   :  { %1648 = vmatpush1.bf16.msra.mxu1 %v1647_v58  ;;  %1776 = vmatpush1.bf16.msra.mxu0 %v1775_v59  ;;  %v414_v58 = vld [vmem:[#allocation5 + $0x2c8] sm:$0xff]  ;;  %v420_v59 = vld [vmem:[#allocation5 + $0x2f8] sm:$0xff] }
 0x143   :  { %1650 = vmatprep.subr.bf16.mxu1 %v1649_v62  ;;  %1778 = vmatprep.subr.bf16.mxu0 %v1777_v63  ;;  %v1667_v62 = vpack.c.bf16 %v407_v52, %v401_v51  ;;  %v1795_v63 = vpack.c.bf16 %v842_v56, %v836_v55  ;;  %v1669_v42 = vpack.c.bf16 %v420_v59, %v414_v58  ;;  %v897_v51 = vld [vmem:[#allocation7 + $0x438] sm:$0xff]  ;;  %v903_v52 = vld [vmem:[#allocation7 + $0x468] sm:$0xff]  ;;  %v461_v55 = vld [vmem:[#allocation5 + $0x440] sm:$0xff] }
 0x144   :  { %v467_v56 = vld [vmem:[#allocation5 + $0x470] sm:$0xff]  ;;  %v1813_v59 = vpack.c.bf16 %v903_v52, %v897_v51  ;;  %v950_v52 = vld [vmem:[#allocation7 + $0x5e0] sm:$0xff] }
 0x145   :  { %v944_v51 = vld [vmem:[#allocation7 + $0x5b0] sm:$0xff] }
 0x146   :  { %1652 = vmatpush1.bf16.msra.mxu1 %v1651_v4  ;;  %1780 = vmatpush1.bf16.msra.mxu0 %v1779_v5  ;;  %v426_v4 = vld [vmem:[#allocation5 + $0x328] sm:$0xff]  ;;  %v432_v5 = vld [vmem:[#allocation5 + $0x358] sm:$0xff] }
 0x147   :  { %1654 = vmatprep.subr.bf16.mxu1 %v1653_v8  ;;  %1782 = vmatprep.subr.bf16.mxu0 %v1781_v9  ;;  %v1671_v8 = vpack.c.bf16 %v419_v41, %v413_v0  ;;  %v1799_v9 = vpack.c.bf16 %v854_v3, %v848_v2  ;;  %v1673_v12 = vpack.c.bf16 %v432_v5, %v426_v4  ;;  %v909_v0 = vld [vmem:[#allocation7 + $0x498] sm:$0xff]  ;;  %v915_v41 = vld [vmem:[#allocation7 + $0x4c8] sm:$0xff]  ;;  %v473_v2 = vld [vmem:[#allocation5 + $0x4a0] sm:$0xff] }
 0x148   :  { %v479_v3 = vld [vmem:[#allocation5 + $0x4d0] sm:$0xff]  ;;  %v1817_v5 = vpack.c.bf16 %v915_v41, %v909_v0  ;;  %v766_v41 = vld [vmem:[#allocation7 + $0x20] sm:$0xff] }
 0x14a   :  { %1656 = vmatpush1.bf16.msra.mxu1 %v1655_v16  ;;  %1784 = vmatpush1.bf16.msra.mxu0 %v1783_v17  ;;  %v438_v16 = vld [vmem:[#allocation5 + $0x388] sm:$0xff]  ;;  %v444_v17 = vld [vmem:[#allocation5 + $0x3b8] sm:$0xff] }
 0x14b   :  { %1658 = vmatprep.subr.bf16.mxu1 %v1657_v22  ;;  %1786 = vmatprep.subr.bf16.mxu0 %v1785_v23  ;;  %v1675_v22 = vpack.c.bf16 %v431_v11, %v425_v10  ;;  %v1803_v23 = vpack.c.bf16 %v866_v15, %v860_v14  ;;  %v1677_v29 = vpack.c.bf16 %v444_v17, %v438_v16  ;;  %v921_v10 = vld [vmem:[#allocation7 + $0x4f8] sm:$0xff]  ;;  %v927_v11 = vld [vmem:[#allocation7 + $0x528] sm:$0xff]  ;;  %v485_v14 = vld [vmem:[#allocation5 + $0x500] sm:$0xff] }
 0x14c   :  { %v491_v15 = vld [vmem:[#allocation5 + $0x530] sm:$0xff]  ;;  %v1821_v17 = vpack.c.bf16 %v927_v11, %v921_v10  ;;  %v787_v10 = vld [vmem:[#allocation7 + $0xc8] sm:$0xff] }
 0x14e   :  { %1660 = vmatpush1.bf16.msra.mxu1 %v1659_v33  ;;  %1788 = vmatpush1.bf16.msra.mxu0 %v1787_v34  ;;  %v450_v33 = vld [vmem:[#allocation5 + $0x3e8] sm:$0xff]  ;;  %v456_v34 = vld [vmem:[#allocation5 + $0x418] sm:$0xff] }
 0x14f   :  { %1662 = vmatprep.subr.bf16.mxu1 %v1661_v37  ;;  %1790 = vmatprep.subr.bf16.mxu0 %v1789_v38  ;;  %v1679_v37 = vpack.c.bf16 %v443_v28, %v437_v27  ;;  %v1807_v38 = vpack.c.bf16 %v878_v32, %v872_v31  ;;  %v1681_v44 = vpack.c.bf16 %v456_v34, %v450_v33  ;;  %v933_v27 = vld [vmem:[#allocation7 + $0x558] sm:$0xff]  ;;  %v939_v28 = vld [vmem:[#allocation7 + $0x588] sm:$0xff]  ;;  %v497_v31 = vld [vmem:[#allocation5 + $0x560] sm:$0xff] }
 0x150   :  { %v503_v32 = vld [vmem:[#allocation5 + $0x590] sm:$0xff]  ;;  %v1825_v34 = vpack.c.bf16 %v939_v28, %v933_v27  ;;  %v790_v27 = vld [vmem:[#allocation7 + $0xe0] sm:$0xff] }
 0x151   :  { %v796_v28 = vld [vmem:[#allocation7 + $0x110] sm:$0xff] }
 0x152   :  { %1664 = vmatpush1.bf16.msra.mxu1 %v1663_v49  ;;  %1792 = vmatpush1.bf16.msra.mxu0 %v1791_v50  ;;  %v462_v49 = vld [vmem:[#allocation5 + $0x448] sm:$0xff]  ;;  %v468_v50 = vld [vmem:[#allocation5 + $0x478] sm:$0xff] }
 0x153   :  { %1666 = vmatprep.subr.bf16.mxu1 %v1665_v53  ;;  %1794 = vmatprep.subr.bf16.mxu0 %v1793_v54  ;;  %v1683_v53 = vpack.c.bf16 %v455_v43, %v449_v40  ;;  %v1811_v54 = vpack.c.bf16 %v890_v47, %v884_v46  ;;  %v1685_v58 = vpack.c.bf16 %v468_v50, %v462_v49  ;;  %v945_v40 = vld [vmem:[#allocation7 + $0x5b8] sm:$0xff]  ;;  %v951_v43 = vld [vmem:[#allocation7 + $0x5e8] sm:$0xff]  ;;  %v509_v46 = vld [vmem:[#allocation5 + $0x5c0] sm:$0xff] }
 0x154   :  { %v515_v47 = vld [vmem:[#allocation5 + $0x5f0] sm:$0xff]  ;;  %v1829_v50 = vpack.c.bf16 %v951_v43, %v945_v40  ;;  %v817_v43 = vld [vmem:[#allocation7 + $0x1b8] sm:$0xff] }
 0x155   :  { %v808_v40 = vld [vmem:[#allocation7 + $0x170] sm:$0xff] }
 0x156   :  { %1668 = vmatpush1.bf16.msra.mxu1 %v1667_v62  ;;  %1796 = vmatpush1.bf16.msra.mxu0 %v1795_v63  ;;  %v474_v62 = vld [vmem:[#allocation5 + $0x4a8] sm:$0xff]  ;;  %v480_v63 = vld [vmem:[#allocation5 + $0x4d8] sm:$0xff] }
 0x157   :  { %1670 = vmatprep.subr.bf16.mxu1 %v1669_v42  ;;  %1798 = vmatprep.subr.bf16.mxu0 %v1797_v1  ;;  %v1687_v42 = vpack.c.bf16 %v467_v56, %v461_v55  ;;  %v1815_v1 = vpack.c.bf16 %v902_v61, %v896_v60  ;;  %v1689_v4 = vpack.c.bf16 %v480_v63, %v474_v62  ;;  %v767_v55 = vld [vmem:[#allocation7 + $0x28] sm:$0xff]  ;;  %v773_v56 = vld [vmem:[#allocation7 + $0x58] sm:$0xff]  ;;  %v762_v60 = vld [vmem:[#allocation7] sm:$0xff] }
 0x158   :  { %v768_v61 = vld [vmem:[#allocation7 + $0x30] sm:$0xff]  ;;  %v775_v63 = vld [vmem:[#allocation7 + $0x68] sm:$0xff]  ;;  %v1833_v0 = vpack.c.bf16 %v773_v56, %v767_v55  ;;  %v829_v56 = vld [vmem:[#allocation7 + $0x218] sm:$0xff] }
 0x159   :  { %v820_v55 = vld [vmem:[#allocation7 + $0x1d0] sm:$0xff] }
 0x15a   :  { %1672 = vmatpush1.bf16.msra.mxu1 %v1671_v8  ;;  %1800 = vmatpush1.bf16.msra.mxu0 %v1799_v9  ;;  %v486_v8 = vld [vmem:[#allocation5 + $0x508] sm:$0xff]  ;;  %v492_v9 = vld [vmem:[#allocation5 + $0x538] sm:$0xff] }
 0x15b   :  { %1674 = vmatprep.subr.bf16.mxu1 %v1673_v12  ;;  %1802 = vmatprep.subr.bf16.mxu0 %v1801_v13  ;;  %v1691_v12 = vpack.c.bf16 %v479_v3, %v473_v2  ;;  %v1819_v13 = vpack.c.bf16 %v914_v7, %v908_v6  ;;  %v1693_v16 = vpack.c.bf16 %v492_v9, %v486_v8  ;;  %v779_v2 = vld [vmem:[#allocation7 + $0x88] sm:$0xff]  ;;  %v785_v3 = vld [vmem:[#allocation7 + $0xb8] sm:$0xff]  ;;  %v774_v6 = vld [vmem:[#allocation7 + $0x60] sm:$0xff] }
 0x15c   :  { %v780_v7 = vld [vmem:[#allocation7 + $0x90] sm:$0xff]  ;;  %v1837_v11 = vpack.c.bf16 %v785_v3, %v779_v2  ;;  %v841_v3 = vld [vmem:[#allocation7 + $0x278] sm:$0xff] }
 0x15d   :  { %v832_v2 = vld [vmem:[#allocation7 + $0x230] sm:$0xff] }
 0x15e   :  { %1676 = vmatpush1.bf16.msra.mxu1 %v1675_v22  ;;  %1804 = vmatpush1.bf16.msra.mxu0 %v1803_v23  ;;  %v498_v22 = vld [vmem:[#allocation5 + $0x568] sm:$0xff]  ;;  %v504_v23 = vld [vmem:[#allocation5 + $0x598] sm:$0xff] }
 0x15f   :  { %1678 = vmatprep.subr.bf16.mxu1 %v1677_v29  ;;  %1806 = vmatprep.subr.bf16.mxu0 %v1805_v30  ;;  %v1695_v29 = vpack.c.bf16 %v491_v15, %v485_v14  ;;  %v1823_v30 = vpack.c.bf16 %v926_v21, %v920_v19  ;;  %v1697_v33 = vpack.c.bf16 %v504_v23, %v498_v22  ;;  %v793_v14 = vld [vmem:[#allocation7 + $0xf8] sm:$0xff]  ;;  %v791_v15 = vld [vmem:[#allocation7 + $0xe8] sm:$0xff] }
 0x160   :  { %v1713_v21 = vpack.c.bf16 %v793_v14, %v787_v10  ;;  %v799_v22 = vld [vmem:[#allocation7 + $0x128] sm:$0xff]  ;;  %v838_v14 = vld [vmem:[#allocation7 + $0x260] sm:$0xff] }
 0x162   :  { %1680 = vmatpush1.bf16.msra.mxu1 %v1679_v37  ;;  %1808 = vmatpush1.bf16.msra.mxu0 %v1807_v38  ;;  %v510_v37 = vld [vmem:[#allocation5 + $0x5c8] sm:$0xff]  ;;  %v516_v38 = vld [vmem:[#allocation5 + $0x5f8] sm:$0xff] }
 0x163   :  { %1682 = vmatprep.subr.bf16.mxu1 %v1681_v44  ;;  %1810 = vmatprep.subr.bf16.mxu0 %v1809_v45  ;;  %v1699_v44 = vpack.c.bf16 %v503_v32, %v497_v31  ;;  %v1827_v45 = vpack.c.bf16 %v938_v36, %v932_v35  ;;  %v1701_v49 = vpack.c.bf16 %v516_v38, %v510_v37  ;;  %v809_v31 = vld [vmem:[#allocation7 + $0x178] sm:$0xff]  ;;  %v798_v32 = vld [vmem:[#allocation7 + $0x120] sm:$0xff]  ;;  %v811_v36 = vld [vmem:[#allocation7 + $0x188] sm:$0xff] }
 0x164   :  { %v802_v38 = vld [vmem:[#allocation7 + $0x140] sm:$0xff] }
 0x166   :  { %1684 = vmatpush1.bf16.msra.mxu1 %v1683_v53  ;;  %1812 = vmatpush1.bf16.msra.mxu0 %v1811_v54  ;;  %v763_v53 = vld [vmem:[#allocation7 + $0x8] sm:$0xff]  ;;  %v769_v54 = vld [vmem:[#allocation7 + $0x38] sm:$0xff] }
 0x167   :  { %1686 = vmatprep.subr.bf16.mxu1 %v1685_v58  ;;  %1814 = vmatprep.subr.bf16.mxu0 %v1813_v59  ;;  %v1703_v58 = vpack.c.bf16 %v515_v47, %v509_v46  ;;  %v1831_v59 = vpack.c.bf16 %v950_v52, %v944_v51  ;;  %v1705_v62 = vpack.c.bf16 %v769_v54, %v763_v53  ;;  %v810_v47 = vld [vmem:[#allocation7 + $0x180] sm:$0xff]  ;;  %v823_v52 = vld [vmem:[#allocation7 + $0x1e8] sm:$0xff] }
 0x168   :  { %v1721_v51 = vpack.c.bf16 %v817_v43, %v811_v36  ;;  %v814_v54 = vld [vmem:[#allocation7 + $0x1a0] sm:$0xff] }
 0x169   :  { %v862_v43 = vld [vmem:[#allocation7 + $0x320] sm:$0xff] }
 0x16a   :  { %1688 = vmatpush1.bf16.msra.mxu1 %v1687_v42  ;;  %1816 = vmatpush1.bf16.msra.mxu0 %v1815_v1  ;;  %v772_v42 = vld [vmem:[#allocation7 + $0x50] sm:$0xff]  ;;  %v781_v1 = vld [vmem:[#allocation7 + $0x98] sm:$0xff] }
 0x16b   :  { %1690 = vmatprep.subr.bf16.mxu1 %v1689_v4  ;;  %1818 = vmatprep.subr.bf16.mxu0 %v1817_v5  ;;  %v2391_v4 = vcombine.low %v2376_v24, %v2378_v26  ;;  %v1707_v5 = vpack.c.bf16 %v768_v61, %v762_v60  ;;  %v1835_v8 = vpack.c.bf16 %v772_v42, %v766_v41  ;;  %v786_v26 = vld [vmem:[#allocation7 + $0xc0] sm:$0xff]  ;;  %v835_v41 = vld [vmem:[#allocation7 + $0x248] sm:$0xff] }
 0x16c   :  { %v1709_v9 = vpack.c.bf16 %v781_v1, %v775_v63  ;;  %v1711_v24 = vpack.c.bf16 %v780_v7, %v774_v6  ;;  %v822_v61 = vld [vmem:[#allocation7 + $0x1e0] sm:$0xff]  ;;  %v1851_v63 = vpack.c.bf16 %v820_v55, %v814_v54  ;;  %v845_v6 = vld [vmem:[#allocation7 + $0x298] sm:$0xff]  ;;  %v883_v54 = vld [vmem:[#allocation7 + $0x3c8] sm:$0xff] }
 0x16d   :  { %v826_v1 = vld [vmem:[#allocation7 + $0x200] sm:$0xff] }
 0x16e   :  { %1692 = vmatpush1.bf16.msra.mxu1 %v1691_v12  ;;  %1820 = vmatpush1.bf16.msra.mxu0 %v1819_v13  ;;  %v778_v12 = vld [vmem:[#allocation7 + $0x80] sm:$0xff]  ;;  %v784_v13 = vld [vmem:[#allocation7 + $0xb0] sm:$0xff]  ;;  %v1855_v10 = vpack.c.bf16 %v832_v2, %v826_v1  ;;  %v895_v1 = vld [vmem:[#allocation7 + $0x428] sm:$0xff] }
 0x16f   :  { %1694 = vmatprep.subr.bf16.mxu1 %v1693_v16  ;;  %1822 = vmatprep.subr.bf16.mxu0 %v1821_v17  ;;  %v797_v16 = vld [vmem:[#allocation7 + $0x118] sm:$0xff]  ;;  %v792_v17 = vld [vmem:[#allocation7 + $0xf0] sm:$0xff]  ;;  %v1839_v19 = vpack.c.bf16 %v784_v13, %v778_v12  ;;  %v847_v12 = vld [vmem:[#allocation7 + $0x2a8] sm:$0xff] }
 0x170   :  { %v1841_v23 = vpack.c.bf16 %v797_v16, %v791_v15  ;;  %v844_v15 = vld [vmem:[#allocation7 + $0x290] sm:$0xff]  ;;  %v853_v16 = vld [vmem:[#allocation7 + $0x2d8] sm:$0xff] }
 0x172   :  { %1696 = vmatpush1.bf16.msra.mxu1 %v1695_v29  ;;  %1824 = vmatpush1.bf16.msra.mxu0 %v1823_v30  ;;  %v805_v29 = vld [vmem:[#allocation7 + $0x158] sm:$0xff]  ;;  %v803_v30 = vld [vmem:[#allocation7 + $0x148] sm:$0xff] }
 0x173   :  { %1698 = vmatprep.subr.bf16.mxu1 %v1697_v33  ;;  %1826 = vmatprep.subr.bf16.mxu0 %v1825_v34  ;;  %v804_v33 = vld [vmem:[#allocation7 + $0x150] sm:$0xff]  ;;  %v1843_v34 = vpack.c.bf16 %v796_v28, %v790_v27  ;;  %v1717_v35 = vpack.c.bf16 %v805_v29, %v799_v22  ;;  %v1845_v37 = vpack.c.bf16 %v809_v31, %v803_v30  ;;  %v859_v27 = vld [vmem:[#allocation7 + $0x308] sm:$0xff]  ;;  %v850_v29 = vld [vmem:[#allocation7 + $0x2c0] sm:$0xff] }
 0x174   :  { %v1719_v46 = vpack.c.bf16 %v804_v33, %v798_v32  ;;  %v1859_v22 = vpack.c.bf16 %v844_v15, %v838_v14  ;;  %v856_v30 = vld [vmem:[#allocation7 + $0x2f0] sm:$0xff]  ;;  %v865_v31 = vld [vmem:[#allocation7 + $0x338] sm:$0xff]  ;;  %v907_v14 = vld [vmem:[#allocation7 + $0x488] sm:$0xff] }
 0x175   :  { %v869_v32 = vld [vmem:[#allocation7 + $0x358] sm:$0xff]  ;;  %v1863_v36 = vpack.c.bf16 %v856_v30, %v850_v29  ;;  %v919_v29 = vld [vmem:[#allocation7 + $0x4e8] sm:$0xff] }
 0x176   :  { %1700 = vmatpush1.bf16.msra.mxu1 %v1699_v44  ;;  %1828 = vmatpush1.bf16.msra.mxu0 %v1827_v45  ;;  %v815_v44 = vld [vmem:[#allocation7 + $0x1a8] sm:$0xff]  ;;  %v821_v45 = vld [vmem:[#allocation7 + $0x1d8] sm:$0xff] }
 0x177   :  { %1702 = vmatprep.subr.bf16.mxu1 %v1701_v49  ;;  %1830 = vmatprep.subr.bf16.mxu0 %v1829_v50  ;;  %v816_v49 = vld [vmem:[#allocation7 + $0x1b0] sm:$0xff]  ;;  %v1847_v50 = vpack.c.bf16 %v808_v40, %v802_v38  ;;  %v1849_v53 = vpack.c.bf16 %v821_v45, %v815_v44  ;;  %v871_v38 = vld [vmem:[#allocation7 + $0x368] sm:$0xff]  ;;  %v877_v45 = vld [vmem:[#allocation7 + $0x398] sm:$0xff] }
 0x178   :  { %v1723_v60 = vpack.c.bf16 %v816_v49, %v810_v47  ;;  %v868_v44 = vld [vmem:[#allocation7 + $0x350] sm:$0xff]  ;;  %v881_v47 = vld [vmem:[#allocation7 + $0x3b8] sm:$0xff] }
 0x17a   :  { %1704 = vmatpush1.bf16.msra.mxu1 %v1703_v58  ;;  %1832 = vmatpush1.bf16.msra.mxu0 %v1831_v59  ;;  %v827_v58 = vld [vmem:[#allocation7 + $0x208] sm:$0xff]  ;;  %v833_v59 = vld [vmem:[#allocation7 + $0x238] sm:$0xff] }
 0x17b   :  { %1706 = vmatprep.subr.bf16.mxu1 %v1705_v62  ;;  %1834 = vmatprep.subr.bf16.mxu0 %v1833_v0  ;;  %v828_v62 = vld [vmem:[#allocation7 + $0x210] sm:$0xff]  ;;  %v1725_v0 = vpack.c.bf16 %v829_v56, %v823_v52  ;;  %v1853_v42 = vpack.c.bf16 %v833_v59, %v827_v58  ;;  %v1867_v52 = vpack.c.bf16 %v868_v44, %v862_v43  ;;  %v874_v56 = vld [vmem:[#allocation7 + $0x380] sm:$0xff]  ;;  %v889_v59 = vld [vmem:[#allocation7 + $0x3f8] sm:$0xff] }
 0x17c   :  { %v1727_v7 = vpack.c.bf16 %v828_v62, %v822_v61  ;;  %v880_v58 = vld [vmem:[#allocation7 + $0x3b0] sm:$0xff]  ;;  %v893_v61 = vld [vmem:[#allocation7 + $0x418] sm:$0xff]  ;;  %v931_v43 = vld [vmem:[#allocation7 + $0x548] sm:$0xff] }
 0x17d   :  { %756 = vmatmul.mubr.f32.vlgmr.msra.gmra.mrb[4].mxu1 %v2380_v48  ;;  %1146 = vmatmul.mubr.f32.vlgmr.msra.gmra.mrb[2].mxu0 %v2391_v4  ;;  %v1715_v48 = vpack.c.bf16 %v792_v17, %v786_v26  ;;  %v857_v26 = vld [vmem:[#allocation7 + $0x2f8] sm:$0xff] }
 0x17e   :  { %1708 = vmatpush1.bf16.msra.mxu1 %v1707_v5  ;;  %1836 = vmatpush1.bf16.msra.mxu0 %v1835_v8  ;;  %v839_v5 = vld [vmem:[#allocation7 + $0x268] sm:$0xff]  ;;  %v834_v8 = vld [vmem:[#allocation7 + $0x240] sm:$0xff] }
 0x17f   :  { %1710 = vmatprep.subr.bf16.mxu1 %v1709_v9  ;;  %1838 = vmatprep.subr.bf16.mxu0 %v1837_v11  ;;  %v840_v9 = vld [vmem:[#allocation7 + $0x270] sm:$0xff]  ;;  %v1729_v11 = vpack.c.bf16 %v841_v3, %v835_v41  ;;  %v1857_v13 = vpack.c.bf16 %v845_v6, %v839_v5  ;;  %v1871_v41 = vpack.c.bf16 %v880_v58, %v874_v56  ;;  %v886_v3 = vld [vmem:[#allocation7 + $0x3e0] sm:$0xff]  ;;  %v901_v6 = vld [vmem:[#allocation7 + $0x458] sm:$0xff] }
 0x180   :  { %1074 = vmatprep.mubr.f32.mxu1 %v2384_v57  ;;  %1216 = vmatprep.mubr.f32.mxu0 %v2384_v57  ;;  %v1731_v17 = vpack.c.bf16 %v840_v9, %v834_v8  ;;  %v892_v5 = vld [vmem:[#allocation7 + $0x410] sm:$0xff]  ;;  %v905_v8 = vld [vmem:[#allocation7 + $0x478] sm:$0xff]  ;;  %v943_v56 = vld [vmem:[#allocation7 + $0x5a8] sm:$0xff] }
 0x182   :  { %1712 = vmatpush1.bf16.msra.mxu1 %v1711_v24  ;;  %1840 = vmatpush1.bf16.msra.mxu0 %v1839_v19  ;;  %v851_v24 = vld [vmem:[#allocation7 + $0x2c8] sm:$0xff]  ;;  %v846_v19 = vld [vmem:[#allocation7 + $0x2a0] sm:$0xff] }
 0x183   :  { %1714 = vmatprep.subr.bf16.mxu1 %v1713_v21  ;;  %1842 = vmatprep.subr.bf16.mxu0 %v1841_v23  ;;  %v852_v21 = vld [vmem:[#allocation7 + $0x2d0] sm:$0xff]  ;;  %v1733_v23 = vpack.c.bf16 %v853_v16, %v847_v12  ;;  %v1861_v28 = vpack.c.bf16 %v857_v26, %v851_v24  ;;  %v1875_v12 = vpack.c.bf16 %v892_v5, %v886_v3  ;;  %v898_v16 = vld [vmem:[#allocation7 + $0x440] sm:$0xff]  ;;  %v913_v26 = vld [vmem:[#allocation7 + $0x4b8] sm:$0xff] }
 0x184   :  { %v1735_v33 = vpack.c.bf16 %v852_v21, %v846_v19  ;;  %v904_v24 = vld [vmem:[#allocation7 + $0x470] sm:$0xff]  ;;  %v917_v19 = vld [vmem:[#allocation7 + $0x4d8] sm:$0xff]  ;;  %v946_v5 = vld [vmem:[#allocation7 + $0x5c0] sm:$0xff] }
 0x186   :  { %1716 = vmatpush1.bf16.msra.mxu1 %v1715_v48  ;;  %1844 = vmatpush1.bf16.msra.mxu0 %v1843_v34  ;;  %v863_v48 = vld [vmem:[#allocation7 + $0x328] sm:$0xff]  ;;  %v858_v34 = vld [vmem:[#allocation7 + $0x300] sm:$0xff] }
 0x187   :  { %1718 = vmatprep.subr.bf16.mxu1 %v1717_v35  ;;  %1846 = vmatprep.subr.bf16.mxu0 %v1845_v37  ;;  %v864_v35 = vld [vmem:[#allocation7 + $0x330] sm:$0xff]  ;;  %v1737_v37 = vpack.c.bf16 %v865_v31, %v859_v27  ;;  %v1865_v40 = vpack.c.bf16 %v869_v32, %v863_v48  ;;  %v1879_v27 = vpack.c.bf16 %v904_v24, %v898_v16  ;;  %v910_v31 = vld [vmem:[#allocation7 + $0x4a0] sm:$0xff]  ;;  %v925_v32 = vld [vmem:[#allocation7 + $0x518] sm:$0xff] }
 0x188   :  { %v1739_v49 = vpack.c.bf16 %v864_v35, %v858_v34  ;;  %v916_v48 = vld [vmem:[#allocation7 + $0x4d0] sm:$0xff]  ;;  %v929_v34 = vld [vmem:[#allocation7 + $0x538] sm:$0xff]  ;;  %v1312_v16 = vld [vmem:[%s2550_s10 + $0x98] sm:$0xff] }
 0x189   :  { %v1295_v24 = vld [vmem:[%s2550_s10 + $0x10] sm:$0xff] }
 0x18a   :  { %1720 = vmatpush1.bf16.msra.mxu1 %v1719_v46  ;;  %1848 = vmatpush1.bf16.msra.mxu0 %v1847_v50  ;;  %v875_v46 = vld [vmem:[#allocation7 + $0x388] sm:$0xff]  ;;  %v870_v50 = vld [vmem:[#allocation7 + $0x360] sm:$0xff] }
 0x18b   :  { %1722 = vmatprep.subr.bf16.mxu1 %v1721_v51  ;;  %1850 = vmatprep.subr.bf16.mxu0 %v1849_v53  ;;  %v876_v51 = vld [vmem:[#allocation7 + $0x390] sm:$0xff]  ;;  %v1741_v53 = vpack.c.bf16 %v877_v45, %v871_v38  ;;  %v1869_v55 = vpack.c.bf16 %v881_v47, %v875_v46  ;;  %v1883_v38 = vpack.c.bf16 %v916_v48, %v910_v31  ;;  %v922_v45 = vld [vmem:[#allocation7 + $0x500] sm:$0xff]  ;;  %v937_v47 = vld [vmem:[#allocation7 + $0x578] sm:$0xff] }
 0x18c   :  { %v1743_v62 = vpack.c.bf16 %v876_v51, %v870_v50  ;;  %v928_v46 = vld [vmem:[#allocation7 + $0x530] sm:$0xff]  ;;  %v941_v50 = vld [vmem:[#allocation7 + $0x598] sm:$0xff]  ;;  %v1316_v31 = vld [vmem:[%s2550_s10 + $0xb8] sm:$0xff] }
 0x18e   :  { %1724 = vmatpush1.bf16.msra.mxu1 %v1723_v60  ;;  %1852 = vmatpush1.bf16.msra.mxu0 %v1851_v63  ;;  %v887_v60 = vld [vmem:[#allocation7 + $0x3e8] sm:$0xff]  ;;  %v882_v63 = vld [vmem:[#allocation7 + $0x3c0] sm:$0xff] }
 0x18f   :  { %1726 = vmatprep.subr.bf16.mxu1 %v1725_v0  ;;  %1854 = vmatprep.subr.bf16.mxu0 %v1853_v42  ;;  %v888_v0 = vld [vmem:[#allocation7 + $0x3f0] sm:$0xff]  ;;  %v1745_v42 = vpack.c.bf16 %v889_v59, %v883_v54  ;;  %v1873_v2 = vpack.c.bf16 %v893_v61, %v887_v60  ;;  %v1887_v54 = vpack.c.bf16 %v928_v46, %v922_v45  ;;  %v934_v59 = vld [vmem:[#allocation7 + $0x560] sm:$0xff]  ;;  %v949_v61 = vld [vmem:[#allocation7 + $0x5d8] sm:$0xff] }
 0x190   :  { %v1747_v9 = vpack.c.bf16 %v888_v0, %v882_v63  ;;  %v940_v60 = vld [vmem:[#allocation7 + $0x590] sm:$0xff]  ;;  %v953_v63 = vld [vmem:[#allocation7 + $0x5f8] sm:$0xff]  ;;  %v1320_v45 = vld [vmem:[%s2550_s10 + $0xd8] sm:$0xff] }
 0x191   :  { %v1303_v46 = vld [vmem:[%s2550_s10 + $0x50] sm:$0xff] }
 0x192   :  { %1728 = vmatpush1.bf16.msra.mxu1 %v1727_v7  ;;  %1856 = vmatpush1.bf16.msra.mxu0 %v1855_v10  ;;  %v899_v7 = vld [vmem:[#allocation7 + $0x448] sm:$0xff]  ;;  %v894_v10 = vld [vmem:[#allocation7 + $0x420] sm:$0xff] }
 0x193   :  { %1730 = vmatprep.subr.bf16.mxu1 %v1729_v11  ;;  %1858 = vmatprep.subr.bf16.mxu0 %v1857_v13  ;;  %v900_v11 = vld [vmem:[#allocation7 + $0x450] sm:$0xff]  ;;  %v1749_v13 = vpack.c.bf16 %v901_v6, %v895_v1  ;;  %v1877_v15 = vpack.c.bf16 %v905_v8, %v899_v7  ;;  %v1765_v1 = vpack.c.bf16 %v949_v61, %v943_v56  ;;  %v1323_v56 = vld [vmem:[%s2550_s10 + $0xf0] sm:$0xff] }
 0x194   :  { %v1751_v21 = vpack.c.bf16 %v900_v11, %v894_v10  ;;  %v952_v6 = vld [vmem:[#allocation7 + $0x5f0] sm:$0xff]  ;;  %v1310_v10 = vld [vmem:[%s2550_s10 + $0x88] sm:$0xff]  ;;  %v1307_v61 = vld [vmem:[%s2550_s10 + $0x70] sm:$0xff] }
 0x195   :  { %v1895_v8 = vpack.c.bf16 %v952_v6, %v946_v5  ;;  %v954_v5 = vld [vmem:[%s2549_s9] sm:$0x3f]  ;;  %v533_v6 = vsub.s32 3, %v2269_v25 }
 0x196   :  { %1732 = vmatpush1.bf16.msra.mxu1 %v1731_v17  ;;  %1860 = vmatpush1.bf16.msra.mxu0 %v1859_v22  ;;  %v911_v17 = vld [vmem:[#allocation7 + $0x4a8] sm:$0xff]  ;;  %v906_v22 = vld [vmem:[#allocation7 + $0x480] sm:$0xff] }
 0x197   :  { %1734 = vmatprep.subr.bf16.mxu1 %v1733_v23  ;;  %1862 = vmatprep.subr.bf16.mxu0 %v1861_v28  ;;  %v912_v23 = vld [vmem:[#allocation7 + $0x4b0] sm:$0xff]  ;;  %v1753_v28 = vpack.c.bf16 %v913_v26, %v907_v14  ;;  %v1881_v30 = vpack.c.bf16 %v917_v19, %v911_v17  ;;  %v1296_v17 = vld [vmem:[%s2550_s10 + $0x18] sm:$0xff] }
 0x198   :  { %v1755_v35 = vpack.c.bf16 %v912_v23, %v906_v22  ;;  %v1903_v19 = vpack.c.bf16 %v1296_v17, %v1295_v24  ;;  %v1314_v22 = vld [vmem:[%s2550_s10 + $0xa8] sm:$0xff] }
 0x19a   :  { %1736 = vmatpush1.bf16.msra.mxu1 %v1735_v33  ;;  %1864 = vmatpush1.bf16.msra.mxu0 %v1863_v36  ;;  %v923_v33 = vld [vmem:[#allocation7 + $0x508] sm:$0xff]  ;;  %v918_v36 = vld [vmem:[#allocation7 + $0x4e0] sm:$0xff] }
 0x19b   :  { %1738 = vmatprep.subr.bf16.mxu1 %v1737_v37  ;;  %1866 = vmatprep.subr.bf16.mxu0 %v1865_v40  ;;  %v924_v37 = vld [vmem:[#allocation7 + $0x510] sm:$0xff]  ;;  %v1757_v40 = vpack.c.bf16 %v925_v32, %v919_v29  ;;  %v1885_v44 = vpack.c.bf16 %v929_v34, %v923_v33  ;;  %v1299_v32 = vld [vmem:[%s2550_s10 + $0x30] sm:$0xff]  ;;  %v1300_v33 = vld [vmem:[%s2550_s10 + $0x38] sm:$0xff] }
 0x19c   :  { %v1759_v51 = vpack.c.bf16 %v924_v37, %v918_v36  ;;  %v1911_v34 = vpack.c.bf16 %v1300_v33, %v1299_v32  ;;  %v1318_v36 = vld [vmem:[%s2550_s10 + $0xc8] sm:$0xff] }
 0x19e   :  { %1740 = vmatpush1.bf16.msra.mxu1 %v1739_v49  ;;  %1868 = vmatpush1.bf16.msra.mxu0 %v1867_v52  ;;  %v935_v49 = vld [vmem:[#allocation7 + $0x568] sm:$0xff]  ;;  %v930_v52 = vld [vmem:[#allocation7 + $0x540] sm:$0xff] }
 0x19f   :  { %1742 = vmatprep.subr.bf16.mxu1 %v1741_v53  ;;  %1870 = vmatprep.subr.bf16.mxu0 %v1869_v55  ;;  %v936_v53 = vld [vmem:[#allocation7 + $0x570] sm:$0xff]  ;;  %v1761_v55 = vpack.c.bf16 %v937_v47, %v931_v43  ;;  %v1889_v58 = vpack.c.bf16 %v941_v50, %v935_v49  ;;  %v1304_v49 = vld [vmem:[%s2550_s10 + $0x58] sm:$0xff] }
 0x1a0   :  { %v1763_v0 = vpack.c.bf16 %v936_v53, %v930_v52  ;;  %v1321_v50 = vld [vmem:[%s2550_s10 + $0xe0] sm:$0xff]  ;;  %v1919_v52 = vpack.c.bf16 %v1304_v49, %v1303_v46 }
 0x1a2   :  { %1744 = vmatpush1.bf16.msra.mxu1 %v1743_v62  ;;  %1872 = vmatpush1.bf16.msra.mxu0 %v1871_v41  ;;  %v947_v62 = vld [vmem:[#allocation7 + $0x5c8] sm:$0xff]  ;;  %v942_v41 = vld [vmem:[#allocation7 + $0x5a0] sm:$0xff] }
 0x1a3   :  { %1746 = vmatprep.subr.bf16.mxu1 %v1745_v42  ;;  %1874 = vmatprep.subr.bf16.mxu0 %v1873_v2  ;;  %v1891_v42 = vpack.c.bf16 %v940_v60, %v934_v59  ;;  %v948_v2 = vld [vmem:[#allocation7 + $0x5d0] sm:$0xff]  ;;  %v1893_v3 = vpack.c.bf16 %v953_v63, %v947_v62  ;;  %v1308_v62 = vld [vmem:[%s2550_s10 + $0x78] sm:$0xff] }
 0x1a4   :  { %v1767_v7 = vpack.c.bf16 %v948_v2, %v942_v41  ;;  %v1927_v63 = vpack.c.bf16 %v1308_v62, %v1307_v61  ;;  %v517_v2 = vld [vmem:[%s2547_s7] sm:$0x3f] }
 0x1a6   :  { %1748 = vmatpush1.bf16.msra.mxu1 %v1747_v9  ;;  %1876 = vmatpush1.bf16.msra.mxu0 %v1875_v12  ;;  %v1309_v9 = vld [vmem:[%s2550_s10 + $0x80] sm:$0xff] }
 0x1a7   :  { %1750 = vmatprep.subr.bf16.mxu1 %v1749_v13  ;;  %1878 = vmatprep.subr.bf16.mxu0 %v1877_v15  ;;  %v1897_v11 = vpack.c.bf16 %v1310_v10, %v1309_v9  ;;  %v1293_v12 = vld [vmem:[%s2550_s10] sm:$0xff]  ;;  %v1294_v13 = vld [vmem:[%s2550_s10 + $0x8] sm:$0xff]  ;;  %v1311_v15 = vld [vmem:[%s2550_s10 + $0x90] sm:$0xff]  ;;  %v526_v9 = vrot.slane %v517_v2, %v2372_v20  ;;  %v963_v10 = vrot.slane %v954_v5, %v2372_v20 }
 0x1a8   :  { %v1899_v14 = vpack.c.bf16 %v1294_v13, %v1293_v12  ;;  %v1901_v26 = vpack.c.bf16 %v1312_v16, %v1311_v15  ;;  %v534_v13 = vrot.slane %v517_v2, %v533_v6 }
 0x1a9   :  { %v1933_v16 = vadd.f32 %v963_v10, %v526_v9 }
 0x1aa   :  { %1752 = vmatpush1.bf16.msra.mxu1 %v1751_v21  ;;  %1880 = vmatpush1.bf16.msra.mxu0 %v1879_v27  ;;  %v1313_v21 = vld [vmem:[%s2550_s10 + $0xa0] sm:$0xff] }
 0x1ab   :  { %1754 = vmatprep.subr.bf16.mxu1 %v1753_v28  ;;  %1882 = vmatprep.subr.bf16.mxu0 %v1881_v30  ;;  %v1905_v23 = vpack.c.bf16 %v1314_v22, %v1313_v21  ;;  %v1297_v27 = vld [vmem:[%s2550_s10 + $0x20] sm:$0xff]  ;;  %v1298_v28 = vld [vmem:[%s2550_s10 + $0x28] sm:$0xff]  ;;  %v1315_v30 = vld [vmem:[%s2550_s10 + $0xb0] sm:$0xff] }
 0x1ac   :  { %v1907_v29 = vpack.c.bf16 %v1298_v28, %v1297_v27  ;;  %v1909_v48 = vpack.c.bf16 %v1316_v31, %v1315_v30 }
 0x1ae   :  { %1756 = vmatpush1.bf16.msra.mxu1 %v1755_v35  ;;  %1884 = vmatpush1.bf16.msra.mxu0 %v1883_v38  ;;  %v1317_v35 = vld [vmem:[%s2550_s10 + $0xc0] sm:$0xff] }
 0x1af   :  { %1758 = vmatprep.subr.bf16.mxu1 %v1757_v40  ;;  %1886 = vmatprep.subr.bf16.mxu0 %v1885_v44  ;;  %v1913_v37 = vpack.c.bf16 %v1318_v36, %v1317_v35  ;;  %v1301_v38 = vld [vmem:[%s2550_s10 + $0x40] sm:$0xff]  ;;  %v1302_v40 = vld [vmem:[%s2550_s10 + $0x48] sm:$0xff]  ;;  %v1319_v44 = vld [vmem:[%s2550_s10 + $0xd0] sm:$0xff]  ;;  %v537_v35 = vsub.s32 4, %v2269_v25  ;;  %v541_v36 = vsub.s32 5, %v2269_v25 }
 0x1b0   :  { %v1915_v43 = vpack.c.bf16 %v1302_v40, %v1301_v38  ;;  %v1917_v47 = vpack.c.bf16 %v1320_v45, %v1319_v44 }
 0x1b1   :  { %v979_v40 = vrot.slane %v954_v5, %v541_v36  ;;  %v538_v44 = vrot.slane %v517_v2, %v537_v35 }
 0x1b2   :  { %1760 = vmatpush1.bf16.msra.mxu1 %v1759_v51  ;;  %1888 = vmatpush1.bf16.msra.mxu0 %v1887_v54  ;;  %v1322_v51 = vld [vmem:[%s2550_s10 + $0xe8] sm:$0xff]  ;;  %v1305_v54 = vld [vmem:[%s2550_s10 + $0x60] sm:$0xff] }
 0x1b3   :  { %1762 = vmatprep.subr.bf16.mxu1 %v1761_v55  ;;  %1890 = vmatprep.subr.bf16.mxu0 %v1889_v58  ;;  %v1921_v53 = vpack.c.bf16 %v1322_v51, %v1321_v50  ;;  %v1306_v55 = vld [vmem:[%s2550_s10 + $0x68] sm:$0xff]  ;;  %v1324_v58 = vld [vmem:[%s2550_s10 + $0xf8] sm:$0xff] }
 0x1b4   :  { %v1923_v59 = vpack.c.bf16 %v1306_v55, %v1305_v54  ;;  %v1925_v60 = vpack.c.bf16 %v1324_v58, %v1323_v56 }
 0x1b6   :  { %1764 = vmatpush1.bf16.msra.mxu1 %v1763_v0  ;;  %1892 = vmatpush1.bf16.msra.mxu0 %v1891_v42 }
 0x1b7   :  { %1766 = vmatprep.subr.bf16.mxu1 %v1765_v1  ;;  %1894 = vmatprep.subr.bf16.mxu0 %v1893_v3  ;;  %v529_v3 = vsub.s32 2, %v2269_v25 }
 0x1b9   :  { %v967_v12 = vrot.slane %v954_v5, %v529_v3 }
 0x1ba   :  { %1768 = vmatpush1.bf16.msra.mxu1 %v1767_v7  ;;  %1896 = vmatpush1.bf16.msra.mxu0 %v1895_v8  ;;  %v522_v7 = vrot.slane %v517_v2, %v2366_v18  ;;  %v959_v8 = vrot.slane %v954_v5, %v2366_v18 }
 0x1bb   :  { %1898 = vmatprep.subr.bf16.mxu1 %v1897_v11  ;;  %v530_v11 = vrot.slane %v517_v2, %v529_v3 }
 0x1bc   :  { %v1931_v15 = vadd.f32 %v959_v8, %v522_v7 }
 0x1bd   :  { %1075 = vmatmul.mubr.f32.vlgmr.msra.gmra.mrb[2].mxu1 %v2391_v4  ;;  %1217 = vmatmul.mubr.f32.vlgmr.msra.gmra.mrb[4].mxu0 %v2391_v4  ;;  %v1935_v24 = vadd.f32 %v967_v12, %v530_v11 }
 0x1be   :  { %1900 = vmatpush3.bf16.msra.mxu1 %v1899_v14  ;;  %v971_v14 = vrot.slane %v954_v5, %v533_v6 }
 0x1bf   :  { %1902 = vmatprep.subr.bf16.mxu1 %v1901_v26 }
 0x1c2   :  { %1904 = vmatpush3.bf16.msra.mxu1 %v1903_v19  ;;  %v1937_v19 = vadd.f32 %v971_v14, %v534_v13 }
 0x1c3   :  { %1906 = vmatprep.subr.bf16.mxu1 %v1905_v23 }
 0x1c6   :  { %1908 = vmatpush3.bf16.msra.mxu1 %v1907_v29 }
 0x1c7   :  { %1910 = vmatprep.subr.bf16.mxu1 %v1909_v48 }
 0x1ca   :  { %1912 = vmatpush3.bf16.msra.mxu1 %v1911_v34 }
 0x1cb   :  { %1914 = vmatprep.subr.bf16.mxu1 %v1913_v37  ;;  %v975_v37 = vrot.slane %v954_v5, %v537_v35 }
 0x1ce   :  { %1916 = vmatpush3.bf16.msra.mxu1 %v1915_v43 }
 0x1cf   :  { %1918 = vmatprep.subr.bf16.mxu1 %v1917_v47  ;;  %v542_v47 = vrot.slane %v517_v2, %v541_v36 }
 0x1d2   :  { %1920 = vmatpush3.bf16.msra.mxu1 %v1919_v52 }
 0x1d3   :  { %1922 = vmatprep.subr.bf16.mxu1 %v1921_v53 }
 0x1d6   :  { %1924 = vmatpush3.bf16.msra.mxu1 %v1923_v59 }
 0x1d7   :  { %1926 = vmatprep.subr.bf16.mxu1 %v1925_v60 }
 0x1da   :  { %1928 = vmatpush3.bf16.msra.mxu1 %v1927_v63 }
 0x250   :  { %v757_v0 = vpop.f32.mrb[4].mxu1  ;;  %v1147_v41 = vpop.f32.mrb[2].mxu0 }
 0x251   :  { %v759_v42 = vpop.f32.mrb[5].mxu1  ;;  %v1149_v1 = vpop.f32.mrb[3].mxu0  ;;  %v1936_v18 = vadd.f32 %v1935_v24, %v1147_v41  ;;  %v758_v53 = vadd.f32 %v757_v0, %v538_v44 }
 0x252   :  { %v1938_v30 = vadd.f32 %v1937_v19, %v1149_v1  ;;  %v760_v55 = vadd.f32 %v759_v42, %v542_v47 }
 0x253   :  { %v1438_v20 = vmul.f32 -1.442695, %v1936_v18 }
 0x254   :  { %v1439_v31 = vmul.f32 -1.442695, %v1938_v30 }
 0x290   :  { %v1076_v26 = vpop.f32.mrb[2].mxu1  ;;  %v1218_v17 = vpop.f32.mrb[4].mxu0 }
 0x291   :  { %v1932_v21 = vadd.f32 %v1931_v15, %v1076_v26  ;;  %v1078_v22 = vpop.f32.mrb[3].mxu1  ;;  %v1220_v23 = vpop.f32.mrb[5].mxu0  ;;  %v1219_v46 = vadd.f32 %v1218_v17, %v975_v37 }
 0x292   :  { %v1934_v27 = vadd.f32 %v1933_v16, %v1078_v22  ;;  %v1221_v50 = vadd.f32 %v1220_v23, %v979_v40 }
 0x293   :  { %v1436_v28 = vmul.f32 -1.442695, %v1932_v21 }
 0x294   :  { %v1437_v29 = vmul.f32 -1.442695, %v1934_v27 }
 0x295   :  { %1960 = vpow2.f32 %v1436_v28 }
 0x296   :  { %1962 = vpow2.f32 %v1437_v29 }
 0x297   :  { %1964 = vpow2.f32 %v1438_v20 }
 0x298   :  { %1966 = vpow2.f32 %v1439_v31 }
 0x29f   :  { %v1961_v48 = vpop.eup %1960 }
 0x2a0   :  { %v1963_v32 = vpop.eup %1962  ;;  %v1231_v33 = vadd.f32 1.0, %v1961_v48 }
 0x2a1   :  { %v1232_v34 = vadd.f32 1.0, %v1963_v32  ;;  %v1965_v38 = vpop.eup %1964 }
 0x2a2   :  { %1968 = vrcp.f32 %v1231_v33  ;;  %v1967_v43 = vpop.eup %1966  ;;  %v1245_v45 = vadd.f32 1.0, %v1965_v38 }
 0x2a3   :  { %1970 = vrcp.f32 %v1232_v34  ;;  %v1246_v49 = vadd.f32 1.0, %v1967_v43 }
 0x2a4   :  { %1972 = vrcp.f32 %v1245_v45 }
 0x2a5   :  { %1974 = vrcp.f32 %v1246_v49 }
 0x2ac   :  { %v1969_v51 = vpop.eup %1968 }
 0x2ad   :  { %v1971_v52 = vpop.eup %1970  ;;  %v1251_v54 = vmul.f32 %v1969_v51, %v1219_v46 }
 0x2ae   :  { %v1252_v56 = vmul.f32 %v1971_v52, %v1221_v50  ;;  %v1973_v59 = vpop.eup %1972 }
 0x2af   :  { %v1253_v58 = vadd.f32 %v1251_v54, %v758_v53  ;;  %v1975_v60 = vpop.eup %1974  ;;  %v1257_v61 = vsub.f32 1.0, %v1973_v59  ;;  %v1261_v2 = vmul.f32 %v1973_v59, %v2391_v4 }
 0x2b0   :  { %v1254_v25 = vadd.f32 %v1252_v56, %v760_v55  ;;  %v1258_v63 = vsub.f32 1.0, %v1975_v60  ;;  %v1262_v0 = vmul.f32 %v1975_v60, %v2384_v57 }
 0x2b1   :  { %1976 = vtanh.f32 %v1253_v58 }
 0x2b2   :  { %1978 = vtanh.f32 %v1254_v25 }
 0x2bb   :  { %v1977_v62 = vpop.eup %1976 }
 0x2bc   :  { %v1979_v41 = vpop.eup %1978  ;;  %v1259_v1 = vmul.f32 %v1977_v62, %v1257_v61 }
 0x2bd   :  { %v1260_v3 = vmul.f32 %v1979_v41, %v1258_v63 }
 0x2be   :  { %v1263_v5 = vadd.f32 %v1261_v2, %v1259_v1 }
 0x2bf   :  { %v1264_v42 = vadd.f32 %v1262_v0, %v1260_v3 }
 0x2c1   :  { %1389 = vmatprep.mubr.f32.mxu1 %v1264_v42  ;;  %v1267_v6 = vcombine.low %v1263_v5, %v1264_v42  ;;  %v1268_v7 = vcombine.high %v1263_v5, %v1264_v42 }
 0x2c2   :  { %1390 = vmatmul.mubr.f32.vlgmr.msra.gmra.mrb[6].mxu1 %v1263_v5 }
 0x2c3   :  { %v1275_v8 = vrot.slane %v1267_v6, %v2306_v39  ;;  %v1282_v9 = vrot.slane %v1268_v7, %v2306_v39  ;;  %1440 = vst.sshfl [vmem:[#allocation9] sm:$0x33 pattern:$0x76325410] %v1267_v6 }
 0x2c4   :  { %1441 = vst.sshfl [vmem:[#allocation9 + $0x8] sm:$0x33 pattern:$0x76325410] %v1268_v7 }
 0x2c5   :  { %v1283_v10 = vcombine.high %v1275_v8, %v1275_v8  ;;  %v1284_v11 = vcombine.high %v1282_v9, %v1282_v9 }
 0x2c7   :  { %1290 = vst [vmem:[#allocation9 + $0x4] sm:$0xf] %v1283_v10  ;;  %1292 = vst [vmem:[#allocation9 + $0xc] sm:$0xf] %v1284_v11 }
 0x395   :  { %v1474_v4 = vpop.f32.mrb[6].mxu1 }
 0x396   :  { %v1475_v12 = vpop.f32.mrb[7].mxu1 }
 0x397   :  { %v1476_v13 = vadd.f32 %v1475_v12, %v1474_v4 }
 0x399   :  { %1980 = vtanh.f32 %v1476_v13 }
 0x3a3   :  { %v1981_v57 = vpop.eup %1980 }
 0x3a4   :  { %1397 = vst.msk [vmem:[#allocation8] sm:$0xff] %vm1396_vm3, %v1981_v57 }
 0x3a5   :  { %1402 = vsyncadd [#allocation4], 96  ;;  %s2113_s7 = smov [#allocation8]  }
 0x3a6   :  { %s1403_s9 = sshll.u32 %s2113_s7, 4  ;;  %s1404_s9 = int_to_ptr.vmem [resolvable:$true] %s1403_s9 }
 0x3a7   :  { %s2052_s10 = scalar_lea.vmem %s1404_s9, 32  ;;  %s2056_s0 = scalar_lea.vmem %s1404_s9, 128 }
 0x3a8   :  { %p2053_p10 = scmp.ne.s32.totalorder %s1404_s9, %s2052_s10  ;;  %p2057_p11 = scmp.lt.s32.totalorder %s1404_s9, %s1404_s9 }
 0x3a9   :  { %p2058_p12 = scmp.lt.s32.totalorder %s2056_s0, %s2052_s10 }
 0x3ab   :  { %p2059_p13 = por %p2058_p12, %p2057_p11 }
 0x3ad   :  { %p2060_p0 = pnand %p2059_p13, %p2053_p10 }
 0x3af   :  { %2063 = shalt.err (!%p2060_p0)
}
 0x3b0   :  { %s2064_s27 = scalar_lea.hbm %s2551_s11, 32 }
 0x3b1   :  { %p2065_p1 = scmp.ne.s32.totalorder %s2551_s11, %s2064_s27  ;;  %p2068_p2 = scmp.lt.u32.totalorder %s2064_s27, %s2551_s11 }
 0x3b3   :  { %p2070_p3 = pnand %p2068_p2, %p2065_p1 }
 0x3b5   :  { %2073 = shalt.err (!%p2070_p3)
}
 0x3b6   :  { %s2114_s15 = smov 32   ;;  %s2115_s17 = smov 2  }
 0x3b7   :  { %1409 = dma.vmem_to_hbm [thread:$0]  %s1404_s9, 32, %s2551_s11, [#allocation4], %s2114_s15, %s2114_s15, %s2115_s17  }
 0x3b8   :  { %1414 = vsyncadd [#allocation10], 192  ;;  %s2116_s14 = smov [#allocation9]  }
 0x3b9   :  { %s1415_s16 = sshll.u32 %s2116_s14, 4  ;;  %s1416_s16 = int_to_ptr.vmem [resolvable:$true] %s1415_s16 }
 0x3ba   :  { %s2074_s19 = scalar_lea.vmem %s1416_s16, 64  ;;  %s2078_s20 = scalar_lea.vmem %s1416_s16, 256 }
 0x3bb   :  { %p2075_p4 = scmp.ne.s32.totalorder %s1416_s16, %s2074_s19  ;;  %p2079_p5 = scmp.lt.s32.totalorder %s1416_s16, %s1416_s16 }
 0x3bc   :  { %p2080_p6 = scmp.lt.s32.totalorder %s2078_s20, %s2074_s19 }
 0x3be   :  { %p2081_p7 = por %p2080_p6, %p2079_p5 }
 0x3c0   :  { %p2082_p8 = pnand %p2081_p7, %p2075_p4 }
 0x3c2   :  { %2085 = shalt.err (!%p2082_p8)
}
 0x3c3   :  { %s2086_s24 = scalar_lea.hbm %s2552_s12, 64 }
 0x3c4   :  { %p2087_p9 = scmp.ne.s32.totalorder %s2552_s12, %s2086_s24  ;;  %p2090_p10 = scmp.lt.u32.totalorder %s2086_s24, %s2552_s12 }
 0x3c6   :  { %p2092_p11 = pnand %p2090_p10, %p2087_p9 }
 0x3c8   :  { %2095 = shalt.err (!%p2092_p11)
}
 0x3c9   :  { %1421 = dma.vmem_to_hbm [thread:$0]  %s1416_s16, 64, %s2552_s12, [#allocation10], %s2108_s22, %s2108_s22, %s2109_s28  }
 0x3ca   :  { %2100 = dma.done.wait [#allocation4], 128  }
 0x3cb   :  { %2101 = vsyncadd [#allocation4], 4294967168 }
 0x3cc   :  { %2102 = dma.done.wait [#allocation10], 256  }
 0x3cd   :  { %2103 = vsyncadd [#allocation10], 4294967040 }
 0x3ce   :  { %1428 = vsyncpa [#allocation3], 1 }
 0x3cf   :  { %1429 = vsyncpa [#allocation6], 1 }
 0x3d0   :  { %1430 = vsyncpa [#allocation4], 1 }
 0x3d1   :  { %1431 = vsyncpa [#allocation10], 1 }

</bundles_post_ra>
